<compile_context>
chip_gen: v7x
topology: tpu7x:2x2x1
jax: 0.10.0
libtpu: 0.0.40
codegen_flags: <defaults>
</compile_context>

<pallas_src>
import functools
import math

import jax
import jax.numpy as jnp
import numpy as np
from jax import lax
from jax.experimental import pallas as pl
from jax.experimental.pallas import tpu as pltpu


# ------------------------------- helpers ----------------------------------- #

def _vmem_limit_bytes():
    """Per-generation scoped-VMEM limit (v7x: 64 MiB/TC, v5e/v6e: 128 MiB)."""
    limit = 48 * 1024 * 1024  # known-good fallback
    try:
        cap = int(pltpu.get_tpu_info().vmem_capacity_bytes)
        if cap > 0:
            limit = min(max(cap * 3 // 4, 32 * 1024 * 1024), 96 * 1024 * 1024)
    except Exception:
        pass
    return limit


def _pick_tile(dim, target, granule):
    """Largest divisor of `dim` <= target that is a multiple of `granule`.

    Falls back to the full extent (always a legal block) if no such divisor exists.
    """
    if dim <= target:
        return dim
    t = (min(target, dim) // granule) * granule
    while t >= granule:
        if dim % t == 0:
            return t
        t -= granule
    return dim


# ----------------------------- tiled linear -------------------------------- #

def _linear_kernel(x_ref, w_ref, b_ref, o_ref, acc_ref):
    """One (tm, tn) output tile; K is the innermost ("arbitrary") grid axis."""
    kk = pl.program_id(2)

    @pl.when(kk == 0)
    def _():
        acc_ref[...] = jnp.zeros_like(acc_ref)

    acc_ref[...] += jnp.dot(x_ref[...], w_ref[...],
                            preferred_element_type=jnp.float32)

    @pl.when(kk == pl.num_programs(2) - 1)
    def _():
        o_ref[...] = (acc_ref[...] + b_ref[...].astype(jnp.float32)).astype(o_ref.dtype)


def linear(x2d, w, b, *, tm=512, tn=512, tk=1024):
    """y = x2d @ w + b.  x2d: (M, K), w: (K, N) (pre-transposed), b: (1, N)."""
    M, K = x2d.shape
    K2, N = w.shape
    assert K == K2 and b.shape == (1, N)
    vmem_limit = _vmem_limit_bytes()
    tm = _pick_tile(M, tm, 8)
    tn = _pick_tile(N, tn, 128)
    tk = _pick_tile(K, tk, 128)
    grid = (M // tm, N // tn, K // tk)

    itemsize = jnp.dtype(x2d.dtype).itemsize
    cost = pl.CostEstimate(
        flops=int(2 * M * N * K),
        transcendentals=0,
        bytes_accessed=int((M * K + K * N + N + M * N) * itemsize),
    )

    return pl.pallas_call(
        _linear_kernel,
        out_shape=jax.ShapeDtypeStruct((M, N), x2d.dtype),
        grid_spec=pltpu.PrefetchScalarGridSpec(
            num_scalar_prefetch=0,
            grid=grid,
            in_specs=[
                pl.BlockSpec((tm, tk), lambda i, j, kk: (i, kk)),
                pl.BlockSpec((tk, tn), lambda i, j, kk: (kk, j)),
                pl.BlockSpec((1, tn), lambda i, j, kk: (0, j)),
            ],
            out_specs=pl.BlockSpec((tm, tn), lambda i, j, kk: (i, j)),
            scratch_shapes=[pltpu.VMEM((tm, tn), jnp.float32)],
        ),
        compiler_params=pltpu.CompilerParams(
            dimension_semantics=("parallel", "parallel", "arbitrary"),
            vmem_limit_bytes=vmem_limit,
        ),
        cost_estimate=cost,
    )(x2d, w, b)


# ----------------------- fused multi-output QKV matmul --------------------- #

def _qkv_kernel(x_ref, w_ref, b_ref, q_ref, k_ref, v_ref, acc_ref, *,
                n_q_blocks, n_k_blocks):
    j = pl.program_id(1)
    kk = pl.program_id(2)

    @pl.when(kk == 0)
    def _():
        acc_ref[...] = jnp.zeros_like(acc_ref)

    acc_ref[...] += jnp.dot(x_ref[...], w_ref[...],
                            preferred_element_type=jnp.float32)

    @pl.when(kk == pl.num_programs(2) - 1)
    def _():
        y = acc_ref[...] + b_ref[...].astype(jnp.float32)

        @pl.when(j < n_q_blocks)
        def _():
            q_ref[...] = y.astype(q_ref.dtype)

        @pl.when(jnp.logical_and(j >= n_q_blocks, j < n_q_blocks + n_k_blocks))
        def _():
            k_ref[...] = y.astype(k_ref.dtype)

        @pl.when(j >= n_q_blocks + n_k_blocks)
        def _():
            v_ref[...] = y.astype(v_ref.dtype)


def qkv_projection(x2d, w_qkv, b_qkv, *, d_model, kv_dim, tm=512, tn=512, tk=1024):
    """Fused QKV projection emitting q, k, v as three outputs (no HBM round trip).

    x2d: (M, K); w_qkv: (K, d_model + 2*kv_dim) fused [wq | wk | wv]; b_qkv: (1, same).
    The j grid axis walks the fused output columns; each j tile belongs to exactly one
    of q/k/v (tn divides both d_model and kv_dim), and that output alone is written.
    """
    M, K = x2d.shape
    n_total = d_model + 2 * kv_dim
    assert w_qkv.shape == (K, n_total) and b_qkv.shape == (1, n_total)
    vmem_limit = _vmem_limit_bytes()

    tm = _pick_tile(M, tm, 8)
    tn = _pick_tile(math.gcd(d_model, kv_dim), tn, 128)
    tk = _pick_tile(K, tk, 128)
    n_q_blocks = d_model // tn
    n_k_blocks = kv_dim // tn
    n_v_blocks = kv_dim // tn
    nj = n_q_blocks + n_k_blocks + n_v_blocks
    grid = (M // tm, nj, K // tk)

    itemsize = jnp.dtype(x2d.dtype).itemsize
    cost = pl.CostEstimate(
        flops=int(2 * M * n_total * K),
        transcendentals=0,
        bytes_accessed=int((M * K + K * n_total + n_total + M * n_total) * itemsize),
    )

    # Output block-index maps clamp into each output's own column range; blocks are
    # only ever written back after their proper j tile has stored them.
    q_spec = pl.BlockSpec((tm, tn), lambda i, j, kk: (i, jnp.minimum(j, n_q_blocks - 1)))
    k_spec = pl.BlockSpec((tm, tn),
                          lambda i, j, kk: (i, jnp.clip(j - n_q_blocks, 0, n_k_blocks - 1)))
    v_spec = pl.BlockSpec(
        (tm, tn),
        lambda i, j, kk: (i, jnp.clip(j - n_q_blocks - n_k_blocks, 0, n_v_blocks - 1)))

    return pl.pallas_call(
        functools.partial(_qkv_kernel, n_q_blocks=n_q_blocks, n_k_blocks=n_k_blocks),
        out_shape=(
            jax.ShapeDtypeStruct((M, d_model), x2d.dtype),
            jax.ShapeDtypeStruct((M, kv_dim), x2d.dtype),
            jax.ShapeDtypeStruct((M, kv_dim), x2d.dtype),
        ),
        grid_spec=pltpu.PrefetchScalarGridSpec(
            num_scalar_prefetch=0,
            grid=grid,
            in_specs=[
                pl.BlockSpec((tm, tk), lambda i, j, kk: (i, kk)),
                pl.BlockSpec((tk, tn), lambda i, j, kk: (kk, j)),
                pl.BlockSpec((1, tn), lambda i, j, kk: (0, j)),
            ],
            out_specs=[q_spec, k_spec, v_spec],
            scratch_shapes=[pltpu.VMEM((tm, tn), jnp.float32)],
        ),
        compiler_params=pltpu.CompilerParams(
            # j must stay "arbitrary": the clamped output index maps require in-order
            # execution on one core; megacore sharding comes from the M (i) axis.
            dimension_semantics=("parallel", "arbitrary", "arbitrary"),
            vmem_limit_bytes=vmem_limit,
        ),
        cost_estimate=cost,
    )(x2d, w_qkv, b_qkv)


# ---------------------------- flash attention ------------------------------ #

def _flash_attention_kernel(qi_ref, ki_ref, q_ref, k_ref, v_ref, o_ref,
                            m_scr, l_scr, acc_scr, *,
                            n_heads, n_kv_heads, head_dim, scale, block_q, block_k):
    t = pl.program_id(1)
    qi = qi_ref[t]
    ki = ki_ref[t]
    group = n_heads // n_kv_heads  # GQA/MQA: query head h reads kv head h // group

    @pl.when(ki == 0)
    def _():
        m_scr[...] = jnp.full_like(m_scr, -jnp.inf)
        l_scr[...] = jnp.zeros_like(l_scr)
        acc_scr[...] = jnp.zeros_like(acc_scr)

    def process(on_diagonal):
        if on_diagonal:
            # block_q == block_k and qi == ki here, so the mask is just col <= row.
            row = lax.broadcasted_iota(jnp.int32, (block_q, block_k), 0)
            col = lax.broadcasted_iota(jnp.int32, (block_q, block_k), 1)
            mask = col <= row

        # TODO(synk): for very large n_heads (>~16) bound this unroll with a head-chunk
        # grid axis to keep vreg pressure in check; full unroll is fine for small H.
        for h in range(n_heads):
            kvh = h // group
            q0 = h * head_dim
            k0 = kvh * head_dim

            # slice refs directly (no (block_q, d_model) materialization); fold the
            # softmax scale into q once per head per tile.
            q_h = q_ref[0, :, q0:q0 + head_dim] * scale
            k_h = k_ref[0, :, k0:k0 + head_dim]
            v_h = v_ref[0, :, k0:k0 + head_dim]

            # q @ k^T via dot_general contracting last axes (no explicit transpose).
            s = lax.dot_general(q_h, k_h, (((1,), (1,)), ((), ())),
                                preferred_element_type=jnp.float32)
            if on_diagonal:
                s = jnp.where(mask, s, -1e30)   # sentinel always in f32

            m_prev = m_scr[:, h:h + 1]
            l_prev = l_scr[:, h:h + 1]

            m_new = jnp.maximum(m_prev, jnp.max(s, axis=-1, keepdims=True))
            alpha = jnp.exp(m_prev - m_new)
            p = jnp.exp(s - m_new)
            l_new = alpha * l_prev + jnp.sum(p, axis=-1, keepdims=True)
            pv = lax.dot_general(p.astype(v_h.dtype), v_h, (((1,), (0,)), ((), ())),
                                 preferred_element_type=jnp.float32)
            acc_new = alpha * acc_scr[:, q0:q0 + head_dim] + pv

            if on_diagonal:
                # The diagonal tile is the last causal contribution for this q block:
                # finalize straight from the fresh values (exact reciprocal).
                o_ref[0, :, q0:q0 + head_dim] = (acc_new / l_new).astype(o_ref.dtype)
            else:
                m_scr[:, h:h + 1] = m_new
                l_scr[:, h:h + 1] = l_new
                acc_scr[:, q0:q0 + head_dim] = acc_new

    @pl.when(ki < qi)      # strictly below the diagonal: no mask needed
    def _():
        process(on_diagonal=False)

    @pl.when(ki == qi)     # diagonal tile: mask + finalize
    def _():
        process(on_diagonal=True)


def flash_attention(q, k, v, *, n_heads, n_kv_heads, block_q=256, block_k=256):
    """Causal flash attention over the natural (B, T, heads*head_dim) layout.

    q: (B, T, n_heads*head_dim); k, v: (B, T, n_kv_heads*head_dim).
    Grid is a flattened lower-triangle (qi, ki) schedule fed through scalar prefetch,
    so upper-triangle tiles cost zero grid steps.  Batch is the parallel axis.
    """
    B, T, qd = q.shape
    head_dim = qd // n_heads
    kv_dim = n_kv_heads * head_dim
    assert qd == n_heads * head_dim
    assert k.shape == (B, T, kv_dim) and v.shape == (B, T, kv_dim)
    assert n_heads % n_kv_heads == 0

    itemsize = jnp.dtype(q.dtype).itemsize
    vmem_limit = _vmem_limit_bytes()
    # q/o + k/v double buffers + f32 accumulator, budgeted at ~60% of the VMEM limit
    # (this is what caps block size on v7x's 64 MiB).
    per_row = (4 * qd + 4 * kv_dim) * itemsize + 4 * qd + 8 * n_heads + 64
    cap_rows = max(8, (int(vmem_limit * 0.6) // per_row) // 8 * 8)
    blk = max(8, min(block_q, block_k, cap_rows))
    blk = _pick_tile(T, blk, 8)
    block_q = block_k = blk
    nq = T // block_q
    scale = 1.0 / math.sqrt(head_dim)

    # Flattened lower-triangle schedule (diagonal tile last within each q row).
    qi_list, ki_list = [], []
    for qi in range(nq):
        for ki in range(qi + 1):
            qi_list.append(qi)
            ki_list.append(ki)
    n_steps = len(qi_list)
    qi_arr = jnp.asarray(np.asarray(qi_list, dtype=np.int32))
    ki_arr = jnp.asarray(np.asarray(ki_list, dtype=np.int32))

    kernel = functools.partial(
        _flash_attention_kernel, n_heads=n_heads, n_kv_heads=n_kv_heads,
        head_dim=head_dim, scale=scale, block_q=block_q, block_k=block_k)

    q_spec = pl.BlockSpec((1, block_q, qd), lambda b, t, qi_r, ki_r: (b, qi_r[t], 0))
    kv_spec = pl.BlockSpec((1, block_k, kv_dim), lambda b, t, qi_r, ki_r: (b, ki_r[t], 0))
    o_spec = pl.BlockSpec((1, block_q, qd), lambda b, t, qi_r, ki_r: (b, qi_r[t], 0))

    cost = pl.CostEstimate(
        flops=int(2 * B * n_heads * T * T * head_dim),           # ~causal half of 4*BHTTd
        transcendentals=int(B * n_heads * T * T // 2),
        bytes_accessed=int((2 * q.size + k.size + v.size) * itemsize),
    )

    return pl.pallas_call(
        kernel,
        out_shape=jax.ShapeDtypeStruct((B, T, qd), q.dtype),
        grid_spec=pltpu.PrefetchScalarGridSpec(
            num_scalar_prefetch=2,
            grid=(B, n_steps),
            in_specs=[q_spec, kv_spec, kv_spec],
            out_specs=o_spec,
            scratch_shapes=[
                pltpu.VMEM((block_q, n_heads), jnp.float32),   # running max
                pltpu.VMEM((block_q, n_heads), jnp.float32),   # running denominator
                pltpu.VMEM((block_q, qd), jnp.float32),        # running numerator
            ],
        ),
        compiler_params=pltpu.CompilerParams(
            dimension_semantics=("parallel", "arbitrary"),
            vmem_limit_bytes=vmem_limit,
        ),
        cost_estimate=cost,
    )(qi_arr, ki_arr, q, k, v)


# --------------------------- module-level wrapper --------------------------- #

def attention_forward(x, params, n_heads, n_kv_heads, *, block_q=256, block_k=256):
    """Mirrors olmo_core Attention.forward for the default configuration."""
    B, T, d_model = x.shape
    head_dim = d_model // n_heads
    kv_dim = n_kv_heads * head_dim

    x2d = x.reshape(B * T, d_model)
    # Fused multi-output QKV projection: x read once, q/k/v written once (no split copy).
    q2d, k2d, v2d = qkv_projection(x2d, params["w_qkv"], params["b_qkv"],
                                   d_model=d_model, kv_dim=kv_dim)
    q = q2d.reshape(B, T, d_model)
    k = k2d.reshape(B, T, kv_dim)
    v = v2d.reshape(B, T, kv_dim)

    # TODO(synk): RoPE, qk_norm, clip_qkv, dropout and intra-document masking
    # (max_doc_len / cu_doc_lens) are disabled by the module defaults and not implemented.

    att = flash_attention(q, k, v, n_heads=n_heads, n_kv_heads=n_kv_heads,
                          block_q=block_q, block_k=block_k)       # (B, T, d_model)

    out = linear(att.reshape(B * T, d_model), params["w_out"], params["b_out"])
    return out.reshape(B, T, d_model)


def init_params(key, d_model, n_heads, n_kv_heads):
    head_dim = d_model // n_heads
    kv_dim = n_kv_heads * head_dim
    keys = jax.random.split(key, 8)

    def lin(kw, kb, in_dim, out_dim):
        bound = 1.0 / math.sqrt(in_dim)
        # stored already transposed: (in_dim, out_dim)
        w = jax.random.uniform(kw, (in_dim, out_dim), jnp.float32, -bound, bound)
        b = jax.random.uniform(kb, (1, out_dim), jnp.float32, -bound, bound)
        return w, b

    w_q, b_q = lin(keys[0], keys[1], d_model, d_model)
    w_k, b_k = lin(keys[2], keys[3], d_model, kv_dim)
    w_v, b_v = lin(keys[4], keys[5], d_model, kv_dim)
    w_out, b_out = lin(keys[6], keys[7], d_model, d_model)
    return dict(
        w_q=w_q, b_q=b_q, w_k=w_k, b_k=b_k, w_v=w_v, b_v=b_v,
        w_out=w_out, b_out=b_out,
        # fused QKV weight/bias used by the Pallas path
        w_qkv=jnp.concatenate([w_q, w_k, w_v], axis=1),
        b_qkv=jnp.concatenate([b_q, b_k, b_v], axis=1),
    )


# Pure-JAX reference for correctness checking.
def attention_reference(x, params, n_heads, n_kv_heads):
    B, T, d_model = x.shape
    hd = d_model // n_heads
    x2d = x.reshape(B * T, d_model)
    q = x2d @ params["w_q"] + params["b_q"]
    k = x2d @ params["w_k"] + params["b_k"]
    v = x2d @ params["w_v"] + params["b_v"]
    q = q.reshape(B, T, n_heads, hd).transpose(0, 2, 1, 3)
    k = k.reshape(B, T, n_kv_heads, hd).transpose(0, 2, 1, 3)
    v = v.reshape(B, T, n_kv_heads, hd).transpose(0, 2, 1, 3)
    if n_kv_heads != n_heads:
        rep = n_heads // n_kv_heads
        k = jnp.repeat(k, rep, axis=1)
        v = jnp.repeat(v, rep, axis=1)
    s = jnp.einsum("bhqd,bhkd->bhqk", q, k) / math.sqrt(hd)
    mask = jnp.tril(jnp.ones((T, T), bool))
    s = jnp.where(mask, s, -jnp.inf)
    p = jax.nn.softmax(s, axis=-1)
    att = jnp.einsum("bhqk,bhkd->bhqd", p, v)
    att = att.transpose(0, 2, 1, 3).reshape(B * T, d_model)
    out = att @ params["w_out"] + params["b_out"]
    return out.reshape(B, T, d_model)


if __name__ == "__main__":
    # Small but non-degenerate shapes: the lower-triangle schedule runs 3 tiles per
    # batch (2 q blocks at the default block size) and the QKV/linear kernels use
    # multiple row blocks.
    B, T, d_model = 2, 512, 256
    n_heads = 4

    key = jax.random.PRNGKey(0)
    kx, kp = jax.random.split(key)
    x = jax.random.normal(kx, (B, T, d_model), jnp.float32)

    # --- MHA (module default: n_kv_heads == n_heads), f32 ---
    params = init_params(kp, d_model, n_heads, n_heads)
    ref = attention_reference(x, params, n_heads, n_heads)
    out = jax.block_until_ready(attention_forward(x, params, n_heads, n_heads))
    assert out.shape == (B, T, d_model)
    assert jnp.allclose(out, ref, atol=2e-2, rtol=2e-2), "f32 MHA mismatch vs reference"

    # --- bf16 run (production dtype: bf16 MXU inputs, f32 accumulation/softmax) ---
    x_bf = x.astype(jnp.bfloat16)
    params_bf = jax.tree_util.tree_map(lambda a: a.astype(jnp.bfloat16), params)
    out_bf = jax.block_until_ready(attention_forward(x_bf, params_bf, n_heads, n_heads))
    assert out_bf.dtype == jnp.bfloat16
    assert jnp.allclose(out_bf.astype(jnp.float32), ref, atol=1e-1, rtol=1e-1), \
        "bf16 mismatch vs reference"

    # --- GQA path (n_kv_heads < n_heads) to validate the grouped kv mapping ---
    n_kv = 2
    params_gqa = init_params(kp, d_model, n_heads, n_kv)
    ref_gqa = attention_reference(x, params_gqa, n_heads, n_kv)
    out_gqa = jax.block_until_ready(attention_forward(x, params_gqa, n_heads, n_kv))
    assert jnp.allclose(out_gqa, ref_gqa, atol=2e-2, rtol=2e-2), "f32 GQA mismatch"

    print("KERNEL_OK")
</pallas_src>

<mosaic_0001>
module attributes {stable_mosaic.version = 11 : i64} {
  func.func @_qkv_kernel(%arg0: i32, %arg1: i32, %arg2: i32, %arg3: memref<512x256xf32, #tpu.memory_space<vmem>>, %arg4: memref<256x256xf32, #tpu.memory_space<vmem>>, %arg5: memref<1x256xf32, #tpu.memory_space<vmem>>, %arg6: memref<512x256xf32, #tpu.memory_space<vmem>>, %arg7: memref<512x256xf32, #tpu.memory_space<vmem>>, %arg8: memref<512x256xf32, #tpu.memory_space<vmem>>, %arg9: memref<512x256xf32, #tpu.memory_space<vmem>>) attributes {dimension_semantics = [#tpu.dimension_semantics<parallel>, #tpu.dimension_semantics<arbitrary>, #tpu.dimension_semantics<arbitrary>], iteration_bounds = array<i64: 2, 3, 1>, scalar_prefetch = 0 : i64, scratch_operands = 1 : i64, tpu.core_type = #tpu.core_type<tc>, window_params = [{transform_indices = @transform_0, window_bounds = array<i64: 512, 256>}, {transform_indices = @transform_1, window_bounds = array<i64: 256, 256>}, {transform_indices = @transform_2, window_bounds = array<i64: 1, 256>}, {transform_indices = @transform_3, window_bounds = array<i64: 512, 256>}, {transform_indices = @transform_4, window_bounds = array<i64: 512, 256>}, {transform_indices = @transform_5, window_bounds = array<i64: 512, 256>}]} {
    %c0_i32 = arith.constant 0 : i32
    %0 = arith.cmpi eq, %arg2, %c0_i32 : i32
    %1 = arith.extui %0 : i1 to i32
    %c0_i32_0 = arith.constant 0 : i32
    %2 = arith.cmpi ne, %1, %c0_i32_0 : i32
    scf.if %2 {
      %cst_10 = arith.constant 0.000000e+00 : f32
      %12 = vector.broadcast %cst_10 : f32 to vector<512x256xf32>
      %c0_11 = arith.constant 0 : index
      %c0_12 = arith.constant 0 : index
      %13 = vector.load %arg9[%c0_11, %c0_12] : memref<512x256xf32, #tpu.memory_space<vmem>>, vector<512x256xf32>
      tpu.vector_store %arg9[%c0_11, %c0_12], %12 {strides = array<i32>} : memref<512x256xf32, #tpu.memory_space<vmem>>, vector<512x256xf32>,
    } else {
    }
    %c0 = arith.constant 0 : index
    %c0_1 = arith.constant 0 : index
    %3 = vector.load %arg9[%c0, %c0_1] : memref<512x256xf32, #tpu.memory_space<vmem>>, vector<512x256xf32>
    %c0_2 = arith.constant 0 : index
    %c0_3 = arith.constant 0 : index
    %4 = vector.load %arg3[%c0_2, %c0_3] : memref<512x256xf32, #tpu.memory_space<vmem>>, vector<512x256xf32>
    %c0_4 = arith.constant 0 : index
    %c0_5 = arith.constant 0 : index
    %5 = vector.load %arg4[%c0_4, %c0_5] : memref<256x256xf32, #tpu.memory_space<vmem>>, vector<256x256xf32>
    %cst = arith.constant dense<0.000000e+00> : vector<512x256xf32>
    %6 = tpu.matmul %4, %5, %cst {dimension_numbers = #tpu.dot_dimension_numbers<[1], [0], [0], [1], [0, 0, 1, 1], [], []>} : vector<512x256xf32>, vector<256x256xf32>, vector<512x256xf32> -> vector<512x256xf32>
    %7 = arith.addf %3, %6 : vector<512x256xf32>
    %c0_6 = arith.constant 0 : index
    %c0_7 = arith.constant 0 : index
    %8 = vector.load %arg9[%c0_6, %c0_7] : memref<512x256xf32, #tpu.memory_space<vmem>>, vector<512x256xf32>
    tpu.vector_store %arg9[%c0_6, %c0_7], %7 {strides = array<i32>} : memref<512x256xf32, #tpu.memory_space<vmem>>, vector<512x256xf32>,
    %c0_i32_8 = arith.constant 0 : i32
    %9 = arith.cmpi eq, %arg2, %c0_i32_8 : i32
    %10 = arith.extui %9 : i1 to i32
    %c0_i32_9 = arith.constant 0 : i32
    %11 = arith.cmpi ne, %10, %c0_i32_9 : i32
    scf.if %11 {
      %c0_10 = arith.constant 0 : index
      %c0_11 = arith.constant 0 : index
      %12 = vector.load %arg9[%c0_10, %c0_11] : memref<512x256xf32, #tpu.memory_space<vmem>>, vector<512x256xf32>
      %c0_12 = arith.constant 0 : index
      %c0_13 = arith.constant 0 : index
      %13 = vector.load %arg5[%c0_12, %c0_13] : memref<1x256xf32, #tpu.memory_space<vmem>>, vector<1x256xf32>
      %14 = vector.broadcast %13 : vector<1x256xf32> to vector<512x256xf32>
      %15 = arith.addf %12, %14 : vector<512x256xf32>
      %c1_i32 = arith.constant 1 : i32
      %16 = arith.cmpi slt, %arg1, %c1_i32 : i32
      %17 = arith.extui %16 : i1 to i32
      %c0_i32_14 = arith.constant 0 : i32
      %18 = arith.cmpi ne, %17, %c0_i32_14 : i32
      scf.if %18 {
        %c0_19 = arith.constant 0 : index
        %c0_20 = arith.constant 0 : index
        %27 = vector.load %arg6[%c0_19, %c0_20] : memref<512x256xf32, #tpu.memory_space<vmem>>, vector<512x256xf32>
        tpu.vector_store %arg6[%c0_19, %c0_20], %15 {strides = array<i32>} : memref<512x256xf32, #tpu.memory_space<vmem>>, vector<512x256xf32>,
      } else {
      }
      %c1_i32_15 = arith.constant 1 : i32
      %19 = arith.cmpi sge, %arg1, %c1_i32_15 : i32
      %c2_i32 = arith.constant 2 : i32
      %20 = arith.cmpi slt, %arg1, %c2_i32 : i32
      %21 = arith.andi %19, %20 : i1
      %22 = arith.extui %21 : i1 to i32
      %c0_i32_16 = arith.constant 0 : i32
      %23 = arith.cmpi ne, %22, %c0_i32_16 : i32
      scf.if %23 {
        %c0_19 = arith.constant 0 : index
        %c0_20 = arith.constant 0 : index
        %27 = vector.load %arg7[%c0_19, %c0_20] : memref<512x256xf32, #tpu.memory_space<vmem>>, vector<512x256xf32>
        tpu.vector_store %arg7[%c0_19, %c0_20], %15 {strides = array<i32>} : memref<512x256xf32, #tpu.memory_space<vmem>>, vector<512x256xf32>,
      } else {
      }
      %c2_i32_17 = arith.constant 2 : i32
      %24 = arith.cmpi sge, %arg1, %c2_i32_17 : i32
      %25 = arith.extui %24 : i1 to i32
      %c0_i32_18 = arith.constant 0 : i32
      %26 = arith.cmpi ne, %25, %c0_i32_18 : i32
      scf.if %26 {
        %c0_19 = arith.constant 0 : index
        %c0_20 = arith.constant 0 : index
        %27 = vector.load %arg8[%c0_19, %c0_20] : memref<512x256xf32, #tpu.memory_space<vmem>>, vector<512x256xf32>
        tpu.vector_store %arg8[%c0_19, %c0_20], %15 {strides = array<i32>} : memref<512x256xf32, #tpu.memory_space<vmem>>, vector<512x256xf32>,
      } else {
      }
    } else {
    }
    return
  }
  func.func @transform_0(%arg0: i32, %arg1: i32, %arg2: i32) -> (i32, i32) {
    %c0_i32 = arith.constant 0 : i32
    return %arg0, %arg2 : i32, i32
  }
  func.func @transform_1(%arg0: i32, %arg1: i32, %arg2: i32) -> (i32, i32) {
    %c0_i32 = arith.constant 0 : i32
    return %arg2, %arg1 : i32, i32
  }
  func.func @transform_2(%arg0: i32, %arg1: i32, %arg2: i32) -> (i32, i32) {
    %c0_i32 = arith.constant 0 : i32
    %c0_i32_0 = arith.constant 0 : i32
    return %c0_i32, %arg1 : i32, i32
  }
  func.func @transform_3(%arg0: i32, %arg1: i32, %arg2: i32) -> (i32, i32) {
    %c0_i32 = arith.constant 0 : i32
    %0 = arith.minsi %arg1, %c0_i32 : i32
    %c0_i32_0 = arith.constant 0 : i32
    return %arg0, %0 : i32, i32
  }
  func.func @transform_4(%arg0: i32, %arg1: i32, %arg2: i32) -> (i32, i32) {
    %c1_i32 = arith.constant 1 : i32
    %0 = arith.subi %arg1, %c1_i32 : i32
    %c0_i32 = arith.constant 0 : i32
    %c0_i32_0 = arith.constant 0 : i32
    %1 = arith.maxsi %c0_i32, %0 : i32
    %2 = arith.minsi %c0_i32_0, %1 : i32
    %c0_i32_1 = arith.constant 0 : i32
    return %arg0, %2 : i32, i32
  }
  func.func @transform_5(%arg0: i32, %arg1: i32, %arg2: i32) -> (i32, i32) {
    %c1_i32 = arith.constant 1 : i32
    %0 = arith.subi %arg1, %c1_i32 : i32
    %c1_i32_0 = arith.constant 1 : i32
    %1 = arith.subi %0, %c1_i32_0 : i32
    %c0_i32 = arith.constant 0 : i32
    %c0_i32_1 = arith.constant 0 : i32
    %2 = arith.maxsi %c0_i32, %1 : i32
    %3 = arith.minsi %c0_i32_1, %2 : i32
    %c0_i32_2 = arith.constant 0 : i32
    return %arg0, %3 : i32, i32
  }
}

</mosaic_0001>

<bundles_post_ra>
// kernel: tpu_custom_call.1
= control target key start
LH: loop header
LB: loop body
LE: loop exit
PB: predicated region body
PF: predicated region fallthrough
CT: control target
= control target key end

     0   :  { %s4963_s0 = inlined_call_operand.hbm [shape: f32[1024,256], index: 0, kind: input, shape index: {}]   ;;  %s4964_s1 = inlined_call_operand.hbm [shape: f32[256,768], index: 1, kind: input, shape index: {}]   ;;  %s4965_s2 = inlined_call_operand.vmem [shape: f32[1,768], index: 2, kind: input, shape index: {}]   ;;  %s4966_s3 = inlined_call_operand.hbm [shape: f32[1024,256], index: 3, kind: output, shape index: {0}]   ;;  %s4967_s4 = inlined_call_operand.hbm [shape: f32[1024,256], index: 4, kind: output, shape index: {1}]   ;;  %s4968_s5 = inlined_call_operand.hbm [shape: f32[1024,256], index: 5, kind: output, shape index: {2}]  }
   0x1   :  { %4999 = sst [smem:[#allocation99_spill]] %s4963_s0 }
   0x2   :  { %5000 = sst [smem:[#allocation100_spill]] %s4964_s1 }
   0x3   :  { %5001 = sst [smem:[#allocation101_spill]] %s4965_s2 }
   0x4   :  { %5002 = sst [smem:[#allocation102_spill]] %s4966_s3 }
   0x5   :  { %5003 = sst [smem:[#allocation103_spill]] %s4967_s4 }
   0x6   :  { %5004 = sst [smem:[#allocation104_spill]] %s4968_s5 }
   0x7   :  { %11 = vsyncpa [#allocation4], 0 }
   0x8   :  { %13 = vsyncpa [#allocation4 + $0x1], 0 }
   0x9   :  { %14 = vsyncpa [#allocation7], 0 }
   0xa   :  { %16 = vsyncpa [#allocation7 + $0x1], 0 }
   0xb   :  { %17 = vsyncpa [#allocation5], 0 }
   0xc   :  { %19 = vsyncpa [#allocation5 + $0x1], 0 }
   0xd   :  { %20 = vsyncpa [#allocation10], 0 }
   0xe   :  { %22 = vsyncpa [#allocation10 + $0x1], 0  ;;  %s3134_s18 = smov 0   ;;  %s3136_s19 = smov 0  }
   0xf   :  { %s3138_s20 = smov 0   ;;  %s3140_s21 = smov 0  }
  0x10   :  { %s3142_s22 = smov 0   ;;  %s3144_s23 = smov 0  }
  0x11   :  { %s3146_s24 = smov 0   ;;  %s3148_s25 = smov 0  }
  0x12   :  { %s3150_s26 = smov 0   ;;  %s3152_s27 = smov 0  }
  0x13   :  { %s3154_s28 = smov 0   ;;  %s3156_s29 = smov 0  }
  0x14   :  { %s3158_s30 = smov 0   ;;  %s3160_s6 = smov 0  }
  0x15 LB: > { %5005 = sst [smem:[#allocation16_spill]] %s3040_s18  ;;  %s3205_s7 = sadd.s32 4294967295, %s3092_s6   ;;  %s3092_s6 = sphi %s3160_s6, %s28_s6   ;;  %s3088_s30 = sphi %s3158_s30, %s5361_s30   ;;  %s3084_s29 = sphi %s3156_s29, %s5350_s29   ;;  %s3080_s28 = sphi %s3154_s28, %s5349_s28   ;;  %s3076_s27 = sphi %s3152_s27, %s5348_s27   ;;  %s3072_s26 = sphi %s3150_s26, %s5360_s26   ;;  %s3068_s25 = sphi %s3148_s25, %s5359_s25   ;;  %s3064_s24 = sphi %s3146_s24, %s5358_s24   ;;  %s3060_s23 = sphi %s3144_s23, %s5357_s23   ;;  %s3056_s22 = sphi %s3142_s22, %s5356_s22   ;;  %s3052_s21 = sphi %s3140_s21, %s5355_s21   ;;  %s3048_s20 = sphi %s3138_s20, %s5354_s20   ;;  %s3044_s19 = sphi %s3136_s19, %s5353_s19   ;;  %s3040_s18 = sphi %s3134_s18, %s5352_s18  }
  0x16   : > { %5006 = sst [smem:[#allocation17_spill]] %s3084_s29  ;;  %s4973_s8 = sadd.s32 4294967294, %s3092_s6  }
  0x17   : > { %5007 = sst [smem:[#allocation18_spill]] %s3088_s30  ;;  %s43_s9 = sadd.s32 1, %s3084_s29 }
  0x18   : > { %s47_s10 = sadd.s32 1, %s3088_s30  ;;  %p45_p0 = scmp.ge.s32.totalorder %s43_s9, 3 }
  0x19   : > { %s56_s11 = sadd.s32 1, %s3072_s26  ;;  %p63_p1 = scmp.ne.s32.totalorder %s3072_s26, %s3068_s25 }
  0x1a   : > { %p4981_p2 = scmp.eq.s32.totalorder %s3092_s6, 0  ;;  %s5363_s9 = smov (%p45_p0, %s43_s9), 0 }
  0x1b   : > { %5008 = sst [smem:[#allocation19_spill]] %s5363_s9  ;;  %s5365_s10 = smov (!%p45_p0, %s47_s10), %s3088_s30 }
  0x1c   : > { %p3222_p3 = por %p4981_p2, %p63_p1  ;;  %p69_p4 = scmp.ne.s32.totalorder %s3068_s25, %s3064_s24 }
  0x1d   : > { %p49_p5 = scmp.ge.s32.totalorder %s5365_s10, 2  ;;  %p4970_p6 = scmp.eq.s32.totalorder %s3205_s7, 0 }
  0x1e   : > { %s142_s14 = sadd.s32 1, %s3048_s20  ;;  %p152_p8 = scmp.ne.s32.totalorder %s3048_s20, %s3044_s19 }
  0x1f   : > { %s5367_s10 = smov (%p49_p5, %s5365_s10), 0  ;;  %p3236_p7 = por %p4970_p6, %p69_p4 }
  0x20   : > { %5010 = sst [smem:[#allocation20_spill]] %s5367_s10  ;;  %s51_s15 = ssub.s32 %s3088_s30, %s5367_s10 }
  0x21   : > { %s5011_s13 = scalar_select %p3236_p7, 1, 0 }
  0x22   : > { %p54_p9 = scmp.eq.s32.totalorder %s51_s15, 0  ;;  %p153_p10 = scmp.eq.s32.totalorder %s3205_s7, 5 }
  0x23   : > { %p158_p12 = scmp.ne.s32.totalorder %s3044_s19, %s3040_s18  ;;  %p159_p13 = scmp.eq.s32.totalorder %s4973_s8, 5 }
  0x24   : > { %s3247_s16 = scalar_select %p54_p9, %s3072_s26, %s56_s11  }
  0x25   : > { %p3249_p11 = por %p153_p10, %p152_p8  ;;  %p3260_p0 = por %p153_p10, %p63_p1 }
  0x26   : > { %5012 = sst [smem:[#allocation21_spill]] %s3247_s16  ;;  %p3264_p5 = por %p159_p13, %p158_p12 }
  0x27   : > { %s5013_s17 = scalar_select %p3249_p11, 1, 0 }
  0x28   : > { %s5015_s3 = scalar_select %p3260_p0, 1, 0 }
  0x29   : > { %5014 = sst [smem:[#allocation22_spill]] %s5013_s17  ;;  %p3271_p6 = por %p159_p13, %p69_p4 }
  0x2a   : > { %s5016_s15 = scalar_select %p3264_p5, 1, 0 }
  0x2b   : > { %s5018_s11 = scalar_select %p3271_p6, 1, 0 }
  0x2c   : > { %5017 = sst [smem:[#allocation23_spill]] %s5016_s15  ;;  %p4980_p8 = scmp.lt.s32.totalorder %s3092_s6, 6 }
  0x2d   : > { %s3276_s10 = scalar_select %p54_p9, %s3048_s20, %s142_s14  }
  0x2e   : > { %s255_s16 = sand.u32 1, %s3072_s26   ;;  %s2573_s8 = sshll.u32 %s3088_s30, 14 }
  0x2f   : > { %s2527_s18 = sshll.u32 %s255_s16, 10  ;;  %s5019_s0 = sld [smem:[#allocation99_spill]] }
  0x30   : > { %s259_s24 = scalar_lea.vmem [#allocation3], %s2527_s18  ;;  %p3292_p1 = pnand %p4980_p8, %p3222_p3 }
  0x31   : > { %s269_s15 = sshll.u32 %s259_s24, 4  ;;  %s3297_s5 = scalar_lea.sflag [#allocation4], %s255_s16  ;;  %s3286_s15 = int_to_ptr.vmem [resolvable:$true] %s269_s15 }
  0x32   : > { %p2824_p10 = pneg %p3292_p1 }
  0x35   : > { %s3284_s4 = scalar_lea.hbm %s5019_s0, %s2573_s8  ;;  %s2827_s17 = scalar_lea.hbm %s5019_s0, 32768 }
  0x36   : > { %s2822_s8 = scalar_lea.hbm %s3284_s4, 16384  ;;  %p2828_p3 = scmp.lt.u32.totalorder %s3284_s4, %s5019_s0 }
  0x37   : > { %p2823_p9 = scmp.ne.s32.totalorder %s3284_s4, %s2822_s8  ;;  %p2829_p8 = scmp.lt.u32.totalorder %s2827_s17, %s2822_s8 }
  0x38   : > { %p2831_p4 = scmp.lt.u32.totalorder %s2822_s8, %s3284_s4 }
  0x39   : > { %p2825_p12 = pnand %p2824_p10, %p2823_p9  ;;  %p2830_p2 = por %p2829_p8, %p2828_p3 }
  0x3b   : > { %p2826_p13 = pneg %p2825_p12  ;;  %p2832_p6 = por %p2831_p4, %p2830_p2 }
  0x3d   : > { %p2833_p5 = pnand %p2832_p6, %p2826_p13 }
  0x3f   : > { %2836 = shalt.err (!%p2833_p5)
}
  0x40   : > { %s2837_s16 = scalar_lea.vmem %s3286_s15, 16384  ;;  %s3094_s18 = smov [#allocation3]  }
  0x41   : > { %p2838_p9 = scmp.ne.s32.totalorder %s3286_s15, %s2837_s16  ;;  %s2842_s12 = sshll.u32 %s3094_s18, 4  ;;  %s2843_s12 = int_to_ptr.vmem [resolvable:$false] %s2842_s12 }
  0x42   : > { %s2844_s30 = scalar_lea.vmem %s2843_s12, 32768  ;;  %p2845_p0 = scmp.lt.s32.totalorder %s3286_s15, %s2843_s12 }
  0x43   : > { %p2840_p12 = pnand %p2838_p9, %p2824_p10  ;;  %p2846_p8 = scmp.lt.s32.totalorder %s2844_s30, %s2837_s16 }
  0x45   : > { %p2841_p11 = pneg %p2840_p12  ;;  %p2847_p3 = por %p2846_p8, %p2845_p0 }
  0x47   : > { %p2848_p2 = pnand %p2847_p3, %p2841_p11 }
  0x49   : > { %2851 = shalt.err (!%p2848_p2)
}
  0x4a   : > { %s4984_s8 = smov 256   ;;  %s4985_s17 = smov 16  }
  0x4b   : > { %2689 = dma.hbm_to_vmem [thread:$0]  (!%p3292_p1), %s3284_s4, 16384, %s3286_s15, %s3297_s5, %s4984_s8, %s4984_s8, %s4985_s17  }
  0x4c   : > { %p309_p6 = scmp.lt.s32.totalorder %s3092_s6, 7  ;;  %p5021_p11 = scmp.ge.s32.totalorder %s3092_s6, 1 }
  0x4d   : > { %s80_s16 = ssub.s32 %s3084_s29, %s5363_s9  ;;  %s84_s18 = sadd.s32 1, %s3060_s23 }
  0x4e   : > { %p3331_p0 = pnand %p5021_p11, %p309_p6  ;;  %p82_p5 = scmp.eq.s32.totalorder %s80_s16, 0 }
  0x4f   : > { %p91_p4 = scmp.ne.s32.totalorder %s3060_s23, %s3056_s22  ;;  %p97_p10 = scmp.ne.s32.totalorder %s3056_s22, %s3052_s21 }
  0x50   : > { %s279_s12 = sand.u32 1, %s3060_s23   ;;  %p5023_p13 = scmp.eq.s32.totalorder %s3092_s6, 0 }
  0x51   : > { %s3344_s30 = scalar_select %p82_p5, %s3060_s23, %s84_s18  }
  0x52   : > { %p93_p9 = por %p91_p4, %p5023_p13  ;;  %p5024_p12 = scmp.eq.s32.totalorder %s3205_s7, 0 }
  0x53   : > { %s2531_s15 = sshll.u32 %s279_s12, 9  ;;  %s2574_s14 = sshll.u32 %s3084_s29, 8 }
  0x54   : > { %p3350_p8 = por %p97_p10, %p5024_p12  ;;  %s5026_s1 = sld [smem:[#allocation100_spill]] }
  0x55   : > { %s283_s21 = scalar_lea.vmem [#allocation6], %s2531_s15  ;;  %p5027_p1 = scmp.lt.s32.totalorder %s3092_s6, 6 }
  0x56   : > { %s5025_s4 = scalar_select %p3350_p8, 1, 0 }
  0x57   : > { %s293_s16 = sshll.u32 %s283_s21, 4  ;;  %p3364_p3 = pnand %p5027_p1, %p93_p9  ;;  %s3360_s16 = int_to_ptr.vmem [resolvable:$true] %s293_s16 }
  0x58   : > { %s3368_s0 = scalar_lea.sflag [#allocation7], %s279_s12 }
  0x59   : > { %p2854_p6 = pneg %p3364_p3 }
  0x5a   : > { %s3358_s17 = scalar_lea.hbm %s5026_s1, %s2574_s14  ;;  %s2857_s5 = scalar_lea.hbm %s5026_s1, 24576 }
  0x5b   : > { %s2852_s8 = scalar_lea.hbm %s3358_s17, 8192  ;;  %p2858_p4 = scmp.lt.u32.totalorder %s3358_s17, %s5026_s1 }
  0x5c   : > { %p2853_p2 = scmp.ne.s32.totalorder %s3358_s17, %s2852_s8  ;;  %p2859_p10 = scmp.lt.u32.totalorder %s2857_s5, %s2852_s8 }
  0x5d   : > { %p2861_p9 = scmp.lt.u32.totalorder %s2852_s8, %s3358_s17 }
  0x5e   : > { %p2855_p11 = pnand %p2854_p6, %p2853_p2  ;;  %p2860_p13 = por %p2859_p10, %p2858_p4 }
  0x60   : > { %p2856_p5 = pneg %p2855_p11  ;;  %p2862_p12 = por %p2861_p9, %p2860_p13 }
  0x62   : > { %p2863_p1 = pnand %p2862_p12, %p2856_p5 }
  0x64   : > { %2866 = shalt.err (!%p2863_p1)
}
  0x65   : > { %s2867_s12 = scalar_lea.vmem %s3360_s16, 8192  ;;  %s3097_s15 = smov [#allocation6]  }
  0x66   : > { %p2868_p2 = scmp.ne.s32.totalorder %s3360_s16, %s2867_s12  ;;  %s2872_s14 = sshll.u32 %s3097_s15, 4  ;;  %s2873_s14 = int_to_ptr.vmem [resolvable:$false] %s2872_s14 }
  0x67   : > { %s2874_s9 = scalar_lea.vmem %s2873_s14, 16384  ;;  %p2875_p7 = scmp.lt.s32.totalorder %s3360_s16, %s2873_s14 }
  0x68   : > { %p2870_p11 = pnand %p2868_p2, %p2854_p6  ;;  %p2876_p4 = scmp.lt.s32.totalorder %s2874_s9, %s2867_s12 }
  0x6a   : > { %p2871_p8 = pneg %p2870_p11  ;;  %p2877_p10 = por %p2876_p4, %p2875_p7 }
  0x6c   : > { %p2878_p13 = pnand %p2877_p10, %p2871_p8 }
  0x6e   : > { %2881 = shalt.err (!%p2878_p13)
}
  0x6f   : > { %s3098_s8 = smov 768   ;;  %s5029_s5 = smov 16  }
  0x70   : > { %s5030_s21 = smov 256   ;;  %313 = sbr.rel (%p3331_p0) target bundleno = 783 (0x30f), region = 32 }
  0x71   : > { %2692 = dma.hbm_to_vmem [thread:$0]  (!%p3364_p3), %s3358_s17, 8192, %s3360_s16, %s3368_s0, %s3098_s8, %s5030_s21, %s5029_s5  }
  0x77   : > { %s315_s15 = sand.u32 1, %s3068_s25   ;;  %p5031_p7 = scmp.ne.s32.totalorder %s5011_s13, 0 }
  0x78   : > { %s3401_s14 = sshll.u32 %s315_s15, 10  ;;  %s316_s12 = scalar_lea.sflag [#allocation4], %s315_s15 }
  0x79   : > { %s3404_s9 = scalar_lea.vmem [#allocation3], %s3401_s14 }
  0x7a   : > { %3023 = dma.done.wait (%p5031_p7), %s316_s12, 16384  }
  0x7b   : > { %3025 = vsyncadd (%p5031_p7), %s316_s12, 4294950912  ;;  %s324_s0 = sand.u32 1, %s3056_s22   ;;  %p5032_p0 = scmp.ne.s32.totalorder %s5025_s4, 0 }
  0x7c   : > { %s2536_s17 = sshll.u32 %s324_s0, 9  ;;  %s325_s24 = scalar_lea.sflag [#allocation7], %s324_s0 }
  0x7d   : > { %s3411_s16 = scalar_lea.vmem [#allocation6], %s2536_s17 }
  0x7e   : > { %3027 = dma.done.wait (%p5032_p0), %s325_s24, 8192  }
  0x7f   : > { %3029 = vsyncadd (%p5032_p0), %s325_s24, 4294959104  ;;  %s4992_s13 = sand.u32 1, %s3044_s19   ;;  %v790_v0 = vld [vmem:[%s3411_s16 + $0x8] sm:$0xff]  ;;  %v792_v1 = vld [vmem:[%s3411_s16 + $0x18] sm:$0xff]  ;;  %s2540_s4 = sshll.u32 %s3076_s27, 1 }
  0x80   : > { %s3420_s18 = sshll.u32 %s4992_s13, 10  ;;  %v789_v2 = vld [vmem:[%s3411_s16] sm:$0xff]  ;;  %v2580_v3 = vpack.c.bf16 %v792_v1, %v790_v0  ;;  %v791_v4 = vld [vmem:[%s3411_s16 + $0x10] sm:$0xff]  ;;  %v794_v5 = vld [vmem:[%s3411_s16 + $0x28] sm:$0xff]  ;;  %p379_p8 = scmp.lt.s32.totalorder %s2540_s4, 5 }
  0x81   : > { %v796_v6 = vld [vmem:[%s3411_s16 + $0x38] sm:$0xff]  ;;  %v2582_v7 = vpack.c.bf16 %v791_v4, %v789_v2  ;;  %v793_v9 = vld [vmem:[%s3411_s16 + $0x20] sm:$0xff]  ;;  %v795_v10 = vld [vmem:[%s3411_s16 + $0x30] sm:$0xff]  ;;  %s5033_s2 = sld [smem:[#allocation101_spill]]  ;;  %s4007_s15 = scalar_lea.vmem [#allocation8], %s3420_s18 }
  0x82   : > { %v2584_v8 = vpack.c.bf16 %v796_v6, %v794_v5  ;;  %v798_v11 = vld [vmem:[%s3411_s16 + $0x48] sm:$0xff]  ;;  %2581 = vmatprep.subr.bf16.mxu0 %v2580_v3  ;;  %2644 = vmatprep.subr.bf16.mxu1 %v2580_v3  ;;  %v800_v12 = vld [vmem:[%s3411_s16 + $0x58] sm:$0xff]  ;;  %v2586_v13 = vpack.c.bf16 %v795_v10, %v793_v9  ;;  %v797_v15 = vld [vmem:[%s3411_s16 + $0x40] sm:$0xff]  ;;  %s5369_s4 = smov (!%p379_p8, %s2540_s4), 5  ;;  %s4010_s12 = scalar_lea.vmem [#allocation9], %s3401_s14 }
  0x83   : > { %2583 = vmatpush1.bf16.msra.mxu0 %v2582_v7  ;;  %2660 = vmatpush1.bf16.msra.mxu1 %v2582_v7  ;;  %v2588_v14 = vpack.c.bf16 %v800_v12, %v798_v11  ;;  %v799_v16 = vld [vmem:[%s3411_s16 + $0x50] sm:$0xff]  ;;  %v802_v17 = vld [vmem:[%s3411_s16 + $0x68] sm:$0xff]  ;;  %v804_v18 = vld [vmem:[%s3411_s16 + $0x78] sm:$0xff]  ;;  %p2541_p3 = scmp.ge.s32.totalorder %s3076_s27, 1 }
  0x84   : > { %2585 = vmatprep.subr.bf16.mxu0 %v2584_v8  ;;  %2645 = vmatprep.subr.bf16.mxu1 %v2584_v8  ;;  %v2590_v19 = vpack.c.bf16 %v799_v16, %v797_v15  ;;  %v2592_v20 = vpack.c.bf16 %v804_v18, %v802_v17  ;;  %v801_v21 = vld [vmem:[%s3411_s16 + $0x60] sm:$0xff]  ;;  %v803_v22 = vld [vmem:[%s3411_s16 + $0x70] sm:$0xff]  ;;  %v806_v23 = vld [vmem:[%s3411_s16 + $0x88] sm:$0xff] }
  0x85   : > { %v808_v24 = vld [vmem:[%s3411_s16 + $0x98] sm:$0xff]  ;;  %v2594_v25 = vpack.c.bf16 %v803_v22, %v801_v21  ;;  %v805_v27 = vld [vmem:[%s3411_s16 + $0x80] sm:$0xff]  ;;  %v807_v28 = vld [vmem:[%s3411_s16 + $0x90] sm:$0xff] }
  0x86   : > { %v2596_v26 = vpack.c.bf16 %v808_v24, %v806_v23  ;;  %v810_v29 = vld [vmem:[%s3411_s16 + $0xa8] sm:$0xff]  ;;  %v812_v30 = vld [vmem:[%s3411_s16 + $0xb8] sm:$0xff]  ;;  %v2598_v31 = vpack.c.bf16 %v807_v28, %v805_v27  ;;  %v809_v33 = vld [vmem:[%s3411_s16 + $0xa0] sm:$0xff] }
  0x87   : > { %2587 = vmatpush1.bf16.msra.mxu0 %v2586_v13  ;;  %2661 = vmatpush1.bf16.msra.mxu1 %v2586_v13  ;;  %v2600_v32 = vpack.c.bf16 %v812_v30, %v810_v29  ;;  %v811_v34 = vld [vmem:[%s3411_s16 + $0xb0] sm:$0xff]  ;;  %v814_v35 = vld [vmem:[%s3411_s16 + $0xc8] sm:$0xff]  ;;  %v816_v36 = vld [vmem:[%s3411_s16 + $0xd8] sm:$0xff]  ;;  %s381_s21 = scalar_lea.vmem %s5033_s2, %s5369_s4 }
  0x88   : > { %2589 = vmatprep.subr.bf16.mxu0 %v2588_v14  ;;  %2646 = vmatprep.subr.bf16.mxu1 %v2588_v14  ;;  %v2602_v37 = vpack.c.bf16 %v811_v34, %v809_v33  ;;  %v813_v38 = vld [vmem:[%s3411_s16 + $0xc0] sm:$0xff]  ;;  %v2604_v39 = vpack.c.bf16 %v816_v36, %v814_v35  ;;  %v815_v40 = vld [vmem:[%s3411_s16 + $0xd0] sm:$0xff]  ;;  %v662_v41 = vld [vmem:[%s3404_s9 + $0x8] sm:$0xff] }
  0x89   : > { %v726_v42 = vld [vmem:[%s3404_s9 + $0x208] sm:$0xff]  ;;  %v820_v44 = vld [vmem:[%s3411_s16 + $0xf8] sm:$0xff]  ;;  %917 = vmatprep.mubr.f32.mxu0 %v662_v41  ;;  %v2606_v45 = vpack.c.bf16 %v815_v40, %v813_v38  ;;  %v817_v47 = vld [vmem:[%s3411_s16 + $0xe0] sm:$0xff] }
  0x8a   : > { %v818_v43 = vld [vmem:[%s3411_s16 + $0xe8] sm:$0xff]  ;;  %1109 = vmatprep.mubr.f32.mxu1 %v726_v42  ;;  %v819_v48 = vld [vmem:[%s3411_s16 + $0xf0] sm:$0xff]  ;;  %v824_v50 = vld [vmem:[%s3411_s16 + $0x118] sm:$0xff] }
  0x8b   : > { %2591 = vmatpush1.bf16.msra.mxu0 %v2590_v19  ;;  %2662 = vmatpush1.bf16.msra.mxu1 %v2590_v19  ;;  %v2608_v46 = vpack.c.bf16 %v820_v44, %v818_v43  ;;  %v822_v49 = vld [vmem:[%s3411_s16 + $0x108] sm:$0xff]  ;;  %v2610_v51 = vpack.c.bf16 %v819_v48, %v817_v47  ;;  %v821_v53 = vld [vmem:[%s3411_s16 + $0x100] sm:$0xff]  ;;  %v823_v54 = vld [vmem:[%s3411_s16 + $0x110] sm:$0xff] }
  0x8c   : > { %2593 = vmatprep.subr.bf16.mxu0 %v2592_v20  ;;  %2647 = vmatprep.subr.bf16.mxu1 %v2592_v20  ;;  %v2612_v52 = vpack.c.bf16 %v824_v50, %v822_v49  ;;  %v826_v55 = vld [vmem:[%s3411_s16 + $0x128] sm:$0xff]  ;;  %v828_v56 = vld [vmem:[%s3411_s16 + $0x138] sm:$0xff]  ;;  %v2614_v57 = vpack.c.bf16 %v823_v54, %v821_v53  ;;  %v825_v59 = vld [vmem:[%s3411_s16 + $0x120] sm:$0xff] }
  0x8d   : > { %v2616_v58 = vpack.c.bf16 %v828_v56, %v826_v55  ;;  %v827_v60 = vld [vmem:[%s3411_s16 + $0x130] sm:$0xff]  ;;  %v830_v61 = vld [vmem:[%s3411_s16 + $0x148] sm:$0xff]  ;;  %v832_v62 = vld [vmem:[%s3411_s16 + $0x158] sm:$0xff] }
  0x8e   : > { %v2618_v63 = vpack.c.bf16 %v827_v60, %v825_v59  ;;  %v2620_v0 = vpack.c.bf16 %v832_v62, %v830_v61  ;;  %v829_v1 = vld [vmem:[%s3411_s16 + $0x140] sm:$0xff]  ;;  %v831_v2 = vld [vmem:[%s3411_s16 + $0x150] sm:$0xff]  ;;  %v834_v3 = vld [vmem:[%s3411_s16 + $0x168] sm:$0xff] }
  0x8f   : > { %2595 = vmatpush1.bf16.msra.mxu0 %v2594_v25  ;;  %2663 = vmatpush1.bf16.msra.mxu1 %v2594_v25  ;;  %v836_v4 = vld [vmem:[%s3411_s16 + $0x178] sm:$0xff]  ;;  %v2622_v5 = vpack.c.bf16 %v831_v2, %v829_v1  ;;  %v833_v7 = vld [vmem:[%s3411_s16 + $0x160] sm:$0xff]  ;;  %v835_v8 = vld [vmem:[%s3411_s16 + $0x170] sm:$0xff] }
  0x90   : > { %2597 = vmatprep.subr.bf16.mxu0 %v2596_v26  ;;  %2648 = vmatprep.subr.bf16.mxu1 %v2596_v26  ;;  %v2624_v6 = vpack.c.bf16 %v836_v4, %v834_v3  ;;  %v838_v9 = vld [vmem:[%s3411_s16 + $0x188] sm:$0xff]  ;;  %v840_v10 = vld [vmem:[%s3411_s16 + $0x198] sm:$0xff]  ;;  %v2626_v11 = vpack.c.bf16 %v835_v8, %v833_v7  ;;  %v837_v13 = vld [vmem:[%s3411_s16 + $0x180] sm:$0xff] }
  0x91   : > { %v2628_v12 = vpack.c.bf16 %v840_v10, %v838_v9  ;;  %v839_v14 = vld [vmem:[%s3411_s16 + $0x190] sm:$0xff]  ;;  %v842_v15 = vld [vmem:[%s3411_s16 + $0x1a8] sm:$0xff]  ;;  %v844_v16 = vld [vmem:[%s3411_s16 + $0x1b8] sm:$0xff] }
  0x92   : > { %v2630_v17 = vpack.c.bf16 %v839_v14, %v837_v13  ;;  %v2632_v18 = vpack.c.bf16 %v844_v16, %v842_v15  ;;  %v841_v19 = vld [vmem:[%s3411_s16 + $0x1a0] sm:$0xff]  ;;  %v843_v20 = vld [vmem:[%s3411_s16 + $0x1b0] sm:$0xff]  ;;  %v846_v21 = vld [vmem:[%s3411_s16 + $0x1c8] sm:$0xff] }
  0x93   : > { %2599 = vmatpush1.bf16.msra.mxu0 %v2598_v31  ;;  %2664 = vmatpush1.bf16.msra.mxu1 %v2598_v31  ;;  %v848_v22 = vld [vmem:[%s3411_s16 + $0x1d8] sm:$0xff]  ;;  %v2634_v23 = vpack.c.bf16 %v843_v20, %v841_v19  ;;  %v845_v25 = vld [vmem:[%s3411_s16 + $0x1c0] sm:$0xff]  ;;  %v847_v26 = vld [vmem:[%s3411_s16 + $0x1d0] sm:$0xff] }
  0x94   : > { %2601 = vmatprep.subr.bf16.mxu0 %v2600_v32  ;;  %2649 = vmatprep.subr.bf16.mxu1 %v2600_v32  ;;  %v2636_v24 = vpack.c.bf16 %v848_v22, %v846_v21  ;;  %v850_v27 = vld [vmem:[%s3411_s16 + $0x1e8] sm:$0xff]  ;;  %v852_v28 = vld [vmem:[%s3411_s16 + $0x1f8] sm:$0xff]  ;;  %v2638_v29 = vpack.c.bf16 %v847_v26, %v845_v25  ;;  %v849_v31 = vld [vmem:[%s3411_s16 + $0x1e0] sm:$0xff] }
  0x95   : > { %v2640_v30 = vpack.c.bf16 %v852_v28, %v850_v27  ;;  %v851_v32 = vld [vmem:[%s3411_s16 + $0x1f0] sm:$0xff]  ;;  %v661_v34 = vld [vmem:[%s3404_s9] sm:$0xff]  ;;  %v664_v36 = vld [vmem:[%s3404_s9 + $0x18] sm:$0xff] }
  0x96   : > { %v2642_v33 = vpack.c.bf16 %v851_v32, %v849_v31  ;;  %v725_v35 = vld [vmem:[%s3404_s9 + $0x200] sm:$0xff]  ;;  %v663_v38 = vld [vmem:[%s3404_s9 + $0x10] sm:$0xff]  ;;  %v666_v40 = vld [vmem:[%s3404_s9 + $0x28] sm:$0xff] }
  0x97   : > { %2603 = vmatpush1.bf16.msra.mxu0 %v2602_v37  ;;  %2665 = vmatpush1.bf16.msra.mxu1 %v2602_v37  ;;  %v728_v37 = vld [vmem:[%s3404_s9 + $0x218] sm:$0xff]  ;;  %v730_v41 = vld [vmem:[%s3404_s9 + $0x228] sm:$0xff]  ;;  %v665_v42 = vld [vmem:[%s3404_s9 + $0x20] sm:$0xff] }
  0x98   : > { %2605 = vmatprep.subr.bf16.mxu0 %v2604_v39  ;;  %2650 = vmatprep.subr.bf16.mxu1 %v2604_v39  ;;  %v727_v39 = vld [vmem:[%s3404_s9 + $0x210] sm:$0xff]  ;;  %v729_v43 = vld [vmem:[%s3404_s9 + $0x220] sm:$0xff]  ;;  %v668_v44 = vld [vmem:[%s3404_s9 + $0x38] sm:$0xff] }
  0x99   : > { %v731_v47 = vld [vmem:[%s3404_s9 + $0x230] sm:$0xff]  ;;  %v670_v48 = vld [vmem:[%s3404_s9 + $0x48] sm:$0xff]  ;;  %v669_v50 = vld [vmem:[%s3404_s9 + $0x40] sm:$0xff] }
  0x9a   : > { %v734_v49 = vld [vmem:[%s3404_s9 + $0x248] sm:$0xff]  ;;  %v736_v53 = vld [vmem:[%s3404_s9 + $0x258] sm:$0xff]  ;;  %v671_v54 = vld [vmem:[%s3404_s9 + $0x50] sm:$0xff] }
  0x9b   : > { %2607 = vmatpush1.bf16.msra.mxu0 %v2606_v45  ;;  %2666 = vmatpush1.bf16.msra.mxu1 %v2606_v45  ;;  %v732_v45 = vld [vmem:[%s3404_s9 + $0x238] sm:$0xff]  ;;  %v735_v55 = vld [vmem:[%s3404_s9 + $0x250] sm:$0xff]  ;;  %v674_v56 = vld [vmem:[%s3404_s9 + $0x68] sm:$0xff] }
  0x9c   : > { %2609 = vmatprep.subr.bf16.mxu0 %v2608_v46  ;;  %2651 = vmatprep.subr.bf16.mxu1 %v2608_v46  ;;  %v667_v46 = vld [vmem:[%s3404_s9 + $0x30] sm:$0xff]  ;;  %v737_v59 = vld [vmem:[%s3404_s9 + $0x260] sm:$0xff]  ;;  %v676_v60 = vld [vmem:[%s3404_s9 + $0x78] sm:$0xff] }
  0x9d   : > { %v740_v61 = vld [vmem:[%s3404_s9 + $0x278] sm:$0xff]  ;;  %v675_v62 = vld [vmem:[%s3404_s9 + $0x70] sm:$0xff]  ;;  %v742_v1 = vld [vmem:[%s3404_s9 + $0x288] sm:$0xff] }
  0x9e   : > { %v677_v2 = vld [vmem:[%s3404_s9 + $0x80] sm:$0xff]  ;;  %v680_v4 = vld [vmem:[%s3404_s9 + $0x98] sm:$0xff]  ;;  %v743_v7 = vld [vmem:[%s3404_s9 + $0x290] sm:$0xff] }
  0x9f   : > { %2611 = vmatpush1.bf16.msra.mxu0 %v2610_v51  ;;  %2667 = vmatpush1.bf16.msra.mxu1 %v2610_v51  ;;  %v733_v51 = vld [vmem:[%s3404_s9 + $0x240] sm:$0xff]  ;;  %v682_v8 = vld [vmem:[%s3404_s9 + $0xa8] sm:$0xff]  ;;  %v748_v13 = vld [vmem:[%s3404_s9 + $0x2b8] sm:$0xff] }
  0xa0   : > { %2613 = vmatprep.subr.bf16.mxu0 %v2612_v52  ;;  %2652 = vmatprep.subr.bf16.mxu1 %v2612_v52  ;;  %v672_v52 = vld [vmem:[%s3404_s9 + $0x58] sm:$0xff]  ;;  %v741_v3 = vld [vmem:[%s3404_s9 + $0x280] sm:$0xff]  ;;  %v746_v9 = vld [vmem:[%s3404_s9 + $0x2a8] sm:$0xff] }
  0xa1   : > { %v681_v10 = vld [vmem:[%s3404_s9 + $0xa0] sm:$0xff]  ;;  %v683_v14 = vld [vmem:[%s3404_s9 + $0xb0] sm:$0xff]  ;;  %v686_v16 = vld [vmem:[%s3404_s9 + $0xc8] sm:$0xff] }
  0xa2   : > { %v747_v15 = vld [vmem:[%s3404_s9 + $0x2b0] sm:$0xff]  ;;  %v749_v19 = vld [vmem:[%s3404_s9 + $0x2c0] sm:$0xff]  ;;  %v688_v20 = vld [vmem:[%s3404_s9 + $0xd8] sm:$0xff] }
  0xa3   : > { %2615 = vmatpush1.bf16.msra.mxu0 %v2614_v57  ;;  %2668 = vmatpush1.bf16.msra.mxu1 %v2614_v57  ;;  %v738_v57 = vld [vmem:[%s3404_s9 + $0x268] sm:$0xff]  ;;  %v752_v21 = vld [vmem:[%s3404_s9 + $0x2d8] sm:$0xff]  ;;  %v687_v22 = vld [vmem:[%s3404_s9 + $0xd0] sm:$0xff] }
  0xa4   : > { %2617 = vmatprep.subr.bf16.mxu0 %v2616_v58  ;;  %2653 = vmatprep.subr.bf16.mxu1 %v2616_v58  ;;  %v673_v58 = vld [vmem:[%s3404_s9 + $0x60] sm:$0xff]  ;;  %v754_v25 = vld [vmem:[%s3404_s9 + $0x2e8] sm:$0xff]  ;;  %v692_v28 = vld [vmem:[%s3404_s9 + $0xf8] sm:$0xff] }
  0xa5   : > { %v689_v26 = vld [vmem:[%s3404_s9 + $0xe0] sm:$0xff]  ;;  %v755_v31 = vld [vmem:[%s3404_s9 + $0x2f0] sm:$0xff]  ;;  %v694_v32 = vld [vmem:[%s3404_s9 + $0x108] sm:$0xff] }
  0xa6   : > { %v753_v27 = vld [vmem:[%s3404_s9 + $0x2e0] sm:$0xff] }
  0xa7   : > { %2619 = vmatpush1.bf16.msra.mxu0 %v2618_v63  ;;  %2669 = vmatpush1.bf16.msra.mxu1 %v2618_v63  ;;  %v739_v63 = vld [vmem:[%s3404_s9 + $0x270] sm:$0xff] }
  0xa8   : > { %2621 = vmatprep.subr.bf16.mxu0 %v2620_v0  ;;  %2654 = vmatprep.subr.bf16.mxu1 %v2620_v0  ;;  %v678_v0 = vld [vmem:[%s3404_s9 + $0x88] sm:$0xff] }
  0xab   : > { %2623 = vmatpush1.bf16.msra.mxu0 %v2622_v5  ;;  %2670 = vmatpush1.bf16.msra.mxu1 %v2622_v5  ;;  %v744_v5 = vld [vmem:[%s3404_s9 + $0x298] sm:$0xff] }
  0xac   : > { %2625 = vmatprep.subr.bf16.mxu0 %v2624_v6  ;;  %2655 = vmatprep.subr.bf16.mxu1 %v2624_v6  ;;  %v679_v6 = vld [vmem:[%s3404_s9 + $0x90] sm:$0xff] }
  0xaf   : > { %2627 = vmatpush1.bf16.msra.mxu0 %v2626_v11  ;;  %2671 = vmatpush1.bf16.msra.mxu1 %v2626_v11  ;;  %v745_v11 = vld [vmem:[%s3404_s9 + $0x2a0] sm:$0xff] }
  0xb0   : > { %2629 = vmatprep.subr.bf16.mxu0 %v2628_v12  ;;  %2656 = vmatprep.subr.bf16.mxu1 %v2628_v12  ;;  %v684_v12 = vld [vmem:[%s3404_s9 + $0xb8] sm:$0xff] }
  0xb3   : > { %2631 = vmatpush1.bf16.msra.mxu0 %v2630_v17  ;;  %2672 = vmatpush1.bf16.msra.mxu1 %v2630_v17  ;;  %v750_v17 = vld [vmem:[%s3404_s9 + $0x2c8] sm:$0xff] }
  0xb4   : > { %2633 = vmatprep.subr.bf16.mxu0 %v2632_v18  ;;  %2657 = vmatprep.subr.bf16.mxu1 %v2632_v18  ;;  %v685_v18 = vld [vmem:[%s3404_s9 + $0xc0] sm:$0xff] }
  0xb7   : > { %2635 = vmatpush1.bf16.msra.mxu0 %v2634_v23  ;;  %2673 = vmatpush1.bf16.msra.mxu1 %v2634_v23  ;;  %v751_v23 = vld [vmem:[%s3404_s9 + $0x2d0] sm:$0xff] }
  0xb8   : > { %2637 = vmatprep.subr.bf16.mxu0 %v2636_v24  ;;  %2658 = vmatprep.subr.bf16.mxu1 %v2636_v24  ;;  %v690_v24 = vld [vmem:[%s3404_s9 + $0xe8] sm:$0xff] }
  0xbb   : > { %2639 = vmatpush1.bf16.msra.mxu0 %v2638_v29  ;;  %2674 = vmatpush1.bf16.msra.mxu1 %v2638_v29  ;;  %v756_v29 = vld [vmem:[%s3404_s9 + $0x2f8] sm:$0xff] }
  0xbc   : > { %2641 = vmatprep.subr.bf16.mxu0 %v2640_v30  ;;  %2659 = vmatprep.subr.bf16.mxu1 %v2640_v30  ;;  %v691_v30 = vld [vmem:[%s3404_s9 + $0xf0] sm:$0xff] }
  0xbf   : > { %2643 = vmatpush1.bf16.msra.mxu0 %v2642_v33  ;;  %2675 = vmatpush1.bf16.msra.mxu1 %v2642_v33  ;;  %v758_v33 = vld [vmem:[%s3404_s9 + $0x308] sm:$0xff] }
  0xc2   : > { %918 = vmatmul.mubr.f32.vlgmr.msra.gmra.mrb[0].mxu0 %v661_v34  ;;  %1110 = vmatmul.mubr.f32.vlgmr.msra.gmra.mrb[0].mxu1 %v725_v35  ;;  %v693_v34 = vld [vmem:[%s3404_s9 + $0x100] sm:$0xff] }
  0xc3   : > { %923 = vmatprep.mubr.f32.mxu0 %v664_v36  ;;  %1115 = vmatprep.mubr.f32.mxu1 %v728_v37  ;;  %v757_v35 = vld [vmem:[%s3404_s9 + $0x300] sm:$0xff]  ;;  %v696_v36 = vld [vmem:[%s3404_s9 + $0x118] sm:$0xff] }
  0xc4   : > { %v760_v37 = vld [vmem:[%s3404_s9 + $0x318] sm:$0xff] }
  0xc6   : > { %924 = vmatmul.mubr.f32.gmra.mrb[2].mxu0 %v663_v38  ;;  %1116 = vmatmul.mubr.f32.gmra.mrb[2].mxu1 %v727_v39  ;;  %v695_v38 = vld [vmem:[%s3404_s9 + $0x110] sm:$0xff] }
  0xc7   : > { %929 = vmatprep.mubr.f32.mxu0 %v666_v40  ;;  %1121 = vmatprep.mubr.f32.mxu1 %v730_v41  ;;  %v759_v39 = vld [vmem:[%s3404_s9 + $0x310] sm:$0xff]  ;;  %v698_v40 = vld [vmem:[%s3404_s9 + $0x128] sm:$0xff] }
  0xc8   : > { %v762_v41 = vld [vmem:[%s3404_s9 + $0x328] sm:$0xff] }
  0xca   : > { %930 = vmatmul.mubr.f32.gmra.mrb[4].mxu0 %v665_v42  ;;  %1122 = vmatmul.mubr.f32.gmra.mrb[4].mxu1 %v729_v43  ;;  %v697_v42 = vld [vmem:[%s3404_s9 + $0x120] sm:$0xff] }
  0xcb   : > { %935 = vmatprep.mubr.f32.mxu0 %v668_v44  ;;  %1127 = vmatprep.mubr.f32.mxu1 %v732_v45  ;;  %v761_v43 = vld [vmem:[%s3404_s9 + $0x320] sm:$0xff]  ;;  %v700_v44 = vld [vmem:[%s3404_s9 + $0x138] sm:$0xff] }
  0xcc   : > { %v764_v45 = vld [vmem:[%s3404_s9 + $0x338] sm:$0xff] }
  0xce   : > { %936 = vmatmul.mubr.f32.gmra.mrb[6].mxu0 %v667_v46  ;;  %1128 = vmatmul.mubr.f32.gmra.mrb[6].mxu1 %v731_v47  ;;  %v699_v46 = vld [vmem:[%s3404_s9 + $0x130] sm:$0xff] }
  0xcf   : > { %941 = vmatprep.mubr.f32.mxu0 %v670_v48  ;;  %1133 = vmatprep.mubr.f32.mxu1 %v734_v49  ;;  %v763_v47 = vld [vmem:[%s3404_s9 + $0x330] sm:$0xff]  ;;  %v702_v48 = vld [vmem:[%s3404_s9 + $0x148] sm:$0xff] }
  0xd0   : > { %v766_v49 = vld [vmem:[%s3404_s9 + $0x348] sm:$0xff] }
  0xd2   : > { %942 = vmatmul.mubr.f32.gmra.mrb[8].mxu0 %v669_v50  ;;  %1134 = vmatmul.mubr.f32.gmra.mrb[8].mxu1 %v733_v51  ;;  %v701_v50 = vld [vmem:[%s3404_s9 + $0x140] sm:$0xff] }
  0xd3   : > { %947 = vmatprep.mubr.f32.mxu0 %v672_v52  ;;  %1139 = vmatprep.mubr.f32.mxu1 %v736_v53  ;;  %v765_v51 = vld [vmem:[%s3404_s9 + $0x340] sm:$0xff]  ;;  %v704_v52 = vld [vmem:[%s3404_s9 + $0x158] sm:$0xff] }
  0xd4   : > { %v768_v53 = vld [vmem:[%s3404_s9 + $0x358] sm:$0xff] }
  0xd6   : > { %948 = vmatmul.mubr.f32.gmra.mrb[10].mxu0 %v671_v54  ;;  %1140 = vmatmul.mubr.f32.gmra.mrb[10].mxu1 %v735_v55  ;;  %v703_v54 = vld [vmem:[%s3404_s9 + $0x150] sm:$0xff] }
  0xd7   : > { %953 = vmatprep.mubr.f32.mxu0 %v674_v56  ;;  %1145 = vmatprep.mubr.f32.mxu1 %v738_v57  ;;  %v767_v55 = vld [vmem:[%s3404_s9 + $0x350] sm:$0xff]  ;;  %v706_v56 = vld [vmem:[%s3404_s9 + $0x168] sm:$0xff] }
  0xd8   : > { %v770_v57 = vld [vmem:[%s3404_s9 + $0x368] sm:$0xff] }
  0xda   : > { %954 = vmatmul.mubr.f32.gmra.mrb[12].mxu0 %v673_v58  ;;  %1146 = vmatmul.mubr.f32.gmra.mrb[12].mxu1 %v737_v59  ;;  %v705_v58 = vld [vmem:[%s3404_s9 + $0x160] sm:$0xff] }
  0xdb   : > { %959 = vmatprep.mubr.f32.mxu0 %v676_v60  ;;  %1151 = vmatprep.mubr.f32.mxu1 %v740_v61  ;;  %v769_v59 = vld [vmem:[%s3404_s9 + $0x360] sm:$0xff]  ;;  %v708_v60 = vld [vmem:[%s3404_s9 + $0x178] sm:$0xff] }
  0xdc   : > { %v772_v61 = vld [vmem:[%s3404_s9 + $0x378] sm:$0xff] }
  0xde   : > { %960 = vmatmul.mubr.f32.gmra.mrb[14].mxu0 %v675_v62  ;;  %1152 = vmatmul.mubr.f32.gmra.mrb[14].mxu1 %v739_v63  ;;  %v707_v62 = vld [vmem:[%s3404_s9 + $0x170] sm:$0xff] }
  0xdf   : > { %965 = vmatprep.mubr.f32.mxu0 %v678_v0  ;;  %1157 = vmatprep.mubr.f32.mxu1 %v742_v1  ;;  %v771_v63 = vld [vmem:[%s3404_s9 + $0x370] sm:$0xff]  ;;  %v710_v0 = vld [vmem:[%s3404_s9 + $0x188] sm:$0xff] }
  0xe0   : > { %v774_v1 = vld [vmem:[%s3404_s9 + $0x388] sm:$0xff] }
  0xe2   : > { %966 = vmatmul.mubr.f32.gmra.mrb[16].mxu0 %v677_v2  ;;  %1158 = vmatmul.mubr.f32.gmra.mrb[16].mxu1 %v741_v3  ;;  %v709_v2 = vld [vmem:[%s3404_s9 + $0x180] sm:$0xff] }
  0xe3   : > { %971 = vmatprep.mubr.f32.mxu0 %v680_v4  ;;  %1163 = vmatprep.mubr.f32.mxu1 %v744_v5  ;;  %v773_v3 = vld [vmem:[%s3404_s9 + $0x380] sm:$0xff]  ;;  %v712_v4 = vld [vmem:[%s3404_s9 + $0x198] sm:$0xff] }
  0xe4   : > { %v776_v5 = vld [vmem:[%s3404_s9 + $0x398] sm:$0xff] }
  0xe6   : > { %972 = vmatmul.mubr.f32.gmra.mrb[18].mxu0 %v679_v6  ;;  %1164 = vmatmul.mubr.f32.gmra.mrb[18].mxu1 %v743_v7  ;;  %v711_v6 = vld [vmem:[%s3404_s9 + $0x190] sm:$0xff] }
  0xe7   : > { %977 = vmatprep.mubr.f32.mxu0 %v682_v8  ;;  %1169 = vmatprep.mubr.f32.mxu1 %v746_v9  ;;  %v775_v7 = vld [vmem:[%s3404_s9 + $0x390] sm:$0xff]  ;;  %v714_v8 = vld [vmem:[%s3404_s9 + $0x1a8] sm:$0xff] }
  0xe8   : > { %v778_v9 = vld [vmem:[%s3404_s9 + $0x3a8] sm:$0xff] }
  0xea   : > { %978 = vmatmul.mubr.f32.gmra.mrb[20].mxu0 %v681_v10  ;;  %1170 = vmatmul.mubr.f32.gmra.mrb[20].mxu1 %v745_v11  ;;  %v713_v10 = vld [vmem:[%s3404_s9 + $0x1a0] sm:$0xff] }
  0xeb   : > { %983 = vmatprep.mubr.f32.mxu0 %v684_v12  ;;  %1175 = vmatprep.mubr.f32.mxu1 %v748_v13  ;;  %v777_v11 = vld [vmem:[%s3404_s9 + $0x3a0] sm:$0xff]  ;;  %v716_v12 = vld [vmem:[%s3404_s9 + $0x1b8] sm:$0xff] }
  0xec   : > { %v780_v13 = vld [vmem:[%s3404_s9 + $0x3b8] sm:$0xff] }
  0xee   : > { %984 = vmatmul.mubr.f32.gmra.mrb[22].mxu0 %v683_v14  ;;  %1176 = vmatmul.mubr.f32.gmra.mrb[22].mxu1 %v747_v15  ;;  %v715_v14 = vld [vmem:[%s3404_s9 + $0x1b0] sm:$0xff] }
  0xef   : > { %989 = vmatprep.mubr.f32.mxu0 %v686_v16  ;;  %1181 = vmatprep.mubr.f32.mxu1 %v750_v17  ;;  %v779_v15 = vld [vmem:[%s3404_s9 + $0x3b0] sm:$0xff]  ;;  %v718_v16 = vld [vmem:[%s3404_s9 + $0x1c8] sm:$0xff] }
  0xf0   : > { %v782_v17 = vld [vmem:[%s3404_s9 + $0x3c8] sm:$0xff] }
  0xf2   : > { %990 = vmatmul.mubr.f32.gmra.mrb[24].mxu0 %v685_v18  ;;  %1182 = vmatmul.mubr.f32.gmra.mrb[24].mxu1 %v749_v19  ;;  %v717_v18 = vld [vmem:[%s3404_s9 + $0x1c0] sm:$0xff] }
  0xf3   : > { %995 = vmatprep.mubr.f32.mxu0 %v688_v20  ;;  %1187 = vmatprep.mubr.f32.mxu1 %v752_v21  ;;  %v781_v19 = vld [vmem:[%s3404_s9 + $0x3c0] sm:$0xff]  ;;  %v720_v20 = vld [vmem:[%s3404_s9 + $0x1d8] sm:$0xff] }
  0xf4   : > { %v784_v21 = vld [vmem:[%s3404_s9 + $0x3d8] sm:$0xff] }
  0xf6   : > { %996 = vmatmul.mubr.f32.gmra.mrb[26].mxu0 %v687_v22  ;;  %1188 = vmatmul.mubr.f32.gmra.mrb[26].mxu1 %v751_v23  ;;  %v719_v22 = vld [vmem:[%s3404_s9 + $0x1d0] sm:$0xff] }
  0xf7   : > { %1001 = vmatprep.mubr.f32.mxu0 %v690_v24  ;;  %1193 = vmatprep.mubr.f32.mxu1 %v754_v25  ;;  %v783_v23 = vld [vmem:[%s3404_s9 + $0x3d0] sm:$0xff]  ;;  %v722_v24 = vld [vmem:[%s3404_s9 + $0x1e8] sm:$0xff] }
  0xf8   : > { %v786_v25 = vld [vmem:[%s3404_s9 + $0x3e8] sm:$0xff] }
  0xfa   : > { %1002 = vmatmul.mubr.f32.gmra.mrb[28].mxu0 %v689_v26  ;;  %1194 = vmatmul.mubr.f32.gmra.mrb[28].mxu1 %v753_v27  ;;  %v721_v26 = vld [vmem:[%s3404_s9 + $0x1e0] sm:$0xff] }
  0xfb   : > { %1007 = vmatprep.mubr.f32.mxu0 %v692_v28  ;;  %1199 = vmatprep.mubr.f32.mxu1 %v756_v29  ;;  %v785_v27 = vld [vmem:[%s3404_s9 + $0x3e0] sm:$0xff]  ;;  %v724_v28 = vld [vmem:[%s3404_s9 + $0x1f8] sm:$0xff] }
  0xfc   : > { %v788_v29 = vld [vmem:[%s3404_s9 + $0x3f8] sm:$0xff] }
  0xfe   : > { %1008 = vmatmul.mubr.f32.gmra.mrb[30].mxu0 %v691_v30  ;;  %1200 = vmatmul.mubr.f32.gmra.mrb[30].mxu1 %v755_v31  ;;  %v723_v30 = vld [vmem:[%s3404_s9 + $0x1f0] sm:$0xff] }
  0xff   : > { %1013 = vmatprep.mubr.f32.mxu0 %v694_v32  ;;  %1205 = vmatprep.mubr.f32.mxu1 %v758_v33  ;;  %v787_v31 = vld [vmem:[%s3404_s9 + $0x3f0] sm:$0xff]  ;;  %v1691_v32 = vlaneseq  ;;  %s4013_s9 = scalar_lea.vmem [#allocation11], %s3401_s14 }
 0x101   : > { %v1692_v33 = vshrl.u32 %v1691_v32, 7 }
 0x102   : > { %1014 = vmatmul.mubr.f32.gmra.mrb[32].mxu0 %v693_v34  ;;  %1206 = vmatmul.mubr.f32.gmra.mrb[32].mxu1 %v757_v35  ;;  %v1689_v35 = vld [vmem:[%s381_s21] sm:$0x3] }
 0x103   : > { %1019 = vmatprep.mubr.f32.mxu0 %v696_v36  ;;  %1211 = vmatprep.mubr.f32.mxu1 %v760_v37  ;;  %v1693_v34 = vsub.s32 0, %v1692_v33  ;;  %v1697_v36 = vsub.s32 1, %v1692_v33 }
 0x105   : > { %v3618_v37 = vrot.slane %v1689_v35, %v1693_v34 }
 0x106   : > { %1020 = vmatmul.mubr.f32.gmra.mrb[34].mxu0 %v695_v38  ;;  %1212 = vmatmul.mubr.f32.gmra.mrb[34].mxu1 %v759_v39  ;;  %v3620_v38 = vrot.slane %v1689_v35, %v1697_v36 }
 0x107   : > { %1025 = vmatprep.mubr.f32.mxu0 %v698_v40  ;;  %1217 = vmatprep.mubr.f32.mxu1 %v762_v41 }
 0x10a   : > { %1026 = vmatmul.mubr.f32.gmra.mrb[36].mxu0 %v697_v42  ;;  %1218 = vmatmul.mubr.f32.gmra.mrb[36].mxu1 %v761_v43 }
 0x10b   : > { %1031 = vmatprep.mubr.f32.mxu0 %v700_v44  ;;  %1223 = vmatprep.mubr.f32.mxu1 %v764_v45 }
 0x10e   : > { %1032 = vmatmul.mubr.f32.gmra.mrb[38].mxu0 %v699_v46  ;;  %1224 = vmatmul.mubr.f32.gmra.mrb[38].mxu1 %v763_v47 }
 0x10f   : > { %1037 = vmatprep.mubr.f32.mxu0 %v702_v48  ;;  %1229 = vmatprep.mubr.f32.mxu1 %v766_v49 }
 0x112   : > { %1038 = vmatmul.mubr.f32.gmra.mrb[40].mxu0 %v701_v50  ;;  %1230 = vmatmul.mubr.f32.gmra.mrb[40].mxu1 %v765_v51 }
 0x113   : > { %1043 = vmatprep.mubr.f32.mxu0 %v704_v52  ;;  %1235 = vmatprep.mubr.f32.mxu1 %v768_v53 }
 0x116   : > { %1044 = vmatmul.mubr.f32.gmra.mrb[42].mxu0 %v703_v54  ;;  %1236 = vmatmul.mubr.f32.gmra.mrb[42].mxu1 %v767_v55 }
 0x117   : > { %1049 = vmatprep.mubr.f32.mxu0 %v706_v56  ;;  %1241 = vmatprep.mubr.f32.mxu1 %v770_v57 }
 0x11a   : > { %1050 = vmatmul.mubr.f32.gmra.mrb[44].mxu0 %v705_v58  ;;  %1242 = vmatmul.mubr.f32.gmra.mrb[44].mxu1 %v769_v59 }
 0x11b   : > { %1055 = vmatprep.mubr.f32.mxu0 %v708_v60  ;;  %1247 = vmatprep.mubr.f32.mxu1 %v772_v61 }
 0x11e   : > { %1056 = vmatmul.mubr.f32.gmra.mrb[46].mxu0 %v707_v62  ;;  %1248 = vmatmul.mubr.f32.gmra.mrb[46].mxu1 %v771_v63 }
 0x11f   : > { %1061 = vmatprep.mubr.f32.mxu0 %v710_v0  ;;  %1253 = vmatprep.mubr.f32.mxu1 %v774_v1 }
 0x122   : > { %1062 = vmatmul.mubr.f32.gmra.mrb[48].mxu0 %v709_v2  ;;  %1254 = vmatmul.mubr.f32.gmra.mrb[48].mxu1 %v773_v3 }
 0x123   : > { %1067 = vmatprep.mubr.f32.mxu0 %v712_v4  ;;  %1259 = vmatprep.mubr.f32.mxu1 %v776_v5 }
 0x126   : > { %1068 = vmatmul.mubr.f32.gmra.mrb[50].mxu0 %v711_v6  ;;  %1260 = vmatmul.mubr.f32.gmra.mrb[50].mxu1 %v775_v7 }
 0x127   : > { %1073 = vmatprep.mubr.f32.mxu0 %v714_v8  ;;  %1265 = vmatprep.mubr.f32.mxu1 %v778_v9 }
 0x12a   : > { %1074 = vmatmul.mubr.f32.gmra.mrb[52].mxu0 %v713_v10  ;;  %1266 = vmatmul.mubr.f32.gmra.mrb[52].mxu1 %v777_v11 }
 0x12b   : > { %1079 = vmatprep.mubr.f32.mxu0 %v716_v12  ;;  %1271 = vmatprep.mubr.f32.mxu1 %v780_v13 }
 0x12e   : > { %1080 = vmatmul.mubr.f32.gmra.mrb[54].mxu0 %v715_v14  ;;  %1272 = vmatmul.mubr.f32.gmra.mrb[54].mxu1 %v779_v15 }
 0x12f   : > { %1085 = vmatprep.mubr.f32.mxu0 %v718_v16  ;;  %1277 = vmatprep.mubr.f32.mxu1 %v782_v17 }
 0x132   : > { %1086 = vmatmul.mubr.f32.gmra.mrb[56].mxu0 %v717_v18  ;;  %1278 = vmatmul.mubr.f32.gmra.mrb[56].mxu1 %v781_v19 }
 0x133   : > { %1091 = vmatprep.mubr.f32.mxu0 %v720_v20  ;;  %1283 = vmatprep.mubr.f32.mxu1 %v784_v21 }
 0x136   : > { %1092 = vmatmul.mubr.f32.gmra.mrb[58].mxu0 %v719_v22  ;;  %1284 = vmatmul.mubr.f32.gmra.mrb[58].mxu1 %v783_v23 }
 0x137   : > { %1097 = vmatprep.mubr.f32.mxu0 %v722_v24  ;;  %1289 = vmatprep.mubr.f32.mxu1 %v786_v25 }
 0x13a   : > { %1098 = vmatmul.mubr.f32.gmra.mrb[60].mxu0 %v721_v26  ;;  %1290 = vmatmul.mubr.f32.gmra.mrb[60].mxu1 %v785_v27 }
 0x13b   : > { %1103 = vmatprep.mubr.f32.mxu0 %v724_v28  ;;  %1295 = vmatprep.mubr.f32.mxu1 %v788_v29 }
 0x13e   : > { %1104 = vmatmul.mubr.f32.gmra.mrb[62].mxu0 %v723_v30  ;;  %1296 = vmatmul.mubr.f32.gmra.mrb[62].mxu1 %v787_v31 }
 0x195   : > { %v919_v39 = vpop.f32.mrb[0].mxu0  ;;  %v1111_v40 = vpop.f32.mrb[0].mxu1 }
 0x196   : > { %v3623_v41 = vadd.f32 %v3618_v37, %v919_v39  ;;  %v3626_v42 = vadd.f32 %v3618_v37, %v1111_v40  ;;  %v921_v43 = vpop.f32.mrb[1].mxu0  ;;  %v1113_v44 = vpop.f32.mrb[1].mxu1 }
 0x197   : > { %v3629_v45 = vadd.f32 %v3620_v38, %v921_v43  ;;  %v3632_v46 = vadd.f32 %v3620_v38, %v1113_v44 }
 0x198   : > { %5034 = vst [vmem:[#allocation24_spill] sm:$0xff] %v3626_v42  ;;  %1833 = vst [vmem:[%s4007_s15] sm:$0xff] (!%p2541_p3), %v3623_v41 }
 0x199   : > { %5035 = vst [vmem:[#allocation25_spill] sm:$0xff] %v3632_v46  ;;  %v925_v47 = vpop.f32.mrb[2].mxu0  ;;  %v1117_v48 = vpop.f32.mrb[2].mxu1  ;;  %1834 = vst [vmem:[%s4007_s15 + $0x8] sm:$0xff] (!%p2541_p3), %v3629_v45 }
 0x19a   : > { %v3635_v49 = vadd.f32 %v3618_v37, %v925_v47  ;;  %v3638_v50 = vadd.f32 %v3618_v37, %v1117_v48  ;;  %v927_v51 = vpop.f32.mrb[3].mxu0  ;;  %v1119_v52 = vpop.f32.mrb[3].mxu1 }
 0x19b   : > { %v3641_v53 = vadd.f32 %v3620_v38, %v927_v51  ;;  %v3644_v54 = vadd.f32 %v3620_v38, %v1119_v52 }
 0x19c   : > { %5036 = vst [vmem:[#allocation26_spill] sm:$0xff] %v3638_v50  ;;  %1835 = vst [vmem:[%s4007_s15 + $0x10] sm:$0xff] (!%p2541_p3), %v3635_v49 }
 0x19d   : > { %5037 = vst [vmem:[#allocation27_spill] sm:$0xff] %v3644_v54  ;;  %v931_v55 = vpop.f32.mrb[4].mxu0  ;;  %v1123_v56 = vpop.f32.mrb[4].mxu1  ;;  %1836 = vst [vmem:[%s4007_s15 + $0x18] sm:$0xff] (!%p2541_p3), %v3641_v53 }
 0x19e   : > { %v3647_v57 = vadd.f32 %v3618_v37, %v931_v55  ;;  %v3650_v58 = vadd.f32 %v3618_v37, %v1123_v56  ;;  %v933_v59 = vpop.f32.mrb[5].mxu0  ;;  %v1125_v60 = vpop.f32.mrb[5].mxu1 }
 0x19f   : > { %v3653_v61 = vadd.f32 %v3620_v38, %v933_v59  ;;  %v3656_v62 = vadd.f32 %v3620_v38, %v1125_v60 }
 0x1a0   : > { %5038 = vst [vmem:[#allocation28_spill] sm:$0xff] %v3650_v58  ;;  %1837 = vst [vmem:[%s4007_s15 + $0x20] sm:$0xff] (!%p2541_p3), %v3647_v57 }
 0x1a1   : > { %5039 = vst [vmem:[#allocation29_spill] sm:$0xff] %v3656_v62  ;;  %v937_v63 = vpop.f32.mrb[6].mxu0  ;;  %v1129_v0 = vpop.f32.mrb[6].mxu1  ;;  %1838 = vst [vmem:[%s4007_s15 + $0x28] sm:$0xff] (!%p2541_p3), %v3653_v61 }
 0x1a2   : > { %v3659_v1 = vadd.f32 %v3618_v37, %v937_v63  ;;  %v3662_v2 = vadd.f32 %v3618_v37, %v1129_v0  ;;  %v939_v3 = vpop.f32.mrb[7].mxu0  ;;  %v1131_v4 = vpop.f32.mrb[7].mxu1 }
 0x1a3   : > { %v3665_v5 = vadd.f32 %v3620_v38, %v939_v3  ;;  %v3668_v6 = vadd.f32 %v3620_v38, %v1131_v4 }
 0x1a4   : > { %5040 = vst [vmem:[#allocation30_spill] sm:$0xff] %v3662_v2  ;;  %1839 = vst [vmem:[%s4007_s15 + $0x30] sm:$0xff] (!%p2541_p3), %v3659_v1 }
 0x1a5   : > { %5041 = vst [vmem:[#allocation31_spill] sm:$0xff] %v3668_v6  ;;  %v943_v7 = vpop.f32.mrb[8].mxu0  ;;  %v1135_v8 = vpop.f32.mrb[8].mxu1  ;;  %1840 = vst [vmem:[%s4007_s15 + $0x38] sm:$0xff] (!%p2541_p3), %v3665_v5 }
 0x1a6   : > { %v3671_v9 = vadd.f32 %v3618_v37, %v943_v7  ;;  %v3674_v10 = vadd.f32 %v3618_v37, %v1135_v8  ;;  %v945_v11 = vpop.f32.mrb[9].mxu0  ;;  %v1137_v12 = vpop.f32.mrb[9].mxu1 }
 0x1a7   : > { %v3677_v13 = vadd.f32 %v3620_v38, %v945_v11  ;;  %v3680_v14 = vadd.f32 %v3620_v38, %v1137_v12 }
 0x1a8   : > { %5042 = vst [vmem:[#allocation32_spill] sm:$0xff] %v3674_v10  ;;  %1841 = vst [vmem:[%s4007_s15 + $0x40] sm:$0xff] (!%p2541_p3), %v3671_v9 }
 0x1a9   : > { %5043 = vst [vmem:[#allocation33_spill] sm:$0xff] %v3680_v14  ;;  %v949_v15 = vpop.f32.mrb[10].mxu0  ;;  %v1141_v16 = vpop.f32.mrb[10].mxu1  ;;  %1842 = vst [vmem:[%s4007_s15 + $0x48] sm:$0xff] (!%p2541_p3), %v3677_v13 }
 0x1aa   : > { %v3683_v17 = vadd.f32 %v3618_v37, %v949_v15  ;;  %v3686_v18 = vadd.f32 %v3618_v37, %v1141_v16  ;;  %v951_v19 = vpop.f32.mrb[11].mxu0  ;;  %v1143_v20 = vpop.f32.mrb[11].mxu1 }
 0x1ab   : > { %v3689_v21 = vadd.f32 %v3620_v38, %v951_v19  ;;  %v3692_v22 = vadd.f32 %v3620_v38, %v1143_v20 }
 0x1ac   : > { %5044 = vst [vmem:[#allocation34_spill] sm:$0xff] %v3686_v18  ;;  %1843 = vst [vmem:[%s4007_s15 + $0x50] sm:$0xff] (!%p2541_p3), %v3683_v17 }
 0x1ad   : > { %5045 = vst [vmem:[#allocation35_spill] sm:$0xff] %v3692_v22  ;;  %v955_v23 = vpop.f32.mrb[12].mxu0  ;;  %v1147_v24 = vpop.f32.mrb[12].mxu1  ;;  %1844 = vst [vmem:[%s4007_s15 + $0x58] sm:$0xff] (!%p2541_p3), %v3689_v21 }
 0x1ae   : > { %v3695_v25 = vadd.f32 %v3618_v37, %v955_v23  ;;  %v3698_v26 = vadd.f32 %v3618_v37, %v1147_v24  ;;  %v957_v27 = vpop.f32.mrb[13].mxu0  ;;  %v1149_v28 = vpop.f32.mrb[13].mxu1 }
 0x1af   : > { %v3701_v29 = vadd.f32 %v3620_v38, %v957_v27  ;;  %v3704_v30 = vadd.f32 %v3620_v38, %v1149_v28 }
 0x1b0   : > { %5046 = vst [vmem:[#allocation36_spill] sm:$0xff] %v3698_v26  ;;  %1845 = vst [vmem:[%s4007_s15 + $0x60] sm:$0xff] (!%p2541_p3), %v3695_v25 }
 0x1b1   : > { %5047 = vst [vmem:[#allocation37_spill] sm:$0xff] %v3704_v30  ;;  %v961_v31 = vpop.f32.mrb[14].mxu0  ;;  %v1153_v32 = vpop.f32.mrb[14].mxu1  ;;  %1846 = vst [vmem:[%s4007_s15 + $0x68] sm:$0xff] (!%p2541_p3), %v3701_v29 }
 0x1b2   : > { %v3707_v33 = vadd.f32 %v3618_v37, %v961_v31  ;;  %v3710_v34 = vadd.f32 %v3618_v37, %v1153_v32  ;;  %v963_v35 = vpop.f32.mrb[15].mxu0  ;;  %v1155_v36 = vpop.f32.mrb[15].mxu1 }
 0x1b3   : > { %v3713_v39 = vadd.f32 %v3620_v38, %v963_v35  ;;  %v3716_v40 = vadd.f32 %v3620_v38, %v1155_v36 }
 0x1b4   : > { %5048 = vst [vmem:[#allocation38_spill] sm:$0xff] %v3710_v34  ;;  %1847 = vst [vmem:[%s4007_s15 + $0x70] sm:$0xff] (!%p2541_p3), %v3707_v33 }
 0x1b5   : > { %5049 = vst [vmem:[#allocation39_spill] sm:$0xff] %v3716_v40  ;;  %v967_v43 = vpop.f32.mrb[16].mxu0  ;;  %v1159_v44 = vpop.f32.mrb[16].mxu1  ;;  %1848 = vst [vmem:[%s4007_s15 + $0x78] sm:$0xff] (!%p2541_p3), %v3713_v39 }
 0x1b6   : > { %v3719_v47 = vadd.f32 %v3618_v37, %v967_v43  ;;  %v3722_v48 = vadd.f32 %v3618_v37, %v1159_v44  ;;  %v969_v51 = vpop.f32.mrb[17].mxu0  ;;  %v1161_v52 = vpop.f32.mrb[17].mxu1 }
 0x1b7   : > { %v3725_v55 = vadd.f32 %v3620_v38, %v969_v51  ;;  %v3728_v56 = vadd.f32 %v3620_v38, %v1161_v52 }
 0x1b8   : > { %5050 = vst [vmem:[#allocation40_spill] sm:$0xff] %v3722_v48  ;;  %1849 = vst [vmem:[%s4007_s15 + $0x80] sm:$0xff] (!%p2541_p3), %v3719_v47 }
 0x1b9   : > { %5051 = vst [vmem:[#allocation41_spill] sm:$0xff] %v3728_v56  ;;  %v973_v59 = vpop.f32.mrb[18].mxu0  ;;  %v1165_v60 = vpop.f32.mrb[18].mxu1  ;;  %1850 = vst [vmem:[%s4007_s15 + $0x88] sm:$0xff] (!%p2541_p3), %v3725_v55 }
 0x1ba   : > { %v3731_v63 = vadd.f32 %v3618_v37, %v973_v59  ;;  %v3734_v0 = vadd.f32 %v3618_v37, %v1165_v60  ;;  %v975_v3 = vpop.f32.mrb[19].mxu0  ;;  %v1167_v4 = vpop.f32.mrb[19].mxu1 }
 0x1bb   : > { %v3737_v7 = vadd.f32 %v3620_v38, %v975_v3  ;;  %v3740_v8 = vadd.f32 %v3620_v38, %v1167_v4 }
 0x1bc   : > { %5052 = vst [vmem:[#allocation42_spill] sm:$0xff] %v3734_v0  ;;  %1851 = vst [vmem:[%s4007_s15 + $0x90] sm:$0xff] (!%p2541_p3), %v3731_v63 }
 0x1bd   : > { %5053 = vst [vmem:[#allocation43_spill] sm:$0xff] %v3740_v8  ;;  %v979_v11 = vpop.f32.mrb[20].mxu0  ;;  %v1171_v12 = vpop.f32.mrb[20].mxu1  ;;  %1852 = vst [vmem:[%s4007_s15 + $0x98] sm:$0xff] (!%p2541_p3), %v3737_v7 }
 0x1be   : > { %v3743_v15 = vadd.f32 %v3618_v37, %v979_v11  ;;  %v3746_v16 = vadd.f32 %v3618_v37, %v1171_v12  ;;  %v981_v19 = vpop.f32.mrb[21].mxu0  ;;  %v1173_v20 = vpop.f32.mrb[21].mxu1 }
 0x1bf   : > { %v3749_v23 = vadd.f32 %v3620_v38, %v981_v19  ;;  %v3752_v24 = vadd.f32 %v3620_v38, %v1173_v20 }
 0x1c0   : > { %5054 = vst [vmem:[#allocation44_spill] sm:$0xff] %v3746_v16  ;;  %1853 = vst [vmem:[%s4007_s15 + $0xa0] sm:$0xff] (!%p2541_p3), %v3743_v15 }
 0x1c1   : > { %5055 = vst [vmem:[#allocation45_spill] sm:$0xff] %v3752_v24  ;;  %v985_v27 = vpop.f32.mrb[22].mxu0  ;;  %v1177_v28 = vpop.f32.mrb[22].mxu1  ;;  %1854 = vst [vmem:[%s4007_s15 + $0xa8] sm:$0xff] (!%p2541_p3), %v3749_v23 }
 0x1c2   : > { %v3755_v31 = vadd.f32 %v3618_v37, %v985_v27  ;;  %v3758_v32 = vadd.f32 %v3618_v37, %v1177_v28  ;;  %v987_v35 = vpop.f32.mrb[23].mxu0  ;;  %v1179_v36 = vpop.f32.mrb[23].mxu1 }
 0x1c3   : > { %v3761_v43 = vadd.f32 %v3620_v38, %v987_v35  ;;  %v3764_v44 = vadd.f32 %v3620_v38, %v1179_v36 }
 0x1c4   : > { %5056 = vst [vmem:[#allocation46_spill] sm:$0xff] %v3758_v32  ;;  %1855 = vst [vmem:[%s4007_s15 + $0xb0] sm:$0xff] (!%p2541_p3), %v3755_v31 }
 0x1c5   : > { %5057 = vst [vmem:[#allocation47_spill] sm:$0xff] %v3764_v44  ;;  %v991_v51 = vpop.f32.mrb[24].mxu0  ;;  %v1183_v52 = vpop.f32.mrb[24].mxu1  ;;  %1856 = vst [vmem:[%s4007_s15 + $0xb8] sm:$0xff] (!%p2541_p3), %v3761_v43 }
 0x1c6   : > { %v3767_v59 = vadd.f32 %v3618_v37, %v991_v51  ;;  %v3770_v60 = vadd.f32 %v3618_v37, %v1183_v52  ;;  %v993_v3 = vpop.f32.mrb[25].mxu0  ;;  %v1185_v4 = vpop.f32.mrb[25].mxu1 }
 0x1c7   : > { %v3773_v11 = vadd.f32 %v3620_v38, %v993_v3  ;;  %v3776_v12 = vadd.f32 %v3620_v38, %v1185_v4 }
 0x1c8   : > { %5058 = vst [vmem:[#allocation48_spill] sm:$0xff] %v3770_v60  ;;  %1857 = vst [vmem:[%s4007_s15 + $0xc0] sm:$0xff] (!%p2541_p3), %v3767_v59 }
 0x1c9   : > { %5059 = vst [vmem:[#allocation49_spill] sm:$0xff] %v3776_v12  ;;  %v997_v19 = vpop.f32.mrb[26].mxu0  ;;  %v1189_v20 = vpop.f32.mrb[26].mxu1  ;;  %1858 = vst [vmem:[%s4007_s15 + $0xc8] sm:$0xff] (!%p2541_p3), %v3773_v11 }
 0x1ca   : > { %v3779_v27 = vadd.f32 %v3618_v37, %v997_v19  ;;  %v3782_v28 = vadd.f32 %v3618_v37, %v1189_v20  ;;  %v999_v35 = vpop.f32.mrb[27].mxu0  ;;  %v1191_v36 = vpop.f32.mrb[27].mxu1 }
 0x1cb   : > { %v3785_v51 = vadd.f32 %v3620_v38, %v999_v35  ;;  %v3788_v52 = vadd.f32 %v3620_v38, %v1191_v36 }
 0x1cc   : > { %5060 = vst [vmem:[#allocation50_spill] sm:$0xff] %v3782_v28  ;;  %1859 = vst [vmem:[%s4007_s15 + $0xd0] sm:$0xff] (!%p2541_p3), %v3779_v27 }
 0x1cd   : > { %5061 = vst [vmem:[#allocation51_spill] sm:$0xff] %v3788_v52  ;;  %v1003_v3 = vpop.f32.mrb[28].mxu0  ;;  %v1195_v60 = vpop.f32.mrb[28].mxu1  ;;  %1860 = vst [vmem:[%s4007_s15 + $0xd8] sm:$0xff] (!%p2541_p3), %v3785_v51 }
 0x1ce   : > { %v3791_v4 = vadd.f32 %v3618_v37, %v1003_v3  ;;  %v3794_v12 = vadd.f32 %v3618_v37, %v1195_v60  ;;  %v1005_v19 = vpop.f32.mrb[29].mxu0  ;;  %v1197_v44 = vpop.f32.mrb[29].mxu1 }
 0x1cf   : > { %v3797_v20 = vadd.f32 %v3620_v38, %v1005_v19  ;;  %v3800_v28 = vadd.f32 %v3620_v38, %v1197_v44 }
 0x1d0   : > { %5062 = vst [vmem:[#allocation52_spill] sm:$0xff] %v3794_v12  ;;  %1861 = vst [vmem:[%s4007_s15 + $0xe0] sm:$0xff] (!%p2541_p3), %v3791_v4 }
 0x1d1   : > { %5063 = vst [vmem:[#allocation53_spill] sm:$0xff] %v3800_v28  ;;  %v1009_v35 = vpop.f32.mrb[30].mxu0  ;;  %v1201_v32 = vpop.f32.mrb[30].mxu1  ;;  %1862 = vst [vmem:[%s4007_s15 + $0xe8] sm:$0xff] (!%p2541_p3), %v3797_v20 }
 0x1d2   : > { %v3803_v36 = vadd.f32 %v3618_v37, %v1009_v35  ;;  %v3806_v52 = vadd.f32 %v3618_v37, %v1201_v32  ;;  %v1011_v3 = vpop.f32.mrb[31].mxu0  ;;  %v1203_v24 = vpop.f32.mrb[31].mxu1 }
 0x1d3   : > { %v3809_v60 = vadd.f32 %v3620_v38, %v1011_v3  ;;  %v3812_v12 = vadd.f32 %v3620_v38, %v1203_v24 }
 0x1d4   : > { %5064 = vst [vmem:[#allocation54_spill] sm:$0xff] %v3806_v52  ;;  %1863 = vst [vmem:[%s4007_s15 + $0xf0] sm:$0xff] (!%p2541_p3), %v3803_v36 }
 0x1d5   : > { %5065 = vst [vmem:[#allocation55_spill] sm:$0xff] %v3812_v12  ;;  %v1015_v19 = vpop.f32.mrb[32].mxu0  ;;  %v1207_v16 = vpop.f32.mrb[32].mxu1  ;;  %1864 = vst [vmem:[%s4007_s15 + $0xf8] sm:$0xff] (!%p2541_p3), %v3809_v60 }
 0x1d6   : > { %v3815_v44 = vadd.f32 %v3618_v37, %v1015_v19  ;;  %v3818_v28 = vadd.f32 %v3618_v37, %v1207_v16  ;;  %v1017_v35 = vpop.f32.mrb[33].mxu0  ;;  %v1209_v8 = vpop.f32.mrb[33].mxu1 }
 0x1d7   : > { %v3821_v32 = vadd.f32 %v3620_v38, %v1017_v35  ;;  %v3824_v52 = vadd.f32 %v3620_v38, %v1209_v8 }
 0x1d8   : > { %5066 = vst [vmem:[#allocation56_spill] sm:$0xff] %v3818_v28  ;;  %1865 = vst [vmem:[%s4007_s15 + $0x100] sm:$0xff] (!%p2541_p3), %v3815_v44 }
 0x1d9   : > { %5067 = vst [vmem:[#allocation57_spill] sm:$0xff] %v3824_v52  ;;  %v1021_v3 = vpop.f32.mrb[34].mxu0  ;;  %v1213_v0 = vpop.f32.mrb[34].mxu1  ;;  %1866 = vst [vmem:[%s4007_s15 + $0x108] sm:$0xff] (!%p2541_p3), %v3821_v32 }
 0x1da   : > { %v3827_v24 = vadd.f32 %v3618_v37, %v1021_v3  ;;  %v3830_v12 = vadd.f32 %v3618_v37, %v1213_v0  ;;  %v1023_v19 = vpop.f32.mrb[35].mxu0  ;;  %v1215_v56 = vpop.f32.mrb[35].mxu1 }
 0x1db   : > { %v3833_v16 = vadd.f32 %v3620_v38, %v1023_v19  ;;  %v3836_v28 = vadd.f32 %v3620_v38, %v1215_v56 }
 0x1dc   : > { %5068 = vst [vmem:[#allocation58_spill] sm:$0xff] %v3830_v12  ;;  %1867 = vst [vmem:[%s4007_s15 + $0x110] sm:$0xff] (!%p2541_p3), %v3827_v24 }
 0x1dd   : > { %5069 = vst [vmem:[#allocation59_spill] sm:$0xff] %v3836_v28  ;;  %v1027_v35 = vpop.f32.mrb[36].mxu0  ;;  %v1219_v48 = vpop.f32.mrb[36].mxu1  ;;  %1868 = vst [vmem:[%s4007_s15 + $0x118] sm:$0xff] (!%p2541_p3), %v3833_v16 }
 0x1de   : > { %v3839_v8 = vadd.f32 %v3618_v37, %v1027_v35  ;;  %v3842_v52 = vadd.f32 %v3618_v37, %v1219_v48  ;;  %v1029_v3 = vpop.f32.mrb[37].mxu0  ;;  %v1221_v40 = vpop.f32.mrb[37].mxu1 }
 0x1df   : > { %v3845_v0 = vadd.f32 %v3620_v38, %v1029_v3  ;;  %v3848_v12 = vadd.f32 %v3620_v38, %v1221_v40 }
 0x1e0   : > { %5070 = vst [vmem:[#allocation60_spill] sm:$0xff] %v3842_v52  ;;  %1869 = vst [vmem:[%s4007_s15 + $0x120] sm:$0xff] (!%p2541_p3), %v3839_v8 }
 0x1e1   : > { %5071 = vst [vmem:[#allocation61_spill] sm:$0xff] %v3848_v12  ;;  %v1033_v19 = vpop.f32.mrb[38].mxu0  ;;  %v1225_v34 = vpop.f32.mrb[38].mxu1  ;;  %1870 = vst [vmem:[%s4007_s15 + $0x128] sm:$0xff] (!%p2541_p3), %v3845_v0 }
 0x1e2   : > { %v3851_v56 = vadd.f32 %v3618_v37, %v1033_v19  ;;  %v3854_v28 = vadd.f32 %v3618_v37, %v1225_v34  ;;  %v1035_v35 = vpop.f32.mrb[39].mxu0  ;;  %v1227_v30 = vpop.f32.mrb[39].mxu1 }
 0x1e3   : > { %v3857_v48 = vadd.f32 %v3620_v38, %v1035_v35  ;;  %v3860_v52 = vadd.f32 %v3620_v38, %v1227_v30 }
 0x1e4   : > { %5072 = vst [vmem:[#allocation62_spill] sm:$0xff] %v3854_v28  ;;  %1871 = vst [vmem:[%s4007_s15 + $0x130] sm:$0xff] (!%p2541_p3), %v3851_v56 }
 0x1e5   : > { %5073 = vst [vmem:[#allocation63_spill] sm:$0xff] %v3860_v52  ;;  %v1039_v3 = vpop.f32.mrb[40].mxu0  ;;  %v1231_v26 = vpop.f32.mrb[40].mxu1  ;;  %1872 = vst [vmem:[%s4007_s15 + $0x138] sm:$0xff] (!%p2541_p3), %v3857_v48 }
 0x1e6   : > { %v3863_v40 = vadd.f32 %v3618_v37, %v1039_v3  ;;  %v3866_v12 = vadd.f32 %v3618_v37, %v1231_v26  ;;  %v1041_v19 = vpop.f32.mrb[41].mxu0  ;;  %v1233_v22 = vpop.f32.mrb[41].mxu1 }
 0x1e7   : > { %v3869_v34 = vadd.f32 %v3620_v38, %v1041_v19  ;;  %v3872_v28 = vadd.f32 %v3620_v38, %v1233_v22 }
 0x1e8   : > { %5074 = vst [vmem:[#allocation64_spill] sm:$0xff] %v3866_v12  ;;  %1873 = vst [vmem:[%s4007_s15 + $0x140] sm:$0xff] (!%p2541_p3), %v3863_v40 }
 0x1e9   : > { %5075 = vst [vmem:[#allocation65_spill] sm:$0xff] %v3872_v28  ;;  %v1045_v35 = vpop.f32.mrb[42].mxu0  ;;  %v1237_v18 = vpop.f32.mrb[42].mxu1  ;;  %1874 = vst [vmem:[%s4007_s15 + $0x148] sm:$0xff] (!%p2541_p3), %v3869_v34 }
 0x1ea   : > { %v3875_v30 = vadd.f32 %v3618_v37, %v1045_v35  ;;  %v3878_v52 = vadd.f32 %v3618_v37, %v1237_v18  ;;  %v1047_v3 = vpop.f32.mrb[43].mxu0  ;;  %v1239_v14 = vpop.f32.mrb[43].mxu1 }
 0x1eb   : > { %v3881_v26 = vadd.f32 %v3620_v38, %v1047_v3  ;;  %v3884_v12 = vadd.f32 %v3620_v38, %v1239_v14 }
 0x1ec   : > { %5076 = vst [vmem:[#allocation66_spill] sm:$0xff] %v3878_v52  ;;  %1875 = vst [vmem:[%s4007_s15 + $0x150] sm:$0xff] (!%p2541_p3), %v3875_v30 }
 0x1ed   : > { %5077 = vst [vmem:[#allocation67_spill] sm:$0xff] %v3884_v12  ;;  %v1051_v19 = vpop.f32.mrb[44].mxu0  ;;  %v1243_v10 = vpop.f32.mrb[44].mxu1  ;;  %1876 = vst [vmem:[%s4007_s15 + $0x158] sm:$0xff] (!%p2541_p3), %v3881_v26 }
 0x1ee   : > { %v3887_v22 = vadd.f32 %v3618_v37, %v1051_v19  ;;  %v3890_v28 = vadd.f32 %v3618_v37, %v1243_v10  ;;  %v1053_v35 = vpop.f32.mrb[45].mxu0  ;;  %v1245_v6 = vpop.f32.mrb[45].mxu1 }
 0x1ef   : > { %v3893_v18 = vadd.f32 %v3620_v38, %v1053_v35  ;;  %v3896_v52 = vadd.f32 %v3620_v38, %v1245_v6 }
 0x1f0   : > { %5078 = vst [vmem:[#allocation68_spill] sm:$0xff] %v3890_v28  ;;  %1877 = vst [vmem:[%s4007_s15 + $0x160] sm:$0xff] (!%p2541_p3), %v3887_v22 }
 0x1f1   : > { %5079 = vst [vmem:[#allocation69_spill] sm:$0xff] %v3896_v52  ;;  %v1057_v3 = vpop.f32.mrb[46].mxu0  ;;  %v1249_v2 = vpop.f32.mrb[46].mxu1  ;;  %1878 = vst [vmem:[%s4007_s15 + $0x168] sm:$0xff] (!%p2541_p3), %v3893_v18 }
 0x1f2   : > { %v3899_v14 = vadd.f32 %v3618_v37, %v1057_v3  ;;  %v3902_v12 = vadd.f32 %v3618_v37, %v1249_v2  ;;  %v1059_v19 = vpop.f32.mrb[47].mxu0  ;;  %v1251_v62 = vpop.f32.mrb[47].mxu1 }
 0x1f3   : > { %v3905_v10 = vadd.f32 %v3620_v38, %v1059_v19  ;;  %v3908_v28 = vadd.f32 %v3620_v38, %v1251_v62 }
 0x1f4   : > { %5080 = vst [vmem:[#allocation70_spill] sm:$0xff] %v3902_v12  ;;  %1879 = vst [vmem:[%s4007_s15 + $0x170] sm:$0xff] (!%p2541_p3), %v3899_v14 }
 0x1f5   : > { %5081 = vst [vmem:[#allocation71_spill] sm:$0xff] %v3908_v28  ;;  %v1063_v35 = vpop.f32.mrb[48].mxu0  ;;  %v1255_v58 = vpop.f32.mrb[48].mxu1  ;;  %1880 = vst [vmem:[%s4007_s15 + $0x178] sm:$0xff] (!%p2541_p3), %v3905_v10 }
 0x1f6   : > { %v3911_v6 = vadd.f32 %v3618_v37, %v1063_v35  ;;  %v3914_v52 = vadd.f32 %v3618_v37, %v1255_v58  ;;  %v1065_v3 = vpop.f32.mrb[49].mxu0  ;;  %v1257_v54 = vpop.f32.mrb[49].mxu1 }
 0x1f7   : > { %v3917_v2 = vadd.f32 %v3620_v38, %v1065_v3  ;;  %v3920_v12 = vadd.f32 %v3620_v38, %v1257_v54 }
 0x1f8   : > { %5082 = vst [vmem:[#allocation72_spill] sm:$0xff] %v3914_v52  ;;  %1881 = vst [vmem:[%s4007_s15 + $0x180] sm:$0xff] (!%p2541_p3), %v3911_v6 }
 0x1f9   : > { %5083 = vst [vmem:[#allocation73_spill] sm:$0xff] %v3920_v12  ;;  %v1069_v19 = vpop.f32.mrb[50].mxu0  ;;  %v1261_v50 = vpop.f32.mrb[50].mxu1  ;;  %1882 = vst [vmem:[%s4007_s15 + $0x188] sm:$0xff] (!%p2541_p3), %v3917_v2 }
 0x1fa   : > { %v3923_v62 = vadd.f32 %v3618_v37, %v1069_v19  ;;  %v3926_v28 = vadd.f32 %v3618_v37, %v1261_v50  ;;  %v1071_v35 = vpop.f32.mrb[51].mxu0  ;;  %v1263_v46 = vpop.f32.mrb[51].mxu1 }
 0x1fb   : > { %v3929_v58 = vadd.f32 %v3620_v38, %v1071_v35  ;;  %v3932_v52 = vadd.f32 %v3620_v38, %v1263_v46 }
 0x1fc   : > { %5084 = vst [vmem:[#allocation74_spill] sm:$0xff] %v3923_v62  ;;  %5085 = vst [vmem:[#allocation75_spill] sm:$0xff] %v3926_v28 }
 0x1fd   : > { %5086 = vst [vmem:[#allocation76_spill] sm:$0xff] %v3929_v58  ;;  %5087 = vst [vmem:[#allocation77_spill] sm:$0xff] %v3932_v52  ;;  %v1075_v3 = vpop.f32.mrb[52].mxu0  ;;  %v1267_v42 = vpop.f32.mrb[52].mxu1 }
 0x1fe   : > { %v3935_v54 = vadd.f32 %v3618_v37, %v1075_v3  ;;  %v3938_v12 = vadd.f32 %v3618_v37, %v1267_v42  ;;  %v1077_v19 = vpop.f32.mrb[53].mxu0  ;;  %v1269_v62 = vpop.f32.mrb[53].mxu1 }
 0x1ff   : > { %v3941_v50 = vadd.f32 %v3620_v38, %v1077_v19  ;;  %v3944_v28 = vadd.f32 %v3620_v38, %v1269_v62 }
 0x200   : > { %5088 = vst [vmem:[#allocation78_spill] sm:$0xff] %v3935_v54  ;;  %5089 = vst [vmem:[#allocation79_spill] sm:$0xff] %v3938_v12 }
 0x201   : > { %5090 = vst [vmem:[#allocation80_spill] sm:$0xff] %v3941_v50  ;;  %5091 = vst [vmem:[#allocation81_spill] sm:$0xff] %v3944_v28  ;;  %v1081_v35 = vpop.f32.mrb[54].mxu0  ;;  %v1273_v58 = vpop.f32.mrb[54].mxu1 }
 0x202   : > { %v3947_v46 = vadd.f32 %v3618_v37, %v1081_v35  ;;  %v3950_v52 = vadd.f32 %v3618_v37, %v1273_v58  ;;  %v1083_v3 = vpop.f32.mrb[55].mxu0  ;;  %v1275_v54 = vpop.f32.mrb[55].mxu1 }
 0x203   : > { %v3953_v42 = vadd.f32 %v3620_v38, %v1083_v3  ;;  %v3956_v12 = vadd.f32 %v3620_v38, %v1275_v54 }
 0x204   : > { %5092 = vst [vmem:[#allocation82_spill] sm:$0xff] %v3947_v46  ;;  %5093 = vst [vmem:[#allocation83_spill] sm:$0xff] %v3950_v52 }
 0x205   : > { %5094 = vst [vmem:[#allocation84_spill] sm:$0xff] %v3953_v42  ;;  %5095 = vst [vmem:[#allocation85_spill] sm:$0xff] %v3956_v12  ;;  %v1087_v19 = vpop.f32.mrb[56].mxu0  ;;  %v1279_v50 = vpop.f32.mrb[56].mxu1 }
 0x206   : > { %v3959_v62 = vadd.f32 %v3618_v37, %v1087_v19  ;;  %v3962_v28 = vadd.f32 %v3618_v37, %v1279_v50  ;;  %v1089_v35 = vpop.f32.mrb[57].mxu0  ;;  %v1281_v46 = vpop.f32.mrb[57].mxu1 }
 0x207   : > { %v3965_v58 = vadd.f32 %v3620_v38, %v1089_v35  ;;  %v3968_v52 = vadd.f32 %v3620_v38, %v1281_v46 }
 0x208   : > { %5096 = vst [vmem:[#allocation86_spill] sm:$0xff] %v3959_v62  ;;  %5097 = vst [vmem:[#allocation87_spill] sm:$0xff] %v3962_v28 }
 0x209   : > { %5098 = vst [vmem:[#allocation88_spill] sm:$0xff] %v3965_v58  ;;  %5099 = vst [vmem:[#allocation89_spill] sm:$0xff] %v3968_v52  ;;  %v1093_v3 = vpop.f32.mrb[58].mxu0  ;;  %v1285_v42 = vpop.f32.mrb[58].mxu1 }
 0x20a   : > { %v3971_v54 = vadd.f32 %v3618_v37, %v1093_v3  ;;  %v3974_v12 = vadd.f32 %v3618_v37, %v1285_v42  ;;  %v1095_v19 = vpop.f32.mrb[59].mxu0  ;;  %v1287_v62 = vpop.f32.mrb[59].mxu1 }
 0x20b   : > { %v3977_v50 = vadd.f32 %v3620_v38, %v1095_v19  ;;  %v3980_v28 = vadd.f32 %v3620_v38, %v1287_v62 }
 0x20c   : > { %5100 = vst [vmem:[#allocation90_spill] sm:$0xff] %v3971_v54  ;;  %5101 = vst [vmem:[#allocation91_spill] sm:$0xff] %v3974_v12 }
 0x20d   : > { %5102 = vst [vmem:[#allocation92_spill] sm:$0xff] %v3977_v50  ;;  %5103 = vst [vmem:[#allocation93_spill] sm:$0xff] %v3980_v28  ;;  %v1099_v35 = vpop.f32.mrb[60].mxu0  ;;  %v1291_v46 = vpop.f32.mrb[60].mxu1 }
 0x20e   : > { %v3983_v52 = vadd.f32 %v3618_v37, %v1099_v35  ;;  %v3986_v3 = vadd.f32 %v3618_v37, %v1291_v46  ;;  %v1101_v42 = vpop.f32.mrb[61].mxu0  ;;  %v1293_v12 = vpop.f32.mrb[61].mxu1 }
 0x20f   : > { %v3989_v54 = vadd.f32 %v3620_v38, %v1101_v42  ;;  %v3992_v19 = vadd.f32 %v3620_v38, %v1293_v12  ;;  %1832 = sbr.rel (%p2541_p3) target bundleno = 570 (0x23a), region = 52  ;;  %v5111_v12 = vld [vmem:[#allocation78_spill] sm:$0xff] (!%p2541_p3) }
 0x210   : > { %5104 = vst [vmem:[#allocation94_spill] sm:$0xff] %v3983_v52  ;;  %5105 = vst [vmem:[#allocation95_spill] sm:$0xff] %v3986_v3  ;;  %v5115_v42 = vld [vmem:[#allocation86_spill] sm:$0xff] (!%p2541_p3) }
 0x211   : > { %5106 = vst [vmem:[#allocation96_spill] sm:$0xff] %v3989_v54  ;;  %v1105_v62 = vpop.f32.mrb[62].mxu0  ;;  %v1297_v28 = vpop.f32.mrb[62].mxu1  ;;  %1885 = vst [vmem:[%s4007_s15 + $0x1a0] sm:$0xff] (!%p2541_p3), %v5111_v12 }
 0x212   : > { %v3995_v50 = vadd.f32 %v3618_v37, %v1105_v62  ;;  %v3998_v35 = vadd.f32 %v3618_v37, %v1297_v28  ;;  %v1107_v52 = vpop.f32.mrb[63].mxu0  ;;  %v1299_v58 = vpop.f32.mrb[63].mxu1  ;;  %v5109_v37 = vld [vmem:[#allocation74_spill] sm:$0xff] (!%p2541_p3)  ;;  %v5112_v28 = vld [vmem:[#allocation80_spill] sm:$0xff] (!%p2541_p3)  ;;  %1889 = vst [vmem:[%s4007_s15 + $0x1c0] sm:$0xff] (!%p2541_p3), %v5115_v42  ;;  %1894 = vst [vmem:[%s4007_s15 + $0x1e8] sm:$0xff] (!%p2541_p3), %v3989_v54 }
 0x213   : > { %v4001_v46 = vadd.f32 %v3620_v38, %v1107_v52  ;;  %v4004_v3 = vadd.f32 %v3620_v38, %v1299_v58  ;;  %1883 = vst [vmem:[%s4007_s15 + $0x190] sm:$0xff] (!%p2541_p3), %v5109_v37  ;;  %v5110_v38 = vld [vmem:[#allocation76_spill] sm:$0xff] (!%p2541_p3)  ;;  %1886 = vst [vmem:[%s4007_s15 + $0x1a8] sm:$0xff] (!%p2541_p3), %v5112_v28  ;;  %v5113_v52 = vld [vmem:[#allocation82_spill] sm:$0xff] (!%p2541_p3) }
 0x214   : > { %5107 = vst [vmem:[#allocation97_spill] sm:$0xff] %v3995_v50  ;;  %1884 = vst [vmem:[%s4007_s15 + $0x198] sm:$0xff] (!%p2541_p3), %v5110_v38  ;;  %v5114_v58 = vld [vmem:[#allocation84_spill] sm:$0xff] (!%p2541_p3)  ;;  %v5117_v37 = vld [vmem:[#allocation90_spill] sm:$0xff] (!%p2541_p3) }
 0x215   : > { %5108 = vst [vmem:[#allocation98_spill] sm:$0xff] %v4001_v46  ;;  %1887 = vst [vmem:[%s4007_s15 + $0x1b0] sm:$0xff] (!%p2541_p3), %v5113_v52  ;;  %v5116_v62 = vld [vmem:[#allocation88_spill] sm:$0xff] (!%p2541_p3)  ;;  %v5121_v52 = vld [vmem:[#allocation25_spill] sm:$0xff] (!%p2541_p3) }
 0x216   : > { %1888 = vst [vmem:[%s4007_s15 + $0x1b8] sm:$0xff] %v5114_v58  ;;  %1890 = vst [vmem:[%s4007_s15 + $0x1c8] sm:$0xff] %v5116_v62  ;;  %v5118_v38 = vld [vmem:[#allocation92_spill] sm:$0xff]  ;;  %v5122_v58 = vld [vmem:[#allocation26_spill] sm:$0xff] }
 0x217   : > { %1891 = vst [vmem:[%s4007_s15 + $0x1d0] sm:$0xff] %v5117_v37  ;;  %1892 = vst [vmem:[%s4007_s15 + $0x1d8] sm:$0xff] %v5118_v38  ;;  %v5119_v12 = vld [vmem:[#allocation94_spill] sm:$0xff]  ;;  %v5120_v28 = vld [vmem:[#allocation24_spill] sm:$0xff] }
 0x218   : > { %1893 = vst [vmem:[%s4007_s15 + $0x1e0] sm:$0xff] %v5119_v12  ;;  %1895 = vst [vmem:[%s4007_s15 + $0x1f0] sm:$0xff] %v3995_v50  ;;  %v5123_v42 = vld [vmem:[#allocation27_spill] sm:$0xff]  ;;  %v5124_v62 = vld [vmem:[#allocation28_spill] sm:$0xff] }
 0x219   : > { %1896 = vst [vmem:[%s4007_s15 + $0x1f8] sm:$0xff] %v4001_v46  ;;  %1897 = vst [vmem:[%s4007_s15 + $0x200] sm:$0xff] %v5120_v28  ;;  %v5125_v37 = vld [vmem:[#allocation29_spill] sm:$0xff]  ;;  %v5126_v38 = vld [vmem:[#allocation30_spill] sm:$0xff] }
 0x21a   : > { %1898 = vst [vmem:[%s4007_s15 + $0x208] sm:$0xff] %v5121_v52  ;;  %1899 = vst [vmem:[%s4007_s15 + $0x210] sm:$0xff] %v5122_v58  ;;  %v5127_v12 = vld [vmem:[#allocation31_spill] sm:$0xff]  ;;  %v5128_v28 = vld [vmem:[#allocation32_spill] sm:$0xff] }
 0x21b   : > { %1900 = vst [vmem:[%s4007_s15 + $0x218] sm:$0xff] %v5123_v42  ;;  %1901 = vst [vmem:[%s4007_s15 + $0x220] sm:$0xff] %v5124_v62  ;;  %v5129_v52 = vld [vmem:[#allocation33_spill] sm:$0xff]  ;;  %v5130_v58 = vld [vmem:[#allocation34_spill] sm:$0xff] }
 0x21c   : > { %1902 = vst [vmem:[%s4007_s15 + $0x228] sm:$0xff] %v5125_v37  ;;  %1903 = vst [vmem:[%s4007_s15 + $0x230] sm:$0xff] %v5126_v38  ;;  %v5131_v42 = vld [vmem:[#allocation35_spill] sm:$0xff]  ;;  %v5132_v62 = vld [vmem:[#allocation36_spill] sm:$0xff] }
 0x21d   : > { %1904 = vst [vmem:[%s4007_s15 + $0x238] sm:$0xff] %v5127_v12  ;;  %1905 = vst [vmem:[%s4007_s15 + $0x240] sm:$0xff] %v5128_v28  ;;  %v5133_v37 = vld [vmem:[#allocation37_spill] sm:$0xff]  ;;  %v5134_v38 = vld [vmem:[#allocation38_spill] sm:$0xff] }
 0x21e   : > { %1906 = vst [vmem:[%s4007_s15 + $0x248] sm:$0xff] %v5129_v52  ;;  %1907 = vst [vmem:[%s4007_s15 + $0x250] sm:$0xff] %v5130_v58  ;;  %v5135_v12 = vld [vmem:[#allocation39_spill] sm:$0xff]  ;;  %v5136_v28 = vld [vmem:[#allocation40_spill] sm:$0xff] }
 0x21f   : > { %1908 = vst [vmem:[%s4007_s15 + $0x258] sm:$0xff] %v5131_v42  ;;  %1909 = vst [vmem:[%s4007_s15 + $0x260] sm:$0xff] %v5132_v62  ;;  %v5137_v52 = vld [vmem:[#allocation41_spill] sm:$0xff]  ;;  %v5138_v58 = vld [vmem:[#allocation42_spill] sm:$0xff] }
 0x220   : > { %1910 = vst [vmem:[%s4007_s15 + $0x268] sm:$0xff] %v5133_v37  ;;  %1911 = vst [vmem:[%s4007_s15 + $0x270] sm:$0xff] %v5134_v38  ;;  %v5139_v42 = vld [vmem:[#allocation43_spill] sm:$0xff]  ;;  %v5140_v62 = vld [vmem:[#allocation44_spill] sm:$0xff] }
 0x221   : > { %1912 = vst [vmem:[%s4007_s15 + $0x278] sm:$0xff] %v5135_v12  ;;  %1913 = vst [vmem:[%s4007_s15 + $0x280] sm:$0xff] %v5136_v28  ;;  %v5141_v37 = vld [vmem:[#allocation45_spill] sm:$0xff]  ;;  %v5142_v38 = vld [vmem:[#allocation46_spill] sm:$0xff] }
 0x222   : > { %1914 = vst [vmem:[%s4007_s15 + $0x288] sm:$0xff] %v5137_v52  ;;  %1915 = vst [vmem:[%s4007_s15 + $0x290] sm:$0xff] %v5138_v58  ;;  %v5143_v12 = vld [vmem:[#allocation47_spill] sm:$0xff]  ;;  %v5144_v28 = vld [vmem:[#allocation48_spill] sm:$0xff] }
 0x223   : > { %1916 = vst [vmem:[%s4007_s15 + $0x298] sm:$0xff] %v5139_v42  ;;  %1917 = vst [vmem:[%s4007_s15 + $0x2a0] sm:$0xff] %v5140_v62  ;;  %v5145_v52 = vld [vmem:[#allocation49_spill] sm:$0xff]  ;;  %v5146_v58 = vld [vmem:[#allocation50_spill] sm:$0xff] }
 0x224   : > { %1918 = vst [vmem:[%s4007_s15 + $0x2a8] sm:$0xff] %v5141_v37  ;;  %1919 = vst [vmem:[%s4007_s15 + $0x2b0] sm:$0xff] %v5142_v38  ;;  %v5147_v42 = vld [vmem:[#allocation51_spill] sm:$0xff]  ;;  %v5148_v62 = vld [vmem:[#allocation52_spill] sm:$0xff] }
 0x225   : > { %1920 = vst [vmem:[%s4007_s15 + $0x2b8] sm:$0xff] %v5143_v12  ;;  %1921 = vst [vmem:[%s4007_s15 + $0x2c0] sm:$0xff] %v5144_v28  ;;  %v5149_v37 = vld [vmem:[#allocation53_spill] sm:$0xff]  ;;  %v5150_v38 = vld [vmem:[#allocation54_spill] sm:$0xff] }
 0x226   : > { %1922 = vst [vmem:[%s4007_s15 + $0x2c8] sm:$0xff] %v5145_v52  ;;  %1923 = vst [vmem:[%s4007_s15 + $0x2d0] sm:$0xff] %v5146_v58  ;;  %v5151_v12 = vld [vmem:[#allocation55_spill] sm:$0xff]  ;;  %v5152_v28 = vld [vmem:[#allocation56_spill] sm:$0xff] }
 0x227   : > { %1924 = vst [vmem:[%s4007_s15 + $0x2d8] sm:$0xff] %v5147_v42  ;;  %1925 = vst [vmem:[%s4007_s15 + $0x2e0] sm:$0xff] %v5148_v62  ;;  %v5153_v52 = vld [vmem:[#allocation57_spill] sm:$0xff]  ;;  %v5154_v58 = vld [vmem:[#allocation58_spill] sm:$0xff] }
 0x228   : > { %1926 = vst [vmem:[%s4007_s15 + $0x2e8] sm:$0xff] %v5149_v37  ;;  %1927 = vst [vmem:[%s4007_s15 + $0x2f0] sm:$0xff] %v5150_v38  ;;  %v5155_v42 = vld [vmem:[#allocation59_spill] sm:$0xff]  ;;  %v5156_v62 = vld [vmem:[#allocation60_spill] sm:$0xff] }
 0x229   : > { %1928 = vst [vmem:[%s4007_s15 + $0x2f8] sm:$0xff] %v5151_v12  ;;  %1929 = vst [vmem:[%s4007_s15 + $0x300] sm:$0xff] %v5152_v28  ;;  %v5157_v37 = vld [vmem:[#allocation61_spill] sm:$0xff]  ;;  %v5158_v38 = vld [vmem:[#allocation62_spill] sm:$0xff] }
 0x22a   : > { %1930 = vst [vmem:[%s4007_s15 + $0x308] sm:$0xff] %v5153_v52  ;;  %1931 = vst [vmem:[%s4007_s15 + $0x310] sm:$0xff] %v5154_v58  ;;  %v5159_v12 = vld [vmem:[#allocation63_spill] sm:$0xff]  ;;  %v5160_v28 = vld [vmem:[#allocation64_spill] sm:$0xff] }
 0x22b   : > { %1932 = vst [vmem:[%s4007_s15 + $0x318] sm:$0xff] %v5155_v42  ;;  %1933 = vst [vmem:[%s4007_s15 + $0x320] sm:$0xff] %v5156_v62  ;;  %v5161_v52 = vld [vmem:[#allocation65_spill] sm:$0xff]  ;;  %v5162_v58 = vld [vmem:[#allocation66_spill] sm:$0xff] }
 0x22c   : > { %1934 = vst [vmem:[%s4007_s15 + $0x328] sm:$0xff] %v5157_v37  ;;  %1935 = vst [vmem:[%s4007_s15 + $0x330] sm:$0xff] %v5158_v38  ;;  %v5163_v42 = vld [vmem:[#allocation67_spill] sm:$0xff]  ;;  %v5164_v62 = vld [vmem:[#allocation68_spill] sm:$0xff] }
 0x22d   : > { %1936 = vst [vmem:[%s4007_s15 + $0x338] sm:$0xff] %v5159_v12  ;;  %1937 = vst [vmem:[%s4007_s15 + $0x340] sm:$0xff] %v5160_v28  ;;  %v5165_v37 = vld [vmem:[#allocation69_spill] sm:$0xff]  ;;  %v5166_v38 = vld [vmem:[#allocation70_spill] sm:$0xff] }
 0x22e   : > { %1938 = vst [vmem:[%s4007_s15 + $0x348] sm:$0xff] %v5161_v52  ;;  %1939 = vst [vmem:[%s4007_s15 + $0x350] sm:$0xff] %v5162_v58  ;;  %v5167_v12 = vld [vmem:[#allocation71_spill] sm:$0xff]  ;;  %v5168_v28 = vld [vmem:[#allocation72_spill] sm:$0xff] }
 0x22f   : > { %1940 = vst [vmem:[%s4007_s15 + $0x358] sm:$0xff] %v5163_v42  ;;  %1941 = vst [vmem:[%s4007_s15 + $0x360] sm:$0xff] %v5164_v62  ;;  %v5169_v52 = vld [vmem:[#allocation73_spill] sm:$0xff]  ;;  %v5170_v58 = vld [vmem:[#allocation75_spill] sm:$0xff] }
 0x230   : > { %1942 = vst [vmem:[%s4007_s15 + $0x368] sm:$0xff] %v5165_v37  ;;  %1943 = vst [vmem:[%s4007_s15 + $0x370] sm:$0xff] %v5166_v38  ;;  %v5171_v42 = vld [vmem:[#allocation77_spill] sm:$0xff]  ;;  %v5172_v46 = vld [vmem:[#allocation79_spill] sm:$0xff] }
 0x231   : > { %1944 = vst [vmem:[%s4007_s15 + $0x378] sm:$0xff] %v5167_v12  ;;  %1945 = vst [vmem:[%s4007_s15 + $0x380] sm:$0xff] %v5168_v28  ;;  %v5173_v62 = vld [vmem:[#allocation81_spill] sm:$0xff]  ;;  %v5174_v37 = vld [vmem:[#allocation83_spill] sm:$0xff] }
 0x232   : > { %1946 = vst [vmem:[%s4007_s15 + $0x388] sm:$0xff] %v5169_v52  ;;  %1947 = vst [vmem:[%s4007_s15 + $0x390] sm:$0xff] %v5170_v58  ;;  %v5175_v50 = vld [vmem:[#allocation85_spill] sm:$0xff]  ;;  %v5176_v38 = vld [vmem:[#allocation87_spill] sm:$0xff] }
 0x233   : > { %1948 = vst [vmem:[%s4007_s15 + $0x398] sm:$0xff] %v5171_v42  ;;  %1949 = vst [vmem:[%s4007_s15 + $0x3a0] sm:$0xff] %v5172_v46  ;;  %v5177_v12 = vld [vmem:[#allocation89_spill] sm:$0xff]  ;;  %v5178_v54 = vld [vmem:[#allocation91_spill] sm:$0xff] }
 0x234   : > { %1950 = vst [vmem:[%s4007_s15 + $0x3a8] sm:$0xff] %v5173_v62  ;;  %1951 = vst [vmem:[%s4007_s15 + $0x3b0] sm:$0xff] %v5174_v37  ;;  %v5179_v28 = vld [vmem:[#allocation93_spill] sm:$0xff]  ;;  %v5180_v52 = vld [vmem:[#allocation95_spill] sm:$0xff] }
 0x235   : > { %1952 = vst [vmem:[%s4007_s15 + $0x3b8] sm:$0xff] %v5175_v50  ;;  %1953 = vst [vmem:[%s4007_s15 + $0x3c0] sm:$0xff] %v5176_v38 }
 0x236   : > { %1954 = vst [vmem:[%s4007_s15 + $0x3c8] sm:$0xff] %v5177_v12  ;;  %1955 = vst [vmem:[%s4007_s15 + $0x3d0] sm:$0xff] %v5178_v54 }
 0x237   : > { %1956 = vst [vmem:[%s4007_s15 + $0x3d8] sm:$0xff] %v5179_v28  ;;  %1957 = vst [vmem:[%s4007_s15 + $0x3e0] sm:$0xff] %v5180_v52 }
 0x238   : > { %1958 = vst [vmem:[%s4007_s15 + $0x3e8] sm:$0xff] %v3992_v19  ;;  %1959 = vst [vmem:[%s4007_s15 + $0x3f0] sm:$0xff] %v3998_v35 }
 0x239   : > { %1960 = vst [vmem:[%s4007_s15 + $0x3f8] sm:$0xff] %v4004_v3 }
 0x23a PF: > { %p1962_p6 = scmp.lt.s32.totalorder %s3076_s27, 2 }
 0x23c   : > { %p1963_p5 = pnand %p2541_p3, %p1962_p6 }
 0x23d   : > { %1967 = vst [vmem:[%s4010_s12] sm:$0xff] (!%p1963_p5), %v3623_v41  ;;  %1968 = vst [vmem:[%s4010_s12 + $0x8] sm:$0xff] (!%p1963_p5), %v3629_v45  ;;  %v5181_v54 = vld [vmem:[#allocation74_spill] sm:$0xff] (!%p1963_p5)  ;;  %v5182_v50 = vld [vmem:[#allocation76_spill] sm:$0xff] (!%p1963_p5) }
 0x23e   : > { %1966 = sbr.rel (%p1963_p5) target bundleno = 637 (0x27d), region = 56  ;;  %1969 = vst [vmem:[%s4010_s12 + $0x10] sm:$0xff] (!%p1963_p5), %v3635_v49  ;;  %1970 = vst [vmem:[%s4010_s12 + $0x18] sm:$0xff] (!%p1963_p5), %v3641_v53  ;;  %v5183_v46 = vld [vmem:[#allocation78_spill] sm:$0xff] (!%p1963_p5)  ;;  %v5184_v58 = vld [vmem:[#allocation80_spill] sm:$0xff] (!%p1963_p5) }
 0x23f   : > { %1971 = vst [vmem:[%s4010_s12 + $0x20] sm:$0xff] (!%p1963_p5), %v3647_v57  ;;  %1972 = vst [vmem:[%s4010_s12 + $0x28] sm:$0xff] (!%p1963_p5), %v3653_v61  ;;  %v5185_v42 = vld [vmem:[#allocation82_spill] sm:$0xff] (!%p1963_p5)  ;;  %v5186_v62 = vld [vmem:[#allocation84_spill] sm:$0xff] (!%p1963_p5) }
 0x240   : > { %1973 = vst [vmem:[%s4010_s12 + $0x30] sm:$0xff] (!%p1963_p5), %v3659_v1  ;;  %1974 = vst [vmem:[%s4010_s12 + $0x38] sm:$0xff] (!%p1963_p5), %v3665_v5  ;;  %v5187_v37 = vld [vmem:[#allocation86_spill] sm:$0xff] (!%p1963_p5)  ;;  %v5188_v38 = vld [vmem:[#allocation88_spill] sm:$0xff] (!%p1963_p5) }
 0x241   : > { %1975 = vst [vmem:[%s4010_s12 + $0x40] sm:$0xff] (!%p1963_p5), %v3671_v9  ;;  %1976 = vst [vmem:[%s4010_s12 + $0x48] sm:$0xff] (!%p1963_p5), %v3677_v13  ;;  %v5189_v12 = vld [vmem:[#allocation90_spill] sm:$0xff] (!%p1963_p5)  ;;  %v5190_v28 = vld [vmem:[#allocation92_spill] sm:$0xff] (!%p1963_p5) }
 0x242   : > { %1977 = vst [vmem:[%s4010_s12 + $0x50] sm:$0xff] (!%p1963_p5), %v3683_v17  ;;  %1978 = vst [vmem:[%s4010_s12 + $0x58] sm:$0xff] (!%p1963_p5), %v3689_v21  ;;  %v5191_v52 = vld [vmem:[#allocation94_spill] sm:$0xff] (!%p1963_p5) }
 0x243   : > { %1979 = vst [vmem:[%s4010_s12 + $0x60] sm:$0xff] (!%p1963_p5), %v3695_v25  ;;  %1980 = vst [vmem:[%s4010_s12 + $0x68] sm:$0xff] (!%p1963_p5), %v3701_v29 }
 0x244   : > { %1981 = vst [vmem:[%s4010_s12 + $0x70] sm:$0xff] (!%p1963_p5), %v3707_v33  ;;  %1982 = vst [vmem:[%s4010_s12 + $0x78] sm:$0xff] (!%p1963_p5), %v3713_v39 }
 0x245   : > { %1983 = vst [vmem:[%s4010_s12 + $0x80] sm:$0xff] %v3719_v47  ;;  %1984 = vst [vmem:[%s4010_s12 + $0x88] sm:$0xff] %v3725_v55 }
 0x246   : > { %1985 = vst [vmem:[%s4010_s12 + $0x90] sm:$0xff] %v3731_v63  ;;  %1986 = vst [vmem:[%s4010_s12 + $0x98] sm:$0xff] %v3737_v7 }
 0x247   : > { %1987 = vst [vmem:[%s4010_s12 + $0xa0] sm:$0xff] %v3743_v15  ;;  %1988 = vst [vmem:[%s4010_s12 + $0xa8] sm:$0xff] %v3749_v23 }
 0x248   : > { %1989 = vst [vmem:[%s4010_s12 + $0xb0] sm:$0xff] %v3755_v31  ;;  %1990 = vst [vmem:[%s4010_s12 + $0xb8] sm:$0xff] %v3761_v43 }
 0x249   : > { %1991 = vst [vmem:[%s4010_s12 + $0xc0] sm:$0xff] %v3767_v59  ;;  %1992 = vst [vmem:[%s4010_s12 + $0xc8] sm:$0xff] %v3773_v11 }
 0x24a   : > { %1993 = vst [vmem:[%s4010_s12 + $0xd0] sm:$0xff] %v3779_v27  ;;  %1994 = vst [vmem:[%s4010_s12 + $0xd8] sm:$0xff] %v3785_v51 }
 0x24b   : > { %1995 = vst [vmem:[%s4010_s12 + $0xe0] sm:$0xff] %v3791_v4  ;;  %1996 = vst [vmem:[%s4010_s12 + $0xe8] sm:$0xff] %v3797_v20 }
 0x24c   : > { %1997 = vst [vmem:[%s4010_s12 + $0xf0] sm:$0xff] %v3803_v36  ;;  %1998 = vst [vmem:[%s4010_s12 + $0xf8] sm:$0xff] %v3809_v60 }
 0x24d   : > { %1999 = vst [vmem:[%s4010_s12 + $0x100] sm:$0xff] %v3815_v44  ;;  %2000 = vst [vmem:[%s4010_s12 + $0x108] sm:$0xff] %v3821_v32 }
 0x24e   : > { %2001 = vst [vmem:[%s4010_s12 + $0x110] sm:$0xff] %v3827_v24  ;;  %2002 = vst [vmem:[%s4010_s12 + $0x118] sm:$0xff] %v3833_v16 }
 0x24f   : > { %2003 = vst [vmem:[%s4010_s12 + $0x120] sm:$0xff] %v3839_v8  ;;  %2004 = vst [vmem:[%s4010_s12 + $0x128] sm:$0xff] %v3845_v0 }
 0x250   : > { %2005 = vst [vmem:[%s4010_s12 + $0x130] sm:$0xff] %v3851_v56  ;;  %2006 = vst [vmem:[%s4010_s12 + $0x138] sm:$0xff] %v3857_v48 }
 0x251   : > { %2007 = vst [vmem:[%s4010_s12 + $0x140] sm:$0xff] %v3863_v40  ;;  %2008 = vst [vmem:[%s4010_s12 + $0x148] sm:$0xff] %v3869_v34 }
 0x252   : > { %2009 = vst [vmem:[%s4010_s12 + $0x150] sm:$0xff] %v3875_v30  ;;  %2010 = vst [vmem:[%s4010_s12 + $0x158] sm:$0xff] %v3881_v26 }
 0x253   : > { %2011 = vst [vmem:[%s4010_s12 + $0x160] sm:$0xff] %v3887_v22  ;;  %2012 = vst [vmem:[%s4010_s12 + $0x168] sm:$0xff] %v3893_v18 }
 0x254   : > { %2013 = vst [vmem:[%s4010_s12 + $0x170] sm:$0xff] %v3899_v14  ;;  %2014 = vst [vmem:[%s4010_s12 + $0x178] sm:$0xff] %v3905_v10 }
 0x255   : > { %2015 = vst [vmem:[%s4010_s12 + $0x180] sm:$0xff] %v3911_v6  ;;  %2016 = vst [vmem:[%s4010_s12 + $0x188] sm:$0xff] %v3917_v2 }
 0x256   : > { %2017 = vst [vmem:[%s4010_s12 + $0x190] sm:$0xff] %v5181_v54  ;;  %2018 = vst [vmem:[%s4010_s12 + $0x198] sm:$0xff] %v5182_v50  ;;  %v5192_v54 = vld [vmem:[#allocation96_spill] sm:$0xff]  ;;  %v5193_v50 = vld [vmem:[#allocation97_spill] sm:$0xff] }
 0x257   : > { %2019 = vst [vmem:[%s4010_s12 + $0x1a0] sm:$0xff] %v5183_v46  ;;  %2020 = vst [vmem:[%s4010_s12 + $0x1a8] sm:$0xff] %v5184_v58  ;;  %v5194_v46 = vld [vmem:[#allocation98_spill] sm:$0xff]  ;;  %v5195_v58 = vld [vmem:[#allocation24_spill] sm:$0xff] }
 0x258   : > { %2021 = vst [vmem:[%s4010_s12 + $0x1b0] sm:$0xff] %v5185_v42  ;;  %2022 = vst [vmem:[%s4010_s12 + $0x1b8] sm:$0xff] %v5186_v62  ;;  %v5196_v42 = vld [vmem:[#allocation25_spill] sm:$0xff]  ;;  %v5197_v62 = vld [vmem:[#allocation26_spill] sm:$0xff] }
 0x259   : > { %2023 = vst [vmem:[%s4010_s12 + $0x1c0] sm:$0xff] %v5187_v37  ;;  %2024 = vst [vmem:[%s4010_s12 + $0x1c8] sm:$0xff] %v5188_v38  ;;  %v5198_v37 = vld [vmem:[#allocation27_spill] sm:$0xff]  ;;  %v5199_v38 = vld [vmem:[#allocation28_spill] sm:$0xff] }
 0x25a   : > { %2025 = vst [vmem:[%s4010_s12 + $0x1d0] sm:$0xff] %v5189_v12  ;;  %2026 = vst [vmem:[%s4010_s12 + $0x1d8] sm:$0xff] %v5190_v28  ;;  %v5200_v12 = vld [vmem:[#allocation29_spill] sm:$0xff]  ;;  %v5201_v28 = vld [vmem:[#allocation30_spill] sm:$0xff] }
 0x25b   : > { %2027 = vst [vmem:[%s4010_s12 + $0x1e0] sm:$0xff] %v5191_v52  ;;  %2028 = vst [vmem:[%s4010_s12 + $0x1e8] sm:$0xff] %v5192_v54  ;;  %v5202_v52 = vld [vmem:[#allocation31_spill] sm:$0xff]  ;;  %v5203_v54 = vld [vmem:[#allocation32_spill] sm:$0xff] }
 0x25c   : > { %2029 = vst [vmem:[%s4010_s12 + $0x1f0] sm:$0xff] %v5193_v50  ;;  %2030 = vst [vmem:[%s4010_s12 + $0x1f8] sm:$0xff] %v5194_v46  ;;  %v5204_v50 = vld [vmem:[#allocation33_spill] sm:$0xff]  ;;  %v5205_v46 = vld [vmem:[#allocation34_spill] sm:$0xff] }
 0x25d   : > { %2031 = vst [vmem:[%s4010_s12 + $0x200] sm:$0xff] %v5195_v58  ;;  %2032 = vst [vmem:[%s4010_s12 + $0x208] sm:$0xff] %v5196_v42  ;;  %v5206_v58 = vld [vmem:[#allocation35_spill] sm:$0xff]  ;;  %v5207_v42 = vld [vmem:[#allocation36_spill] sm:$0xff] }
 0x25e   : > { %2033 = vst [vmem:[%s4010_s12 + $0x210] sm:$0xff] %v5197_v62  ;;  %2034 = vst [vmem:[%s4010_s12 + $0x218] sm:$0xff] %v5198_v37  ;;  %v5208_v62 = vld [vmem:[#allocation37_spill] sm:$0xff]  ;;  %v5209_v37 = vld [vmem:[#allocation38_spill] sm:$0xff] }
 0x25f   : > { %2035 = vst [vmem:[%s4010_s12 + $0x220] sm:$0xff] %v5199_v38  ;;  %2036 = vst [vmem:[%s4010_s12 + $0x228] sm:$0xff] %v5200_v12  ;;  %v5210_v38 = vld [vmem:[#allocation39_spill] sm:$0xff]  ;;  %v5211_v12 = vld [vmem:[#allocation40_spill] sm:$0xff] }
 0x260   : > { %2037 = vst [vmem:[%s4010_s12 + $0x230] sm:$0xff] %v5201_v28  ;;  %2038 = vst [vmem:[%s4010_s12 + $0x238] sm:$0xff] %v5202_v52  ;;  %v5212_v28 = vld [vmem:[#allocation41_spill] sm:$0xff]  ;;  %v5213_v52 = vld [vmem:[#allocation42_spill] sm:$0xff] }
 0x261   : > { %2039 = vst [vmem:[%s4010_s12 + $0x240] sm:$0xff] %v5203_v54  ;;  %2040 = vst [vmem:[%s4010_s12 + $0x248] sm:$0xff] %v5204_v50  ;;  %v5214_v54 = vld [vmem:[#allocation43_spill] sm:$0xff]  ;;  %v5215_v50 = vld [vmem:[#allocation44_spill] sm:$0xff] }
 0x262   : > { %2041 = vst [vmem:[%s4010_s12 + $0x250] sm:$0xff] %v5205_v46  ;;  %2042 = vst [vmem:[%s4010_s12 + $0x258] sm:$0xff] %v5206_v58  ;;  %v5216_v46 = vld [vmem:[#allocation45_spill] sm:$0xff]  ;;  %v5217_v58 = vld [vmem:[#allocation46_spill] sm:$0xff] }
 0x263   : > { %2043 = vst [vmem:[%s4010_s12 + $0x260] sm:$0xff] %v5207_v42  ;;  %2044 = vst [vmem:[%s4010_s12 + $0x268] sm:$0xff] %v5208_v62  ;;  %v5218_v42 = vld [vmem:[#allocation47_spill] sm:$0xff]  ;;  %v5219_v62 = vld [vmem:[#allocation48_spill] sm:$0xff] }
 0x264   : > { %2045 = vst [vmem:[%s4010_s12 + $0x270] sm:$0xff] %v5209_v37  ;;  %2046 = vst [vmem:[%s4010_s12 + $0x278] sm:$0xff] %v5210_v38  ;;  %v5220_v37 = vld [vmem:[#allocation49_spill] sm:$0xff]  ;;  %v5221_v38 = vld [vmem:[#allocation50_spill] sm:$0xff] }
 0x265   : > { %2047 = vst [vmem:[%s4010_s12 + $0x280] sm:$0xff] %v5211_v12  ;;  %2048 = vst [vmem:[%s4010_s12 + $0x288] sm:$0xff] %v5212_v28  ;;  %v5222_v12 = vld [vmem:[#allocation51_spill] sm:$0xff]  ;;  %v5223_v28 = vld [vmem:[#allocation52_spill] sm:$0xff] }
 0x266   : > { %2049 = vst [vmem:[%s4010_s12 + $0x290] sm:$0xff] %v5213_v52  ;;  %2050 = vst [vmem:[%s4010_s12 + $0x298] sm:$0xff] %v5214_v54  ;;  %v5224_v52 = vld [vmem:[#allocation53_spill] sm:$0xff]  ;;  %v5225_v54 = vld [vmem:[#allocation54_spill] sm:$0xff] }
 0x267   : > { %2051 = vst [vmem:[%s4010_s12 + $0x2a0] sm:$0xff] %v5215_v50  ;;  %2052 = vst [vmem:[%s4010_s12 + $0x2a8] sm:$0xff] %v5216_v46  ;;  %v5226_v50 = vld [vmem:[#allocation55_spill] sm:$0xff]  ;;  %v5227_v46 = vld [vmem:[#allocation56_spill] sm:$0xff] }
 0x268   : > { %2053 = vst [vmem:[%s4010_s12 + $0x2b0] sm:$0xff] %v5217_v58  ;;  %2054 = vst [vmem:[%s4010_s12 + $0x2b8] sm:$0xff] %v5218_v42  ;;  %v5228_v58 = vld [vmem:[#allocation57_spill] sm:$0xff]  ;;  %v5229_v42 = vld [vmem:[#allocation58_spill] sm:$0xff] }
 0x269   : > { %2055 = vst [vmem:[%s4010_s12 + $0x2c0] sm:$0xff] %v5219_v62  ;;  %2056 = vst [vmem:[%s4010_s12 + $0x2c8] sm:$0xff] %v5220_v37  ;;  %v5230_v62 = vld [vmem:[#allocation59_spill] sm:$0xff]  ;;  %v5231_v37 = vld [vmem:[#allocation60_spill] sm:$0xff] }
 0x26a   : > { %2057 = vst [vmem:[%s4010_s12 + $0x2d0] sm:$0xff] %v5221_v38  ;;  %2058 = vst [vmem:[%s4010_s12 + $0x2d8] sm:$0xff] %v5222_v12  ;;  %v5232_v38 = vld [vmem:[#allocation61_spill] sm:$0xff]  ;;  %v5233_v12 = vld [vmem:[#allocation62_spill] sm:$0xff] }
 0x26b   : > { %2059 = vst [vmem:[%s4010_s12 + $0x2e0] sm:$0xff] %v5223_v28  ;;  %2060 = vst [vmem:[%s4010_s12 + $0x2e8] sm:$0xff] %v5224_v52  ;;  %v5234_v28 = vld [vmem:[#allocation63_spill] sm:$0xff]  ;;  %v5235_v52 = vld [vmem:[#allocation64_spill] sm:$0xff] }
 0x26c   : > { %2061 = vst [vmem:[%s4010_s12 + $0x2f0] sm:$0xff] %v5225_v54  ;;  %2062 = vst [vmem:[%s4010_s12 + $0x2f8] sm:$0xff] %v5226_v50  ;;  %v5236_v54 = vld [vmem:[#allocation65_spill] sm:$0xff]  ;;  %v5237_v50 = vld [vmem:[#allocation66_spill] sm:$0xff] }
 0x26d   : > { %2063 = vst [vmem:[%s4010_s12 + $0x300] sm:$0xff] %v5227_v46  ;;  %2064 = vst [vmem:[%s4010_s12 + $0x308] sm:$0xff] %v5228_v58  ;;  %v5238_v46 = vld [vmem:[#allocation67_spill] sm:$0xff]  ;;  %v5239_v58 = vld [vmem:[#allocation68_spill] sm:$0xff] }
 0x26e   : > { %2065 = vst [vmem:[%s4010_s12 + $0x310] sm:$0xff] %v5229_v42  ;;  %2066 = vst [vmem:[%s4010_s12 + $0x318] sm:$0xff] %v5230_v62  ;;  %v5240_v42 = vld [vmem:[#allocation69_spill] sm:$0xff]  ;;  %v5241_v62 = vld [vmem:[#allocation70_spill] sm:$0xff] }
 0x26f   : > { %2067 = vst [vmem:[%s4010_s12 + $0x320] sm:$0xff] %v5231_v37  ;;  %2068 = vst [vmem:[%s4010_s12 + $0x328] sm:$0xff] %v5232_v38  ;;  %v5242_v37 = vld [vmem:[#allocation71_spill] sm:$0xff]  ;;  %v5243_v38 = vld [vmem:[#allocation72_spill] sm:$0xff] }
 0x270   : > { %2069 = vst [vmem:[%s4010_s12 + $0x330] sm:$0xff] %v5233_v12  ;;  %2070 = vst [vmem:[%s4010_s12 + $0x338] sm:$0xff] %v5234_v28  ;;  %v5244_v12 = vld [vmem:[#allocation73_spill] sm:$0xff]  ;;  %v5245_v28 = vld [vmem:[#allocation75_spill] sm:$0xff] }
 0x271   : > { %2071 = vst [vmem:[%s4010_s12 + $0x340] sm:$0xff] %v5235_v52  ;;  %2072 = vst [vmem:[%s4010_s12 + $0x348] sm:$0xff] %v5236_v54  ;;  %v5246_v52 = vld [vmem:[#allocation77_spill] sm:$0xff]  ;;  %v5247_v54 = vld [vmem:[#allocation79_spill] sm:$0xff] }
 0x272   : > { %2073 = vst [vmem:[%s4010_s12 + $0x350] sm:$0xff] %v5237_v50  ;;  %2074 = vst [vmem:[%s4010_s12 + $0x358] sm:$0xff] %v5238_v46  ;;  %v5248_v50 = vld [vmem:[#allocation81_spill] sm:$0xff]  ;;  %v5249_v46 = vld [vmem:[#allocation83_spill] sm:$0xff] }
 0x273   : > { %2075 = vst [vmem:[%s4010_s12 + $0x360] sm:$0xff] %v5239_v58  ;;  %2076 = vst [vmem:[%s4010_s12 + $0x368] sm:$0xff] %v5240_v42  ;;  %v5250_v58 = vld [vmem:[#allocation85_spill] sm:$0xff]  ;;  %v5251_v42 = vld [vmem:[#allocation87_spill] sm:$0xff] }
 0x274   : > { %2077 = vst [vmem:[%s4010_s12 + $0x370] sm:$0xff] %v5241_v62  ;;  %2078 = vst [vmem:[%s4010_s12 + $0x378] sm:$0xff] %v5242_v37  ;;  %v5252_v62 = vld [vmem:[#allocation89_spill] sm:$0xff]  ;;  %v5253_v37 = vld [vmem:[#allocation91_spill] sm:$0xff] }
 0x275   : > { %2079 = vst [vmem:[%s4010_s12 + $0x380] sm:$0xff] %v5243_v38  ;;  %2080 = vst [vmem:[%s4010_s12 + $0x388] sm:$0xff] %v5244_v12  ;;  %v5254_v38 = vld [vmem:[#allocation93_spill] sm:$0xff]  ;;  %v5255_v12 = vld [vmem:[#allocation95_spill] sm:$0xff] }
 0x276   : > { %2081 = vst [vmem:[%s4010_s12 + $0x390] sm:$0xff] %v5245_v28  ;;  %2082 = vst [vmem:[%s4010_s12 + $0x398] sm:$0xff] %v5246_v52 }
 0x277   : > { %2083 = vst [vmem:[%s4010_s12 + $0x3a0] sm:$0xff] %v5247_v54  ;;  %2084 = vst [vmem:[%s4010_s12 + $0x3a8] sm:$0xff] %v5248_v50 }
 0x278   : > { %2085 = vst [vmem:[%s4010_s12 + $0x3b0] sm:$0xff] %v5249_v46  ;;  %2086 = vst [vmem:[%s4010_s12 + $0x3b8] sm:$0xff] %v5250_v58 }
 0x279   : > { %2087 = vst [vmem:[%s4010_s12 + $0x3c0] sm:$0xff] %v5251_v42  ;;  %2088 = vst [vmem:[%s4010_s12 + $0x3c8] sm:$0xff] %v5252_v62 }
 0x27a   : > { %2089 = vst [vmem:[%s4010_s12 + $0x3d0] sm:$0xff] %v5253_v37  ;;  %2090 = vst [vmem:[%s4010_s12 + $0x3d8] sm:$0xff] %v5254_v38 }
 0x27b   : > { %2091 = vst [vmem:[%s4010_s12 + $0x3e0] sm:$0xff] %v5255_v12  ;;  %2092 = vst [vmem:[%s4010_s12 + $0x3e8] sm:$0xff] %v3992_v19 }
 0x27c   : > { %2093 = vst [vmem:[%s4010_s12 + $0x3f0] sm:$0xff] %v3998_v35  ;;  %2094 = vst [vmem:[%s4010_s12 + $0x3f8] sm:$0xff] %v4004_v3 }
 0x27d PF: > { %2098 = sbr.rel (%p1962_p6) target bundleno = 701 (0x2bd), region = 60  ;;  %2099 = vst [vmem:[%s4013_s9] sm:$0xff] (!%p1962_p6), %v3623_v41  ;;  %2100 = vst [vmem:[%s4013_s9 + $0x8] sm:$0xff] (!%p1962_p6), %v3629_v45  ;;  %v5256_v41 = vld [vmem:[#allocation74_spill] sm:$0xff] (!%p1962_p6)  ;;  %v5257_v45 = vld [vmem:[#allocation76_spill] sm:$0xff] (!%p1962_p6) }
 0x27e   : > { %2101 = vst [vmem:[%s4013_s9 + $0x10] sm:$0xff] (!%p1962_p6), %v3635_v49  ;;  %2102 = vst [vmem:[%s4013_s9 + $0x18] sm:$0xff] (!%p1962_p6), %v3641_v53  ;;  %v5258_v49 = vld [vmem:[#allocation78_spill] sm:$0xff] (!%p1962_p6)  ;;  %v5259_v53 = vld [vmem:[#allocation80_spill] sm:$0xff] (!%p1962_p6) }
 0x27f   : > { %2103 = vst [vmem:[%s4013_s9 + $0x20] sm:$0xff] (!%p1962_p6), %v3647_v57  ;;  %2104 = vst [vmem:[%s4013_s9 + $0x28] sm:$0xff] (!%p1962_p6), %v3653_v61  ;;  %v5260_v57 = vld [vmem:[#allocation82_spill] sm:$0xff] (!%p1962_p6)  ;;  %v5261_v61 = vld [vmem:[#allocation84_spill] sm:$0xff] (!%p1962_p6) }
 0x280   : > { %2105 = vst [vmem:[%s4013_s9 + $0x30] sm:$0xff] (!%p1962_p6), %v3659_v1  ;;  %2106 = vst [vmem:[%s4013_s9 + $0x38] sm:$0xff] (!%p1962_p6), %v3665_v5  ;;  %v5262_v1 = vld [vmem:[#allocation86_spill] sm:$0xff] (!%p1962_p6)  ;;  %v5263_v5 = vld [vmem:[#allocation88_spill] sm:$0xff] (!%p1962_p6) }
 0x281   : > { %2107 = vst [vmem:[%s4013_s9 + $0x40] sm:$0xff] (!%p1962_p6), %v3671_v9  ;;  %2108 = vst [vmem:[%s4013_s9 + $0x48] sm:$0xff] (!%p1962_p6), %v3677_v13  ;;  %v5264_v9 = vld [vmem:[#allocation90_spill] sm:$0xff] (!%p1962_p6)  ;;  %v5265_v13 = vld [vmem:[#allocation92_spill] sm:$0xff] (!%p1962_p6) }
 0x282   : > { %2109 = vst [vmem:[%s4013_s9 + $0x50] sm:$0xff] (!%p1962_p6), %v3683_v17  ;;  %2110 = vst [vmem:[%s4013_s9 + $0x58] sm:$0xff] (!%p1962_p6), %v3689_v21  ;;  %v5266_v17 = vld [vmem:[#allocation94_spill] sm:$0xff] (!%p1962_p6)  ;;  %v5267_v21 = vld [vmem:[#allocation96_spill] sm:$0xff] (!%p1962_p6) }
 0x283   : > { %2111 = vst [vmem:[%s4013_s9 + $0x60] sm:$0xff] (!%p1962_p6), %v3695_v25  ;;  %2112 = vst [vmem:[%s4013_s9 + $0x68] sm:$0xff] (!%p1962_p6), %v3701_v29  ;;  %v5268_v25 = vld [vmem:[#allocation97_spill] sm:$0xff] (!%p1962_p6)  ;;  %v5269_v29 = vld [vmem:[#allocation98_spill] sm:$0xff] (!%p1962_p6) }
 0x284   : > { %2113 = vst [vmem:[%s4013_s9 + $0x70] sm:$0xff] %v3707_v33  ;;  %2114 = vst [vmem:[%s4013_s9 + $0x78] sm:$0xff] %v3713_v39  ;;  %v5270_v33 = vld [vmem:[#allocation24_spill] sm:$0xff]  ;;  %v5271_v39 = vld [vmem:[#allocation25_spill] sm:$0xff] }
 0x285   : > { %2115 = vst [vmem:[%s4013_s9 + $0x80] sm:$0xff] %v3719_v47  ;;  %2116 = vst [vmem:[%s4013_s9 + $0x88] sm:$0xff] %v3725_v55  ;;  %v5272_v47 = vld [vmem:[#allocation26_spill] sm:$0xff]  ;;  %v5273_v55 = vld [vmem:[#allocation27_spill] sm:$0xff] }
 0x286   : > { %2117 = vst [vmem:[%s4013_s9 + $0x90] sm:$0xff] %v3731_v63  ;;  %2118 = vst [vmem:[%s4013_s9 + $0x98] sm:$0xff] %v3737_v7  ;;  %v5274_v63 = vld [vmem:[#allocation28_spill] sm:$0xff]  ;;  %v5275_v7 = vld [vmem:[#allocation29_spill] sm:$0xff] }
 0x287   : > { %2119 = vst [vmem:[%s4013_s9 + $0xa0] sm:$0xff] %v3743_v15  ;;  %2120 = vst [vmem:[%s4013_s9 + $0xa8] sm:$0xff] %v3749_v23  ;;  %v5276_v15 = vld [vmem:[#allocation30_spill] sm:$0xff]  ;;  %v5277_v23 = vld [vmem:[#allocation31_spill] sm:$0xff] }
 0x288   : > { %2121 = vst [vmem:[%s4013_s9 + $0xb0] sm:$0xff] %v3755_v31  ;;  %2122 = vst [vmem:[%s4013_s9 + $0xb8] sm:$0xff] %v3761_v43  ;;  %v5278_v31 = vld [vmem:[#allocation32_spill] sm:$0xff]  ;;  %v5279_v43 = vld [vmem:[#allocation33_spill] sm:$0xff] }
 0x289   : > { %2123 = vst [vmem:[%s4013_s9 + $0xc0] sm:$0xff] %v3767_v59  ;;  %2124 = vst [vmem:[%s4013_s9 + $0xc8] sm:$0xff] %v3773_v11  ;;  %v5280_v59 = vld [vmem:[#allocation34_spill] sm:$0xff]  ;;  %v5281_v11 = vld [vmem:[#allocation35_spill] sm:$0xff] }
 0x28a   : > { %2125 = vst [vmem:[%s4013_s9 + $0xd0] sm:$0xff] %v3779_v27  ;;  %2126 = vst [vmem:[%s4013_s9 + $0xd8] sm:$0xff] %v3785_v51  ;;  %v5282_v27 = vld [vmem:[#allocation36_spill] sm:$0xff]  ;;  %v5283_v51 = vld [vmem:[#allocation37_spill] sm:$0xff] }
 0x28b   : > { %2127 = vst [vmem:[%s4013_s9 + $0xe0] sm:$0xff] %v3791_v4  ;;  %2128 = vst [vmem:[%s4013_s9 + $0xe8] sm:$0xff] %v3797_v20  ;;  %v5284_v4 = vld [vmem:[#allocation38_spill] sm:$0xff]  ;;  %v5285_v20 = vld [vmem:[#allocation39_spill] sm:$0xff] }
 0x28c   : > { %2129 = vst [vmem:[%s4013_s9 + $0xf0] sm:$0xff] %v3803_v36  ;;  %2130 = vst [vmem:[%s4013_s9 + $0xf8] sm:$0xff] %v3809_v60  ;;  %v5286_v36 = vld [vmem:[#allocation40_spill] sm:$0xff]  ;;  %v5287_v60 = vld [vmem:[#allocation41_spill] sm:$0xff] }
 0x28d   : > { %2131 = vst [vmem:[%s4013_s9 + $0x100] sm:$0xff] %v3815_v44  ;;  %2132 = vst [vmem:[%s4013_s9 + $0x108] sm:$0xff] %v3821_v32  ;;  %v5288_v44 = vld [vmem:[#allocation42_spill] sm:$0xff]  ;;  %v5289_v32 = vld [vmem:[#allocation43_spill] sm:$0xff] }
 0x28e   : > { %2133 = vst [vmem:[%s4013_s9 + $0x110] sm:$0xff] %v3827_v24  ;;  %2134 = vst [vmem:[%s4013_s9 + $0x118] sm:$0xff] %v3833_v16  ;;  %v5290_v24 = vld [vmem:[#allocation44_spill] sm:$0xff]  ;;  %v5291_v16 = vld [vmem:[#allocation45_spill] sm:$0xff] }
 0x28f   : > { %2135 = vst [vmem:[%s4013_s9 + $0x120] sm:$0xff] %v3839_v8  ;;  %2136 = vst [vmem:[%s4013_s9 + $0x128] sm:$0xff] %v3845_v0  ;;  %v5292_v8 = vld [vmem:[#allocation46_spill] sm:$0xff]  ;;  %v5293_v0 = vld [vmem:[#allocation47_spill] sm:$0xff] }
 0x290   : > { %2137 = vst [vmem:[%s4013_s9 + $0x130] sm:$0xff] %v3851_v56  ;;  %2138 = vst [vmem:[%s4013_s9 + $0x138] sm:$0xff] %v3857_v48  ;;  %v5294_v56 = vld [vmem:[#allocation48_spill] sm:$0xff]  ;;  %v5295_v48 = vld [vmem:[#allocation49_spill] sm:$0xff] }
 0x291   : > { %2139 = vst [vmem:[%s4013_s9 + $0x140] sm:$0xff] %v3863_v40  ;;  %2140 = vst [vmem:[%s4013_s9 + $0x148] sm:$0xff] %v3869_v34  ;;  %v5296_v40 = vld [vmem:[#allocation50_spill] sm:$0xff]  ;;  %v5297_v34 = vld [vmem:[#allocation51_spill] sm:$0xff] }
 0x292   : > { %2141 = vst [vmem:[%s4013_s9 + $0x150] sm:$0xff] %v3875_v30  ;;  %2142 = vst [vmem:[%s4013_s9 + $0x158] sm:$0xff] %v3881_v26  ;;  %v5298_v30 = vld [vmem:[#allocation52_spill] sm:$0xff]  ;;  %v5299_v26 = vld [vmem:[#allocation53_spill] sm:$0xff] }
 0x293   : > { %2143 = vst [vmem:[%s4013_s9 + $0x160] sm:$0xff] %v3887_v22  ;;  %2144 = vst [vmem:[%s4013_s9 + $0x168] sm:$0xff] %v3893_v18  ;;  %v5300_v22 = vld [vmem:[#allocation54_spill] sm:$0xff]  ;;  %v5301_v18 = vld [vmem:[#allocation55_spill] sm:$0xff] }
 0x294   : > { %2145 = vst [vmem:[%s4013_s9 + $0x170] sm:$0xff] %v3899_v14  ;;  %2146 = vst [vmem:[%s4013_s9 + $0x178] sm:$0xff] %v3905_v10  ;;  %v5302_v14 = vld [vmem:[#allocation56_spill] sm:$0xff]  ;;  %v5303_v10 = vld [vmem:[#allocation57_spill] sm:$0xff] }
 0x295   : > { %2147 = vst [vmem:[%s4013_s9 + $0x180] sm:$0xff] %v3911_v6  ;;  %2148 = vst [vmem:[%s4013_s9 + $0x188] sm:$0xff] %v3917_v2  ;;  %v5304_v6 = vld [vmem:[#allocation58_spill] sm:$0xff]  ;;  %v5305_v2 = vld [vmem:[#allocation59_spill] sm:$0xff] }
 0x296   : > { %2149 = vst [vmem:[%s4013_s9 + $0x190] sm:$0xff] %v5256_v41  ;;  %2150 = vst [vmem:[%s4013_s9 + $0x198] sm:$0xff] %v5257_v45  ;;  %v5306_v28 = vld [vmem:[#allocation60_spill] sm:$0xff]  ;;  %v5307_v52 = vld [vmem:[#allocation61_spill] sm:$0xff] }
 0x297   : > { %2151 = vst [vmem:[%s4013_s9 + $0x1a0] sm:$0xff] %v5258_v49  ;;  %2152 = vst [vmem:[%s4013_s9 + $0x1a8] sm:$0xff] %v5259_v53  ;;  %v5308_v54 = vld [vmem:[#allocation62_spill] sm:$0xff]  ;;  %v5309_v50 = vld [vmem:[#allocation63_spill] sm:$0xff] }
 0x298   : > { %2153 = vst [vmem:[%s4013_s9 + $0x1b0] sm:$0xff] %v5260_v57  ;;  %2154 = vst [vmem:[%s4013_s9 + $0x1b8] sm:$0xff] %v5261_v61  ;;  %v5310_v46 = vld [vmem:[#allocation64_spill] sm:$0xff]  ;;  %v5311_v58 = vld [vmem:[#allocation65_spill] sm:$0xff] }
 0x299   : > { %2155 = vst [vmem:[%s4013_s9 + $0x1c0] sm:$0xff] %v5262_v1  ;;  %2156 = vst [vmem:[%s4013_s9 + $0x1c8] sm:$0xff] %v5263_v5  ;;  %v5312_v42 = vld [vmem:[#allocation66_spill] sm:$0xff]  ;;  %v5313_v62 = vld [vmem:[#allocation67_spill] sm:$0xff] }
 0x29a   : > { %2157 = vst [vmem:[%s4013_s9 + $0x1d0] sm:$0xff] %v5264_v9  ;;  %2158 = vst [vmem:[%s4013_s9 + $0x1d8] sm:$0xff] %v5265_v13  ;;  %v5314_v37 = vld [vmem:[#allocation68_spill] sm:$0xff]  ;;  %v5315_v38 = vld [vmem:[#allocation69_spill] sm:$0xff] }
 0x29b   : > { %2159 = vst [vmem:[%s4013_s9 + $0x1e0] sm:$0xff] %v5266_v17  ;;  %2160 = vst [vmem:[%s4013_s9 + $0x1e8] sm:$0xff] %v5267_v21  ;;  %v5316_v12 = vld [vmem:[#allocation70_spill] sm:$0xff]  ;;  %v5317_v41 = vld [vmem:[#allocation71_spill] sm:$0xff] }
 0x29c   : > { %2161 = vst [vmem:[%s4013_s9 + $0x1f0] sm:$0xff] %v5268_v25  ;;  %2162 = vst [vmem:[%s4013_s9 + $0x1f8] sm:$0xff] %v5269_v29  ;;  %v5318_v45 = vld [vmem:[#allocation72_spill] sm:$0xff]  ;;  %v5319_v49 = vld [vmem:[#allocation73_spill] sm:$0xff] }
 0x29d   : > { %2163 = vst [vmem:[%s4013_s9 + $0x200] sm:$0xff] %v5270_v33  ;;  %2164 = vst [vmem:[%s4013_s9 + $0x208] sm:$0xff] %v5271_v39  ;;  %v5320_v53 = vld [vmem:[#allocation75_spill] sm:$0xff]  ;;  %v5321_v57 = vld [vmem:[#allocation77_spill] sm:$0xff] }
 0x29e   : > { %2165 = vst [vmem:[%s4013_s9 + $0x210] sm:$0xff] %v5272_v47  ;;  %2166 = vst [vmem:[%s4013_s9 + $0x218] sm:$0xff] %v5273_v55  ;;  %v5322_v61 = vld [vmem:[#allocation79_spill] sm:$0xff]  ;;  %v5323_v1 = vld [vmem:[#allocation81_spill] sm:$0xff] }
 0x29f   : > { %2167 = vst [vmem:[%s4013_s9 + $0x220] sm:$0xff] %v5274_v63  ;;  %2168 = vst [vmem:[%s4013_s9 + $0x228] sm:$0xff] %v5275_v7  ;;  %v5324_v5 = vld [vmem:[#allocation83_spill] sm:$0xff]  ;;  %v5325_v9 = vld [vmem:[#allocation85_spill] sm:$0xff] }
 0x2a0   : > { %2169 = vst [vmem:[%s4013_s9 + $0x230] sm:$0xff] %v5276_v15  ;;  %2170 = vst [vmem:[%s4013_s9 + $0x238] sm:$0xff] %v5277_v23  ;;  %v5326_v13 = vld [vmem:[#allocation87_spill] sm:$0xff]  ;;  %v5327_v17 = vld [vmem:[#allocation89_spill] sm:$0xff] }
 0x2a1   : > { %2171 = vst [vmem:[%s4013_s9 + $0x240] sm:$0xff] %v5278_v31  ;;  %2172 = vst [vmem:[%s4013_s9 + $0x248] sm:$0xff] %v5279_v43  ;;  %v5328_v21 = vld [vmem:[#allocation91_spill] sm:$0xff]  ;;  %v5329_v25 = vld [vmem:[#allocation93_spill] sm:$0xff] }
 0x2a2   : > { %2173 = vst [vmem:[%s4013_s9 + $0x250] sm:$0xff] %v5280_v59  ;;  %2174 = vst [vmem:[%s4013_s9 + $0x258] sm:$0xff] %v5281_v11  ;;  %v5330_v29 = vld [vmem:[#allocation95_spill] sm:$0xff] }
 0x2a3   : > { %2175 = vst [vmem:[%s4013_s9 + $0x260] sm:$0xff] %v5282_v27  ;;  %2176 = vst [vmem:[%s4013_s9 + $0x268] sm:$0xff] %v5283_v51 }
 0x2a4   : > { %2177 = vst [vmem:[%s4013_s9 + $0x270] sm:$0xff] %v5284_v4  ;;  %2178 = vst [vmem:[%s4013_s9 + $0x278] sm:$0xff] %v5285_v20 }
 0x2a5   : > { %2179 = vst [vmem:[%s4013_s9 + $0x280] sm:$0xff] %v5286_v36  ;;  %2180 = vst [vmem:[%s4013_s9 + $0x288] sm:$0xff] %v5287_v60 }
 0x2a6   : > { %2181 = vst [vmem:[%s4013_s9 + $0x290] sm:$0xff] %v5288_v44  ;;  %2182 = vst [vmem:[%s4013_s9 + $0x298] sm:$0xff] %v5289_v32 }
 0x2a7   : > { %2183 = vst [vmem:[%s4013_s9 + $0x2a0] sm:$0xff] %v5290_v24  ;;  %2184 = vst [vmem:[%s4013_s9 + $0x2a8] sm:$0xff] %v5291_v16 }
 0x2a8   : > { %2185 = vst [vmem:[%s4013_s9 + $0x2b0] sm:$0xff] %v5292_v8  ;;  %2186 = vst [vmem:[%s4013_s9 + $0x2b8] sm:$0xff] %v5293_v0 }
 0x2a9   : > { %2187 = vst [vmem:[%s4013_s9 + $0x2c0] sm:$0xff] %v5294_v56  ;;  %2188 = vst [vmem:[%s4013_s9 + $0x2c8] sm:$0xff] %v5295_v48 }
 0x2aa   : > { %2189 = vst [vmem:[%s4013_s9 + $0x2d0] sm:$0xff] %v5296_v40  ;;  %2190 = vst [vmem:[%s4013_s9 + $0x2d8] sm:$0xff] %v5297_v34 }
 0x2ab   : > { %2191 = vst [vmem:[%s4013_s9 + $0x2e0] sm:$0xff] %v5298_v30  ;;  %2192 = vst [vmem:[%s4013_s9 + $0x2e8] sm:$0xff] %v5299_v26 }
 0x2ac   : > { %2193 = vst [vmem:[%s4013_s9 + $0x2f0] sm:$0xff] %v5300_v22  ;;  %2194 = vst [vmem:[%s4013_s9 + $0x2f8] sm:$0xff] %v5301_v18 }
 0x2ad   : > { %2195 = vst [vmem:[%s4013_s9 + $0x300] sm:$0xff] %v5302_v14  ;;  %2196 = vst [vmem:[%s4013_s9 + $0x308] sm:$0xff] %v5303_v10 }
 0x2ae   : > { %2197 = vst [vmem:[%s4013_s9 + $0x310] sm:$0xff] %v5304_v6  ;;  %2198 = vst [vmem:[%s4013_s9 + $0x318] sm:$0xff] %v5305_v2 }
 0x2af   : > { %2199 = vst [vmem:[%s4013_s9 + $0x320] sm:$0xff] %v5306_v28  ;;  %2200 = vst [vmem:[%s4013_s9 + $0x328] sm:$0xff] %v5307_v52 }
 0x2b0   : > { %2201 = vst [vmem:[%s4013_s9 + $0x330] sm:$0xff] %v5308_v54  ;;  %2202 = vst [vmem:[%s4013_s9 + $0x338] sm:$0xff] %v5309_v50 }
 0x2b1   : > { %2203 = vst [vmem:[%s4013_s9 + $0x340] sm:$0xff] %v5310_v46  ;;  %2204 = vst [vmem:[%s4013_s9 + $0x348] sm:$0xff] %v5311_v58 }
 0x2b2   : > { %2205 = vst [vmem:[%s4013_s9 + $0x350] sm:$0xff] %v5312_v42  ;;  %2206 = vst [vmem:[%s4013_s9 + $0x358] sm:$0xff] %v5313_v62 }
 0x2b3   : > { %2207 = vst [vmem:[%s4013_s9 + $0x360] sm:$0xff] %v5314_v37  ;;  %2208 = vst [vmem:[%s4013_s9 + $0x368] sm:$0xff] %v5315_v38 }
 0x2b4   : > { %2209 = vst [vmem:[%s4013_s9 + $0x370] sm:$0xff] %v5316_v12  ;;  %2210 = vst [vmem:[%s4013_s9 + $0x378] sm:$0xff] %v5317_v41 }
 0x2b5   : > { %2211 = vst [vmem:[%s4013_s9 + $0x380] sm:$0xff] %v5318_v45  ;;  %2212 = vst [vmem:[%s4013_s9 + $0x388] sm:$0xff] %v5319_v49 }
 0x2b6   : > { %2213 = vst [vmem:[%s4013_s9 + $0x390] sm:$0xff] %v5320_v53  ;;  %2214 = vst [vmem:[%s4013_s9 + $0x398] sm:$0xff] %v5321_v57 }
 0x2b7   : > { %2215 = vst [vmem:[%s4013_s9 + $0x3a0] sm:$0xff] %v5322_v61  ;;  %2216 = vst [vmem:[%s4013_s9 + $0x3a8] sm:$0xff] %v5323_v1 }
 0x2b8   : > { %2217 = vst [vmem:[%s4013_s9 + $0x3b0] sm:$0xff] %v5324_v5  ;;  %2218 = vst [vmem:[%s4013_s9 + $0x3b8] sm:$0xff] %v5325_v9 }
 0x2b9   : > { %2219 = vst [vmem:[%s4013_s9 + $0x3c0] sm:$0xff] %v5326_v13  ;;  %2220 = vst [vmem:[%s4013_s9 + $0x3c8] sm:$0xff] %v5327_v17 }
 0x2ba   : > { %2221 = vst [vmem:[%s4013_s9 + $0x3d0] sm:$0xff] %v5328_v21  ;;  %2222 = vst [vmem:[%s4013_s9 + $0x3d8] sm:$0xff] %v5329_v25 }
 0x2bb   : > { %2223 = vst [vmem:[%s4013_s9 + $0x3e0] sm:$0xff] %v5330_v29  ;;  %2224 = vst [vmem:[%s4013_s9 + $0x3e8] sm:$0xff] %v3992_v19 }
 0x2bc   : > { %2225 = vst [vmem:[%s4013_s9 + $0x3f0] sm:$0xff] %v3998_v35  ;;  %2226 = vst [vmem:[%s4013_s9 + $0x3f8] sm:$0xff] %v4004_v3 }
 0x2bd PF: > { %s2232_s14 = sand.u32 1, %s3205_s7   ;;  %s2577_s0 = sshll.u32 %s3080_s28, 14 }
 0x2be   : > { %s2280_s17 = sshll.u32 %s4010_s12, 4  ;;  %s5331_s18 = sld [smem:[#allocation103_spill]]  ;;  %s4803_s17 = int_to_ptr.vmem [resolvable:$true] %s2280_s17 }
 0x2bf   : > { %s4805_s5 = scalar_lea.sflag [#allocation10], %s2232_s14  ;;  %s2882_s21 = scalar_lea.vmem %s4803_s17, 16384 }
 0x2c0   : > { %p2883_p9 = scmp.ne.s32.totalorder %s4803_s17, %s2882_s21  ;;  %p5333_p12 = scmp.ne.s32.totalorder %s5015_s3, 0 }
 0x2c1   : > { %s3099_s7 = smov [#allocation9]  }
 0x2c2   : > { %p2884_p1 = pnand %p2883_p9, %p5333_p12  ;;  %s2886_s12 = sshll.u32 %s3099_s7, 4  ;;  %s2887_s12 = int_to_ptr.vmem [resolvable:$false] %s2886_s12 }
 0x2c3   : > { %s2888_s13 = scalar_lea.vmem %s2887_s12, 32768  ;;  %p2889_p11 = scmp.lt.s32.totalorder %s4803_s17, %s2887_s12 }
 0x2c4   : > { %s5332_s4 = smov %s5331_s18  ;;  %s4801_s8 = scalar_lea.hbm %s5331_s18, %s2577_s0 }
 0x2c5   : > { %p2885_p2 = pneg %p2884_p1  ;;  %p2890_p4 = scmp.lt.s32.totalorder %s2888_s13, %s2882_s21 }
 0x2c7   : > { %p2891_p10 = por %p2890_p4, %p2889_p11 }
 0x2c9   : > { %p2892_p13 = pnand %p2891_p10, %p2885_p2 }
 0x2cb   : > { %2895 = shalt.err (!%p2892_p13)
}
 0x2cc   : > { %s2896_s14 = scalar_lea.hbm %s4801_s8, 16384  ;;  %s2900_s18 = scalar_lea.hbm %s5332_s4, 32768 }
 0x2cd   : > { %p2897_p7 = scmp.ne.s32.totalorder %s4801_s8, %s2896_s14  ;;  %p2901_p3 = scmp.lt.u32.totalorder %s4801_s8, %s5332_s4 }
 0x2ce   : > { %p2902_p6 = scmp.lt.u32.totalorder %s2900_s18, %s2896_s14  ;;  %p2904_p9 = scmp.lt.u32.totalorder %s2896_s14, %s4801_s8 }
 0x2cf   : > { %p2898_p0 = pnand %p2897_p7, %p5333_p12 }
 0x2d0   : > { %p2903_p5 = por %p2902_p6, %p2901_p3 }
 0x2d1   : > { %p2899_p8 = pneg %p2898_p0 }
 0x2d2   : > { %p2905_p1 = por %p2904_p9, %p2903_p5 }
 0x2d4   : > { %p2906_p2 = pnand %p2905_p1, %p2899_p8 }
 0x2d6   : > { %2909 = shalt.err (!%p2906_p2)
}
 0x2d7   : > { %s4995_s13 = smov 256   ;;  %s4997_s21 = smov 16  }
 0x2d8   : > { %2681 = dma.vmem_to_hbm [thread:$0]  (%p5333_p12), %s4803_s17, 16384, %s4801_s8, %s4805_s5, %s4995_s13, %s4995_s13, %s4997_s21  }
 0x2d9   : > { %s5334_s14 = sld [smem:[#allocation22_spill]]  ;;  %p2245_p11 = scmp.lt.s32.totalorder %s3076_s27, 0 }
 0x2da   : > { %s2575_s24 = sshll.u32 %s3080_s28, 7  ;;  %s2256_s16 = sshll.u32 %s4007_s15, 4  ;;  %s4844_s16 = int_to_ptr.vmem [resolvable:$true] %s2256_s16 }
 0x2db   : > { %s5371_s27 = smov (!%p2245_p11, %s3076_s27), 0  ;;  %s5335_s12 = sld [smem:[#allocation104_spill]] }
 0x2dc   : > { %s2304_s2 = sshll.u32 %s4013_s9, 4  ;;  %s2547_s4 = sshll.u32 %s5371_s27, 1  ;;  %s4846_s2 = int_to_ptr.vmem [resolvable:$true] %s2304_s2 }
 0x2dd   : > { %s2253_s29 = sadd.s32 %s2575_s24, %s2547_s4  ;;  %s5336_s13 = sld [smem:[#allocation102_spill]] }
 0x2de   : > { %s2549_s17 = sshll.u32 %s2253_s29, 7  ;;  %s5337_s21 = sand.u32 1, %s3044_s19  }
 0x2df   : > { %s4855_s18 = scalar_lea.sflag [#allocation5], %s5337_s21  ;;  %p5338_p10 = scmp.ne.s32.totalorder %s5334_s14, 0 }
 0x2e0   : > { %s3102_s27 = smov [#allocation8]  }
 0x2e1   : > { %s4841_s1 = scalar_lea.hbm %s5335_s12, %s2577_s0  ;;  %s2910_s0 = scalar_lea.vmem %s4844_s16, 16384 }
 0x2e2   : > { %p2911_p4 = scmp.ne.s32.totalorder %s4844_s16, %s2910_s0  ;;  %s2914_s9 = sshll.u32 %s3102_s27, 4  ;;  %s2915_s9 = int_to_ptr.vmem [resolvable:$false] %s2914_s9 }
 0x2e3   : > { %s4851_s28 = scalar_lea.hbm %s5336_s13, %s2549_s17  ;;  %s2916_s4 = scalar_lea.vmem %s2915_s9, 32768 }
 0x2e4   : > { %p2912_p13 = pnand %p2911_p4, %p5338_p10  ;;  %p2917_p0 = scmp.lt.s32.totalorder %s4844_s16, %s2915_s9 }
 0x2e5   : > { %p2918_p8 = scmp.lt.s32.totalorder %s2916_s4, %s2910_s0 }
 0x2e6   : > { %p2913_p7 = pneg %p2912_p13 }
 0x2e7   : > { %p2919_p3 = por %p2918_p8, %p2917_p0 }
 0x2e9   : > { %p2920_p6 = pnand %p2919_p3, %p2913_p7 }
 0x2eb   : > { %2923 = shalt.err (!%p2920_p6)
}
 0x2ec   : > { %s2924_s29 = scalar_lea.hbm %s4851_s28, 16384  ;;  %s2928_s7 = scalar_lea.hbm %s5336_s13, 32768 }
 0x2ed   : > { %p2925_p5 = scmp.ne.s32.totalorder %s4851_s28, %s2924_s29  ;;  %p2929_p2 = scmp.lt.u32.totalorder %s4851_s28, %s5336_s13 }
 0x2ee   : > { %p2930_p11 = scmp.lt.u32.totalorder %s2928_s7, %s2924_s29  ;;  %p2932_p13 = scmp.lt.u32.totalorder %s2924_s29, %s4851_s28 }
 0x2ef   : > { %p2926_p9 = pnand %p2925_p5, %p5338_p10 }
 0x2f0   : > { %p2931_p4 = por %p2930_p11, %p2929_p2 }
 0x2f1   : > { %p2927_p1 = pneg %p2926_p9 }
 0x2f2   : > { %p2933_p7 = por %p2932_p13, %p2931_p4 }
 0x2f4   : > { %p2934_p0 = pnand %p2933_p7, %p2927_p1 }
 0x2f6   : > { %2937 = shalt.err (!%p2934_p0)
}
 0x2f7   : > { %s5339_s15 = smov 16   ;;  %s5340_s0 = smov 256  }
 0x2f8   : > { %2680 = dma.vmem_to_hbm [thread:$0]  (%p5338_p10), %s4844_s16, 16384, %s4851_s28, %s4855_s18, %s5340_s0, %s5340_s0, %s5339_s15  }
 0x2f9   : > { %s2938_s27 = scalar_lea.vmem %s4846_s2, 16384  ;;  %s3103_s9 = smov [#allocation11]  }
 0x2fa   : > { %p2939_p8 = scmp.ne.s32.totalorder %s4846_s2, %s2938_s27  ;;  %s2942_s4 = sshll.u32 %s3103_s9, 4  ;;  %s2943_s4 = int_to_ptr.vmem [resolvable:$false] %s2942_s4 }
 0x2fb   : > { %s2944_s14 = scalar_lea.vmem %s2943_s4, 32768  ;;  %p2945_p5 = scmp.lt.s32.totalorder %s4846_s2, %s2943_s4 }
 0x2fc   : > { %p2940_p3 = pnand %p2939_p8, %p5333_p12  ;;  %p2946_p9 = scmp.lt.s32.totalorder %s2944_s14, %s2938_s27 }
 0x2fe   : > { %p2941_p6 = pneg %p2940_p3  ;;  %p2947_p1 = por %p2946_p9, %p2945_p5 }
 0x300   : > { %p2948_p2 = pnand %p2947_p1, %p2941_p6 }
 0x302   : > { %2951 = shalt.err (!%p2948_p2)
}
 0x303   : > { %s2952_s16 = scalar_lea.hbm %s4841_s1, 16384  ;;  %s2956_s29 = scalar_lea.hbm %s5335_s12, 32768 }
 0x304   : > { %p2953_p10 = scmp.ne.s32.totalorder %s4841_s1, %s2952_s16  ;;  %p2957_p13 = scmp.lt.u32.totalorder %s4841_s1, %s5335_s12 }
 0x305   : > { %p2958_p7 = scmp.lt.u32.totalorder %s2956_s29, %s2952_s16  ;;  %p2960_p8 = scmp.lt.u32.totalorder %s2952_s16, %s4841_s1 }
 0x306   : > { %p2954_p11 = pnand %p2953_p10, %p5333_p12 }
 0x307   : > { %p2959_p0 = por %p2958_p7, %p2957_p13 }
 0x308   : > { %p2955_p4 = pneg %p2954_p11 }
 0x309   : > { %p2961_p3 = por %p2960_p8, %p2959_p0 }
 0x30b   : > { %p2962_p6 = pnand %p2961_p3, %p2955_p4 }
 0x30d   : > { %2965 = shalt.err (!%p2962_p6)
}
 0x30e   : > { %2682 = dma.vmem_to_hbm [thread:$0]  (%p5333_p12), %s4846_s2, 16384, %s4841_s1, %s4805_s5, %s5340_s0, %s5340_s0, %s5339_s15  }
 0x30f PF: > { %s5341_s7 = sld [smem:[#allocation16_spill]]  ;;  %s5342_s17 = sld [smem:[#allocation23_spill]] }
 0x310   : > { %p2704_p5 = scmp.ge.s32.totalorder %s3092_s6, 2 }
 0x315   : > { %s2319_s8 = sand.u32 1, %s5341_s7   ;;  %p5343_p9 = scmp.ne.s32.totalorder %s5342_s17, 0 }
 0x316   : > { %s2320_s27 = scalar_lea.sflag [#allocation5], %s2319_s8 }
 0x317   : > { %p2694_p1 = pnand %p2704_p5, %p5343_p9 }
 0x319   : > { %3031 = dma.done.wait (!%p2694_p1), %s2320_s27, 16384  }
 0x31a   : > { %3033 = vsyncadd (!%p2694_p1), %s2320_s27, 4294950912  ;;  %s5344_s3 = sadd.s32 4294967294, %s3092_s6   ;;  %p5345_p2 = scmp.ne.s32.totalorder %s5018_s11, 0 }
 0x31b   : > { %s2328_s9 = sand.u32 1, %s5344_s3  }
 0x31c   : > { %p2697_p10 = pnand %p2704_p5, %p5345_p2  ;;  %s2329_s4 = scalar_lea.sflag [#allocation10], %s2328_s9 }
 0x31e   : > { %3035 = dma.done.wait (!%p2697_p10), %s2329_s4, 32768  }
 0x31f   : > { %3037 = vsyncadd (!%p2697_p10), %s2329_s4, 4294934528  ;;  %s28_s6 = sadd.s32 1, %s3092_s6   ;;  %s5347_s2 = sld [smem:[#allocation21_spill]] }
 0x320   : > { %p4916_p12 = scmp.ge.s32.totalorder %s28_s6, 8   ;;  %s5348_s27 = sld [smem:[#allocation17_spill]] }
 0x321   : > { %s5349_s28 = sld [smem:[#allocation18_spill]]  ;;  %s5350_s29 = sld [smem:[#allocation19_spill]] }
 0x322   : > { %s5351_s11 = sld [smem:[#allocation20_spill]]  ;;  %s5352_s18 = smov %s3044_s19 }
 0x323   : > { %s5353_s19 = smov %s3048_s20  ;;  %s5354_s20 = smov %s3276_s10 }
 0x324   : > { %s5355_s21 = smov %s3056_s22  ;;  %s5356_s22 = smov %s3060_s23 }
 0x325   : > { %s5357_s23 = smov %s3344_s30  ;;  %s5358_s24 = smov %s3068_s25 }
 0x326   : > { %s5359_s25 = smov %s3072_s26  ;;  %s5360_s26 = smov %s5347_s2 }
 0x327   :  { %27 = sbr.rel (!%p4916_p12) target bundleno = 21 (0x15), region = 145 }
 0x328   : > { %s5361_s30 = smov %s5351_s11 }
 0x32e   :  { %2343 = vsyncpa [#allocation4], 1 }
 0x32f   :  { %2345 = vsyncpa [#allocation4 + $0x1], 1 }
 0x330   :  { %2346 = vsyncpa [#allocation7], 1 }
 0x331   :  { %2348 = vsyncpa [#allocation7 + $0x1], 1 }
 0x332   :  { %2349 = vsyncpa [#allocation5], 1 }
 0x333   :  { %2351 = vsyncpa [#allocation5 + $0x1], 1 }
 0x334   :  { %2352 = vsyncpa [#allocation10], 1 }
 0x335   :  { %2354 = vsyncpa [#allocation10 + $0x1], 1 }

</bundles_post_ra>
